<compile_context>
chip_gen: v6e
topology: v6e:2x2x1
jax: 0.10.0
libtpu: 0.0.40
codegen_flags: <defaults>
</compile_context>

<pallas_src>
import functools

import jax
import jax.numpy as jnp
from jax import lax
from jax.experimental import pallas as pl
from jax.experimental.pallas import tpu as pltpu

EMB_DIMS = 512
# channel sizes fixed by the module: 3 -> 64 -> 64 -> 64 -> 128 -> EMB_DIMS
CHANNELS = (3, 64, 64, 64, 128, EMB_DIMS)
BN_EPS = 1e-5
MATMUL_DTYPE = jnp.bfloat16          # MXU dtype for layers 2-5


def _round_up(v, m):
    return (v + m - 1) // m * m


def _pointnet_kernel(x_ref,
                     w1_ref, w2_ref, w3_ref, w4_ref, w5_ref,
                     b1_ref, b2_ref, b3_ref, b4_ref, b5_ref,
                     o_ref, *, chunk, n_chunks):
    """One (batch, point-column tile) through all 5 conv1x1+BN+ReLU layers.

    The tile's point columns are processed in `chunk`-lane sub-tiles so the
    layer 1-4 intermediates ((64..128, chunk) f32) stay in vregs and each
    chunk's (512, chunk) result is written to the output tile immediately.
    """
    w1 = w1_ref[...]                                    # (64, 3) f32, resident

    def body(c, carry):
        start = pl.multiple_of(c * chunk, chunk)
        x = x_ref[0, :, pl.ds(start, chunk)].astype(jnp.float32)   # (3, chunk)

        # Layer 1 (cin=3) on the VPU: 3 broadcast multiply-adds, no MXU fill.
        h = jnp.maximum(
            w1[:, 0:1] * x[0:1, :]
            + w1[:, 1:2] * x[1:2, :]
            + w1[:, 2:3] * x[2:3, :]
            + b1_ref[...], 0.0)                         # (64, chunk) f32

        # Layers 2-5 on the MXU: bf16 operands, f32 accumulate, f32 bias+ReLU.
        for w_ref, b_ref in ((w2_ref, b2_ref), (w3_ref, b3_ref),
                             (w4_ref, b4_ref), (w5_ref, b5_ref)):
            y = jnp.dot(w_ref[...], h.astype(MATMUL_DTYPE),
                        preferred_element_type=jnp.float32)
            h = jnp.maximum(y + b_ref[...], 0.0)        # (cout, chunk) f32

        o_ref[0, :, pl.ds(start, chunk)] = h.astype(o_ref.dtype)
        return carry

    lax.fori_loop(0, n_chunks, body, 0, unroll=True)


def _fold_bn(weights, bn_scales, bn_biases):
    """Fold eval-mode BN scale into the conv weights (algebraically exact).

    Layer 1 stays f32 (VPU path); layers 2-5 are cast to bf16 for the MXU.
    Biases stay f32, shaped (cout, 1) for lane broadcast.
    """
    w_folded, b_folded = [], []
    for l, (w, s, b) in enumerate(zip(weights, bn_scales, bn_biases)):
        wf = w * s[:, None]
        if l > 0:
            wf = wf.astype(MATMUL_DTYPE)
        w_folded.append(wf)
        b_folded.append(b[:, None].astype(jnp.float32))
    return w_folded, b_folded


@functools.partial(jax.jit, static_argnames=("tn", "out_dtype"))
def pointnet_forward(x, weights, bn_scales, bn_biases, *, tn=1024,
                     out_dtype=jnp.bfloat16):
    """x: (B, 3, N) float32 NCW (like PyTorch).  Returns (B, EMB_DIMS, N)."""
    B, Cin, N = x.shape
    assert Cin == CHANNELS[0]
    assert tn % 128 == 0, "point tile must be a multiple of the 128-lane width"

    # Adapt the tile to small N and pad N so the lane dim stays 128-aligned.
    tn_eff = min(tn, _round_up(N, 128))
    n_pad = _round_up(N, tn_eff)
    if n_pad != N:
        x = jnp.pad(x, ((0, 0), (0, 0), (0, n_pad - N)))
    n_tiles = n_pad // tn_eff

    # In-kernel point sub-tile: 256 lanes keeps layer 1-4 intermediates in vregs.
    chunk = 256 if tn_eff % 256 == 0 else 128
    n_chunks = tn_eff // chunk

    w_folded, biases = _fold_bn(weights, bn_scales, bn_biases)

    in_specs = [pl.BlockSpec((1, Cin, tn_eff), lambda b, j: (b, 0, j))]
    operands = [x]
    for w in w_folded:                    # constant block index -> DMA'd once
        in_specs.append(pl.BlockSpec(w.shape, lambda b, j: (0, 0)))
        operands.append(w)
    for bias in biases:
        in_specs.append(pl.BlockSpec(bias.shape, lambda b, j: (0, 0)))
        operands.append(bias)

    ppt_flops = 2 * sum(ci * co for ci, co in zip(CHANNELS[:-1], CHANNELS[1:]))
    param_bytes = sum(int(a.size) * a.dtype.itemsize for a in w_folded + biases)
    out_bytes = B * n_pad * EMB_DIMS * jnp.dtype(out_dtype).itemsize
    cost = pl.CostEstimate(
        flops=B * n_pad * ppt_flops,
        transcendentals=0,
        bytes_accessed=B * n_pad * Cin * x.dtype.itemsize + out_bytes + param_bytes)

    kernel = functools.partial(_pointnet_kernel, chunk=chunk, n_chunks=n_chunks)

    out = pl.pallas_call(
        kernel,
        out_shape=jax.ShapeDtypeStruct((B, EMB_DIMS, n_pad), out_dtype),
        grid_spec=pltpu.PrefetchScalarGridSpec(
            num_scalar_prefetch=0,
            grid=(B, n_tiles),
            in_specs=in_specs,
            out_specs=pl.BlockSpec((1, EMB_DIMS, tn_eff), lambda b, j: (b, 0, j)),
        ),
        compiler_params=pltpu.CompilerParams(
            dimension_semantics=("parallel", "parallel"),
            vmem_limit_bytes=32 * 1024 * 1024),
        cost_estimate=cost,
    )(*operands)

    if n_pad != N:
        out = out[:, :, :N]
    return out


def init_params(key):
    """Deterministic synthetic parameters matching the module's shapes."""
    weights, bn_scales, bn_biases = [], [], []
    for l in range(5):
        cin, cout = CHANNELS[l], CHANNELS[l + 1]
        key, kw, kg, kb, km, kv = jax.random.split(key, 6)
        # torch conv weight (cout, cin, 1) -> (cout, cin)
        w = jax.random.normal(kw, (cout, cin), jnp.float32) * (1.0 / jnp.sqrt(cin))
        # BatchNorm params / running stats (eval mode), folded to scale/bias
        gamma = 1.0 + 0.1 * jax.random.normal(kg, (cout,), jnp.float32)
        beta = 0.1 * jax.random.normal(kb, (cout,), jnp.float32)
        rmean = 0.1 * jax.random.normal(km, (cout,), jnp.float32)
        rvar = jnp.abs(jax.random.normal(kv, (cout,), jnp.float32)) + 0.5
        scale = gamma / jnp.sqrt(rvar + BN_EPS)
        bias = beta - rmean * scale
        weights.append(w)
        bn_scales.append(scale)
        bn_biases.append(bias)
    return weights, bn_scales, bn_biases


def _reference_forward(x, weights, bn_scales, bn_biases, out_dtype=jnp.bfloat16):
    """Pure-JAX reference with the same numerics as the kernel: folded BN,
    layer 1 in f32, layers 2-5 bf16 matmuls with f32 accumulation, bf16 out."""
    w_folded, biases = _fold_bn(weights, bn_scales, bn_biases)
    h = x.astype(jnp.float32)                           # (B, 3, N)
    h = jnp.maximum(jnp.einsum("oc,bcn->bon", w_folded[0], h)
                    + biases[0][None], 0.0)
    for w, b in zip(w_folded[1:], biases[1:]):
        y = jnp.einsum("oc,bcn->bon", w, h.astype(MATMUL_DTYPE),
                       preferred_element_type=jnp.float32)
        h = jnp.maximum(y + b[None], 0.0)
    return h.astype(out_dtype)                          # (B, EMB_DIMS, N)


if __name__ == "__main__":
    key = jax.random.PRNGKey(0)
    key, kx = jax.random.split(key)

    B, N = 2, 896                     # small: 2 clouds x 896 points (pads to 1024)
    x = jax.random.normal(kx, (B, CHANNELS[0], N), jnp.float32)   # (B, 3, N)

    weights, bn_scales, bn_biases = init_params(key)

    # tn=512 -> grid (2, 2), two 256-lane in-kernel chunks/tile, plus N padding.
    out = pointnet_forward(x, weights, bn_scales, bn_biases, tn=512)
    out = jax.block_until_ready(out)

    ref = _reference_forward(x, weights, bn_scales, bn_biases)
    assert out.shape == (B, EMB_DIMS, N), out.shape
    assert out.dtype == jnp.bfloat16, out.dtype
    assert jnp.allclose(out.astype(jnp.float32), ref.astype(jnp.float32),
                        atol=2e-2, rtol=2e-2), "mismatch vs reference"

    print("KERNEL_OK")
</pallas_src>

<mosaic_0001>
module attributes {stable_mosaic.version = 11 : i64} {
  func.func @_pointnet_kernel(%arg0: i32, %arg1: i32, %arg2: memref<1x3x512xf32, #tpu.memory_space<vmem>>, %arg3: memref<64x3xf32, #tpu.memory_space<vmem>>, %arg4: memref<64x64xbf16, #tpu.memory_space<vmem>>, %arg5: memref<64x64xbf16, #tpu.memory_space<vmem>>, %arg6: memref<128x64xbf16, #tpu.memory_space<vmem>>, %arg7: memref<512x128xbf16, #tpu.memory_space<vmem>>, %arg8: memref<64x1xf32, #tpu.memory_space<vmem>>, %arg9: memref<64x1xf32, #tpu.memory_space<vmem>>, %arg10: memref<64x1xf32, #tpu.memory_space<vmem>>, %arg11: memref<128x1xf32, #tpu.memory_space<vmem>>, %arg12: memref<512x1xf32, #tpu.memory_space<vmem>>, %arg13: memref<1x512x512xbf16, #tpu.memory_space<vmem>>) attributes {dimension_semantics = [#tpu.dimension_semantics<parallel>, #tpu.dimension_semantics<parallel>], iteration_bounds = array<i64: 2, 2>, scalar_prefetch = 0 : i64, scratch_operands = 0 : i64, tpu.core_type = #tpu.core_type<tc>, window_params = [{transform_indices = @transform_0, window_bounds = array<i64: 1, 3, 512>}, {pipeline_mode = #tpu.pipeline_mode<synchronous>, transform_indices = @transform_1, window_bounds = array<i64: 64, 3>}, {pipeline_mode = #tpu.pipeline_mode<synchronous>, transform_indices = @transform_2, window_bounds = array<i64: 64, 64>}, {pipeline_mode = #tpu.pipeline_mode<synchronous>, transform_indices = @transform_3, window_bounds = array<i64: 64, 64>}, {pipeline_mode = #tpu.pipeline_mode<synchronous>, transform_indices = @transform_4, window_bounds = array<i64: 128, 64>}, {pipeline_mode = #tpu.pipeline_mode<synchronous>, transform_indices = @transform_5, window_bounds = array<i64: 512, 128>}, {pipeline_mode = #tpu.pipeline_mode<synchronous>, transform_indices = @transform_6, window_bounds = array<i64: 64, 1>}, {pipeline_mode = #tpu.pipeline_mode<synchronous>, transform_indices = @transform_7, window_bounds = array<i64: 64, 1>}, {pipeline_mode = #tpu.pipeline_mode<synchronous>, transform_indices = @transform_8, window_bounds = array<i64: 64, 1>}, {pipeline_mode = #tpu.pipeline_mode<synchronous>, transform_indices = @transform_9, window_bounds = array<i64: 128, 1>}, {pipeline_mode = #tpu.pipeline_mode<synchronous>, transform_indices = @transform_10, window_bounds = array<i64: 512, 1>}, {transform_indices = @transform_11, window_bounds = array<i64: 1, 512, 512>}]} {
    %c0 = arith.constant 0 : index
    %c0_0 = arith.constant 0 : index
    %0 = vector.load %arg3[%c0, %c0_0] : memref<64x3xf32, #tpu.memory_space<vmem>>, vector<64x3xf32>
    %c0_i32 = arith.constant 0 : i32
    %c256_i32 = arith.constant 256 : i32
    %1 = arith.muli %c0_i32, %c256_i32 : i32
    %2 = tpu.assume_multiple %1, 256 : i32
    %c0_1 = arith.constant 0 : index
    %c0_2 = arith.constant 0 : index
    %3 = arith.index_cast %2 : i32 to index
    %4 = vector.load %arg2[%c0_1, %c0_2, %3] : memref<1x3x512xf32, #tpu.memory_space<vmem>>, vector<1x3x256xf32>
    %5 = vector.shape_cast %4 : vector<1x3x256xf32> to vector<3x256xf32>
    %6 = vector.extract_strided_slice %0 {offsets = [0, 0], sizes = [64, 1], strides = [1, 1]} : vector<64x3xf32> to vector<64x1xf32>
    %7 = vector.extract_strided_slice %5 {offsets = [0, 0], sizes = [1, 256], strides = [1, 1]} : vector<3x256xf32> to vector<1x256xf32>
    %8 = vector.broadcast %6 : vector<64x1xf32> to vector<64x256xf32>
    %9 = vector.broadcast %7 : vector<1x256xf32> to vector<64x256xf32>
    %10 = arith.mulf %8, %9 : vector<64x256xf32>
    %11 = vector.extract_strided_slice %0 {offsets = [0, 1], sizes = [64, 1], strides = [1, 1]} : vector<64x3xf32> to vector<64x1xf32>
    %12 = vector.extract_strided_slice %5 {offsets = [1, 0], sizes = [1, 256], strides = [1, 1]} : vector<3x256xf32> to vector<1x256xf32>
    %13 = vector.broadcast %11 : vector<64x1xf32> to vector<64x256xf32>
    %14 = vector.broadcast %12 : vector<1x256xf32> to vector<64x256xf32>
    %15 = arith.mulf %13, %14 : vector<64x256xf32>
    %16 = arith.addf %10, %15 : vector<64x256xf32>
    %17 = vector.extract_strided_slice %0 {offsets = [0, 2], sizes = [64, 1], strides = [1, 1]} : vector<64x3xf32> to vector<64x1xf32>
    %18 = vector.extract_strided_slice %5 {offsets = [2, 0], sizes = [1, 256], strides = [1, 1]} : vector<3x256xf32> to vector<1x256xf32>
    %19 = vector.broadcast %17 : vector<64x1xf32> to vector<64x256xf32>
    %20 = vector.broadcast %18 : vector<1x256xf32> to vector<64x256xf32>
    %21 = arith.mulf %19, %20 : vector<64x256xf32>
    %22 = arith.addf %16, %21 : vector<64x256xf32>
    %c0_3 = arith.constant 0 : index
    %c0_4 = arith.constant 0 : index
    %23 = vector.load %arg8[%c0_3, %c0_4] : memref<64x1xf32, #tpu.memory_space<vmem>>, vector<64x1xf32>
    %24 = vector.broadcast %23 : vector<64x1xf32> to vector<64x256xf32>
    %25 = arith.addf %22, %24 : vector<64x256xf32>
    %cst = arith.constant 0.000000e+00 : f32
    %26 = vector.broadcast %cst : f32 to vector<64x256xf32>
    %27 = arith.maximumf %25, %26 : vector<64x256xf32>
    %c0_5 = arith.constant 0 : index
    %c0_6 = arith.constant 0 : index
    %28 = vector.load %arg4[%c0_5, %c0_6] : memref<64x64xbf16, #tpu.memory_space<vmem>>, vector<64x64xbf16>
    %29 = arith.truncf %27 : vector<64x256xf32> to vector<64x256xbf16>
    %cst_7 = arith.constant dense<0.000000e+00> : vector<64x256xf32>
    %30 = tpu.matmul %28, %29, %cst_7 {dimension_numbers = #tpu.dot_dimension_numbers<[1], [0], [0], [1], [0, 0, 1, 1], [], []>} : vector<64x64xbf16>, vector<64x256xbf16>, vector<64x256xf32> -> vector<64x256xf32>
    %c0_8 = arith.constant 0 : index
    %c0_9 = arith.constant 0 : index
    %31 = vector.load %arg9[%c0_8, %c0_9] : memref<64x1xf32, #tpu.memory_space<vmem>>, vector<64x1xf32>
    %32 = vector.broadcast %31 : vector<64x1xf32> to vector<64x256xf32>
    %33 = arith.addf %30, %32 : vector<64x256xf32>
    %cst_10 = arith.constant 0.000000e+00 : f32
    %34 = vector.broadcast %cst_10 : f32 to vector<64x256xf32>
    %35 = arith.maximumf %33, %34 : vector<64x256xf32>
    %c0_11 = arith.constant 0 : index
    %c0_12 = arith.constant 0 : index
    %36 = vector.load %arg5[%c0_11, %c0_12] : memref<64x64xbf16, #tpu.memory_space<vmem>>, vector<64x64xbf16>
    %37 = arith.truncf %35 : vector<64x256xf32> to vector<64x256xbf16>
    %cst_13 = arith.constant dense<0.000000e+00> : vector<64x256xf32>
    %38 = tpu.matmul %36, %37, %cst_13 {dimension_numbers = #tpu.dot_dimension_numbers<[1], [0], [0], [1], [0, 0, 1, 1], [], []>} : vector<64x64xbf16>, vector<64x256xbf16>, vector<64x256xf32> -> vector<64x256xf32>
    %c0_14 = arith.constant 0 : index
    %c0_15 = arith.constant 0 : index
    %39 = vector.load %arg10[%c0_14, %c0_15] : memref<64x1xf32, #tpu.memory_space<vmem>>, vector<64x1xf32>
    %40 = vector.broadcast %39 : vector<64x1xf32> to vector<64x256xf32>
    %41 = arith.addf %38, %40 : vector<64x256xf32>
    %cst_16 = arith.constant 0.000000e+00 : f32
    %42 = vector.broadcast %cst_16 : f32 to vector<64x256xf32>
    %43 = arith.maximumf %41, %42 : vector<64x256xf32>
    %c0_17 = arith.constant 0 : index
    %c0_18 = arith.constant 0 : index
    %44 = vector.load %arg6[%c0_17, %c0_18] : memref<128x64xbf16, #tpu.memory_space<vmem>>, vector<128x64xbf16>
    %45 = arith.truncf %43 : vector<64x256xf32> to vector<64x256xbf16>
    %cst_19 = arith.constant dense<0.000000e+00> : vector<128x256xf32>
    %46 = tpu.matmul %44, %45, %cst_19 {dimension_numbers = #tpu.dot_dimension_numbers<[1], [0], [0], [1], [0, 0, 1, 1], [], []>} : vector<128x64xbf16>, vector<64x256xbf16>, vector<128x256xf32> -> vector<128x256xf32>
    %c0_20 = arith.constant 0 : index
    %c0_21 = arith.constant 0 : index
    %47 = vector.load %arg11[%c0_20, %c0_21] : memref<128x1xf32, #tpu.memory_space<vmem>>, vector<128x1xf32>
    %48 = vector.broadcast %47 : vector<128x1xf32> to vector<128x256xf32>
    %49 = arith.addf %46, %48 : vector<128x256xf32>
    %cst_22 = arith.constant 0.000000e+00 : f32
    %50 = vector.broadcast %cst_22 : f32 to vector<128x256xf32>
    %51 = arith.maximumf %49, %50 : vector<128x256xf32>
    %c0_23 = arith.constant 0 : index
    %c0_24 = arith.constant 0 : index
    %52 = vector.load %arg7[%c0_23, %c0_24] : memref<512x128xbf16, #tpu.memory_space<vmem>>, vector<512x128xbf16>
    %53 = arith.truncf %51 : vector<128x256xf32> to vector<128x256xbf16>
    %cst_25 = arith.constant dense<0.000000e+00> : vector<512x256xf32>
    %54 = tpu.matmul %52, %53, %cst_25 {dimension_numbers = #tpu.dot_dimension_numbers<[1], [0], [0], [1], [0, 0, 1, 1], [], []>} : vector<512x128xbf16>, vector<128x256xbf16>, vector<512x256xf32> -> vector<512x256xf32>
    %c0_26 = arith.constant 0 : index
    %c0_27 = arith.constant 0 : index
    %55 = vector.load %arg12[%c0_26, %c0_27] : memref<512x1xf32, #tpu.memory_space<vmem>>, vector<512x1xf32>
    %56 = vector.broadcast %55 : vector<512x1xf32> to vector<512x256xf32>
    %57 = arith.addf %54, %56 : vector<512x256xf32>
    %cst_28 = arith.constant 0.000000e+00 : f32
    %58 = vector.broadcast %cst_28 : f32 to vector<512x256xf32>
    %59 = arith.maximumf %57, %58 : vector<512x256xf32>
    %60 = arith.truncf %59 : vector<512x256xf32> to vector<512x256xbf16>
    %c0_29 = arith.constant 0 : index
    %c0_30 = arith.constant 0 : index
    %61 = arith.index_cast %2 : i32 to index
    %62 = vector.load %arg13[%c0_29, %c0_30, %61] : memref<1x512x512xbf16, #tpu.memory_space<vmem>>, vector<1x512x256xbf16>
    %63 = vector.shape_cast %62 : vector<1x512x256xbf16> to vector<512x256xbf16>
    %64 = vector.shape_cast %60 : vector<512x256xbf16> to vector<1x512x256xbf16>
    tpu.vector_store %arg13[%c0_29, %c0_30, %61], %64 {strides = array<i32>} : memref<1x512x512xbf16, #tpu.memory_space<vmem>>, vector<1x512x256xbf16>,
    %c1_i32 = arith.constant 1 : i32
    %c256_i32_31 = arith.constant 256 : i32
    %65 = arith.muli %c1_i32, %c256_i32_31 : i32
    %66 = tpu.assume_multiple %65, 256 : i32
    %c0_32 = arith.constant 0 : index
    %c0_33 = arith.constant 0 : index
    %67 = arith.index_cast %66 : i32 to index
    %68 = vector.load %arg2[%c0_32, %c0_33, %67] : memref<1x3x512xf32, #tpu.memory_space<vmem>>, vector<1x3x256xf32>
    %69 = vector.shape_cast %68 : vector<1x3x256xf32> to vector<3x256xf32>
    %70 = vector.extract_strided_slice %0 {offsets = [0, 0], sizes = [64, 1], strides = [1, 1]} : vector<64x3xf32> to vector<64x1xf32>
    %71 = vector.extract_strided_slice %69 {offsets = [0, 0], sizes = [1, 256], strides = [1, 1]} : vector<3x256xf32> to vector<1x256xf32>
    %72 = vector.broadcast %70 : vector<64x1xf32> to vector<64x256xf32>
    %73 = vector.broadcast %71 : vector<1x256xf32> to vector<64x256xf32>
    %74 = arith.mulf %72, %73 : vector<64x256xf32>
    %75 = vector.extract_strided_slice %0 {offsets = [0, 1], sizes = [64, 1], strides = [1, 1]} : vector<64x3xf32> to vector<64x1xf32>
    %76 = vector.extract_strided_slice %69 {offsets = [1, 0], sizes = [1, 256], strides = [1, 1]} : vector<3x256xf32> to vector<1x256xf32>
    %77 = vector.broadcast %75 : vector<64x1xf32> to vector<64x256xf32>
    %78 = vector.broadcast %76 : vector<1x256xf32> to vector<64x256xf32>
    %79 = arith.mulf %77, %78 : vector<64x256xf32>
    %80 = arith.addf %74, %79 : vector<64x256xf32>
    %81 = vector.extract_strided_slice %0 {offsets = [0, 2], sizes = [64, 1], strides = [1, 1]} : vector<64x3xf32> to vector<64x1xf32>
    %82 = vector.extract_strided_slice %69 {offsets = [2, 0], sizes = [1, 256], strides = [1, 1]} : vector<3x256xf32> to vector<1x256xf32>
    %83 = vector.broadcast %81 : vector<64x1xf32> to vector<64x256xf32>
    %84 = vector.broadcast %82 : vector<1x256xf32> to vector<64x256xf32>
    %85 = arith.mulf %83, %84 : vector<64x256xf32>
    %86 = arith.addf %80, %85 : vector<64x256xf32>
    %c0_34 = arith.constant 0 : index
    %c0_35 = arith.constant 0 : index
    %87 = vector.load %arg8[%c0_34, %c0_35] : memref<64x1xf32, #tpu.memory_space<vmem>>, vector<64x1xf32>
    %88 = vector.broadcast %87 : vector<64x1xf32> to vector<64x256xf32>
    %89 = arith.addf %86, %88 : vector<64x256xf32>
    %cst_36 = arith.constant 0.000000e+00 : f32
    %90 = vector.broadcast %cst_36 : f32 to vector<64x256xf32>
    %91 = arith.maximumf %89, %90 : vector<64x256xf32>
    %c0_37 = arith.constant 0 : index
    %c0_38 = arith.constant 0 : index
    %92 = vector.load %arg4[%c0_37, %c0_38] : memref<64x64xbf16, #tpu.memory_space<vmem>>, vector<64x64xbf16>
    %93 = arith.truncf %91 : vector<64x256xf32> to vector<64x256xbf16>
    %cst_39 = arith.constant dense<0.000000e+00> : vector<64x256xf32>
    %94 = tpu.matmul %92, %93, %cst_39 {dimension_numbers = #tpu.dot_dimension_numbers<[1], [0], [0], [1], [0, 0, 1, 1], [], []>} : vector<64x64xbf16>, vector<64x256xbf16>, vector<64x256xf32> -> vector<64x256xf32>
    %c0_40 = arith.constant 0 : index
    %c0_41 = arith.constant 0 : index
    %95 = vector.load %arg9[%c0_40, %c0_41] : memref<64x1xf32, #tpu.memory_space<vmem>>, vector<64x1xf32>
    %96 = vector.broadcast %95 : vector<64x1xf32> to vector<64x256xf32>
    %97 = arith.addf %94, %96 : vector<64x256xf32>
    %cst_42 = arith.constant 0.000000e+00 : f32
    %98 = vector.broadcast %cst_42 : f32 to vector<64x256xf32>
    %99 = arith.maximumf %97, %98 : vector<64x256xf32>
    %c0_43 = arith.constant 0 : index
    %c0_44 = arith.constant 0 : index
    %100 = vector.load %arg5[%c0_43, %c0_44] : memref<64x64xbf16, #tpu.memory_space<vmem>>, vector<64x64xbf16>
    %101 = arith.truncf %99 : vector<64x256xf32> to vector<64x256xbf16>
    %cst_45 = arith.constant dense<0.000000e+00> : vector<64x256xf32>
    %102 = tpu.matmul %100, %101, %cst_45 {dimension_numbers = #tpu.dot_dimension_numbers<[1], [0], [0], [1], [0, 0, 1, 1], [], []>} : vector<64x64xbf16>, vector<64x256xbf16>, vector<64x256xf32> -> vector<64x256xf32>
    %c0_46 = arith.constant 0 : index
    %c0_47 = arith.constant 0 : index
    %103 = vector.load %arg10[%c0_46, %c0_47] : memref<64x1xf32, #tpu.memory_space<vmem>>, vector<64x1xf32>
    %104 = vector.broadcast %103 : vector<64x1xf32> to vector<64x256xf32>
    %105 = arith.addf %102, %104 : vector<64x256xf32>
    %cst_48 = arith.constant 0.000000e+00 : f32
    %106 = vector.broadcast %cst_48 : f32 to vector<64x256xf32>
    %107 = arith.maximumf %105, %106 : vector<64x256xf32>
    %c0_49 = arith.constant 0 : index
    %c0_50 = arith.constant 0 : index
    %108 = vector.load %arg6[%c0_49, %c0_50] : memref<128x64xbf16, #tpu.memory_space<vmem>>, vector<128x64xbf16>
    %109 = arith.truncf %107 : vector<64x256xf32> to vector<64x256xbf16>
    %cst_51 = arith.constant dense<0.000000e+00> : vector<128x256xf32>
    %110 = tpu.matmul %108, %109, %cst_51 {dimension_numbers = #tpu.dot_dimension_numbers<[1], [0], [0], [1], [0, 0, 1, 1], [], []>} : vector<128x64xbf16>, vector<64x256xbf16>, vector<128x256xf32> -> vector<128x256xf32>
    %c0_52 = arith.constant 0 : index
    %c0_53 = arith.constant 0 : index
    %111 = vector.load %arg11[%c0_52, %c0_53] : memref<128x1xf32, #tpu.memory_space<vmem>>, vector<128x1xf32>
    %112 = vector.broadcast %111 : vector<128x1xf32> to vector<128x256xf32>
    %113 = arith.addf %110, %112 : vector<128x256xf32>
    %cst_54 = arith.constant 0.000000e+00 : f32
    %114 = vector.broadcast %cst_54 : f32 to vector<128x256xf32>
    %115 = arith.maximumf %113, %114 : vector<128x256xf32>
    %c0_55 = arith.constant 0 : index
    %c0_56 = arith.constant 0 : index
    %116 = vector.load %arg7[%c0_55, %c0_56] : memref<512x128xbf16, #tpu.memory_space<vmem>>, vector<512x128xbf16>
    %117 = arith.truncf %115 : vector<128x256xf32> to vector<128x256xbf16>
    %cst_57 = arith.constant dense<0.000000e+00> : vector<512x256xf32>
    %118 = tpu.matmul %116, %117, %cst_57 {dimension_numbers = #tpu.dot_dimension_numbers<[1], [0], [0], [1], [0, 0, 1, 1], [], []>} : vector<512x128xbf16>, vector<128x256xbf16>, vector<512x256xf32> -> vector<512x256xf32>
    %c0_58 = arith.constant 0 : index
    %c0_59 = arith.constant 0 : index
    %119 = vector.load %arg12[%c0_58, %c0_59] : memref<512x1xf32, #tpu.memory_space<vmem>>, vector<512x1xf32>
    %120 = vector.broadcast %119 : vector<512x1xf32> to vector<512x256xf32>
    %121 = arith.addf %118, %120 : vector<512x256xf32>
    %cst_60 = arith.constant 0.000000e+00 : f32
    %122 = vector.broadcast %cst_60 : f32 to vector<512x256xf32>
    %123 = arith.maximumf %121, %122 : vector<512x256xf32>
    %124 = arith.truncf %123 : vector<512x256xf32> to vector<512x256xbf16>
    %c0_61 = arith.constant 0 : index
    %c0_62 = arith.constant 0 : index
    %125 = arith.index_cast %66 : i32 to index
    %126 = vector.load %arg13[%c0_61, %c0_62, %125] : memref<1x512x512xbf16, #tpu.memory_space<vmem>>, vector<1x512x256xbf16>
    %127 = vector.shape_cast %126 : vector<1x512x256xbf16> to vector<512x256xbf16>
    %128 = vector.shape_cast %124 : vector<512x256xbf16> to vector<1x512x256xbf16>
    tpu.vector_store %arg13[%c0_61, %c0_62, %125], %128 {strides = array<i32>} : memref<1x512x512xbf16, #tpu.memory_space<vmem>>, vector<1x512x256xbf16>,
    %c2_i32 = arith.constant 2 : i32
    return
  }
  func.func @transform_0(%arg0: i32, %arg1: i32) -> (i32, i32, i32) {
    %c0_i32 = arith.constant 0 : i32
    %c0_i32_0 = arith.constant 0 : i32
    return %arg0, %c0_i32, %arg1 : i32, i32, i32
  }
  func.func @transform_1(%arg0: i32, %arg1: i32) -> (i32, i32) {
    %c0_i32 = arith.constant 0 : i32
    %c0_i32_0 = arith.constant 0 : i32
    %c0_i32_1 = arith.constant 0 : i32
    return %c0_i32, %c0_i32_0 : i32, i32
  }
  func.func @transform_2(%arg0: i32, %arg1: i32) -> (i32, i32) {
    %c0_i32 = arith.constant 0 : i32
    %c0_i32_0 = arith.constant 0 : i32
    %c0_i32_1 = arith.constant 0 : i32
    return %c0_i32, %c0_i32_0 : i32, i32
  }
  func.func @transform_3(%arg0: i32, %arg1: i32) -> (i32, i32) {
    %c0_i32 = arith.constant 0 : i32
    %c0_i32_0 = arith.constant 0 : i32
    %c0_i32_1 = arith.constant 0 : i32
    return %c0_i32, %c0_i32_0 : i32, i32
  }
  func.func @transform_4(%arg0: i32, %arg1: i32) -> (i32, i32) {
    %c0_i32 = arith.constant 0 : i32
    %c0_i32_0 = arith.constant 0 : i32
    %c0_i32_1 = arith.constant 0 : i32
    return %c0_i32, %c0_i32_0 : i32, i32
  }
  func.func @transform_5(%arg0: i32, %arg1: i32) -> (i32, i32) {
    %c0_i32 = arith.constant 0 : i32
    %c0_i32_0 = arith.constant 0 : i32
    %c0_i32_1 = arith.constant 0 : i32
    return %c0_i32, %c0_i32_0 : i32, i32
  }
  func.func @transform_6(%arg0: i32, %arg1: i32) -> (i32, i32) {
    %c0_i32 = arith.constant 0 : i32
    %c0_i32_0 = arith.constant 0 : i32
    %c0_i32_1 = arith.constant 0 : i32
    return %c0_i32, %c0_i32_0 : i32, i32
  }
  func.func @transform_7(%arg0: i32, %arg1: i32) -> (i32, i32) {
    %c0_i32 = arith.constant 0 : i32
    %c0_i32_0 = arith.constant 0 : i32
    %c0_i32_1 = arith.constant 0 : i32
    return %c0_i32, %c0_i32_0 : i32, i32
  }
  func.func @transform_8(%arg0: i32, %arg1: i32) -> (i32, i32) {
    %c0_i32 = arith.constant 0 : i32
    %c0_i32_0 = arith.constant 0 : i32
    %c0_i32_1 = arith.constant 0 : i32
    return %c0_i32, %c0_i32_0 : i32, i32
  }
  func.func @transform_9(%arg0: i32, %arg1: i32) -> (i32, i32) {
    %c0_i32 = arith.constant 0 : i32
    %c0_i32_0 = arith.constant 0 : i32
    %c0_i32_1 = arith.constant 0 : i32
    return %c0_i32, %c0_i32_0 : i32, i32
  }
  func.func @transform_10(%arg0: i32, %arg1: i32) -> (i32, i32) {
    %c0_i32 = arith.constant 0 : i32
    %c0_i32_0 = arith.constant 0 : i32
    %c0_i32_1 = arith.constant 0 : i32
    return %c0_i32, %c0_i32_0 : i32, i32
  }
  func.func @transform_11(%arg0: i32, %arg1: i32) -> (i32, i32, i32) {
    %c0_i32 = arith.constant 0 : i32
    %c0_i32_0 = arith.constant 0 : i32
    return %arg0, %c0_i32, %arg1 : i32, i32, i32
  }
}

</mosaic_0001>

<bundles_post_ra>
// kernel: pointnet_forward.1
= control target key start
LH: loop header
LB: loop body
LE: loop exit
PB: predicated region body
PF: predicated region fallthrough
CT: control target
= control target key end

     0   :  { %s6651_s17 = smov 0   ;;  %s6653_s18 = smov 0   ;;  %s9292_s0 = inlined_call_operand.vmem [shape: f32[2,3,1024], index: 0, kind: input, shape index: {}]   ;;  %s9293_s1 = inlined_call_operand.vmem [shape: f32[64,3], index: 1, kind: input, shape index: {}]   ;;  %s9294_s2 = inlined_call_operand.vmem [shape: bf16[64,64], index: 2, kind: input, shape index: {}]   ;;  %s9295_s3 = inlined_call_operand.vmem [shape: bf16[64,64], index: 3, kind: input, shape index: {}]   ;;  %s9296_s4 = inlined_call_operand.vmem [shape: bf16[128,64], index: 4, kind: input, shape index: {}]   ;;  %s9297_s5 = inlined_call_operand.vmem [shape: bf16[512,128], index: 5, kind: input, shape index: {}]   ;;  %s9298_s6 = inlined_call_operand.vmem [shape: f32[64,1], index: 6, kind: input, shape index: {}]   ;;  %s9299_s7 = inlined_call_operand.vmem [shape: f32[64,1], index: 7, kind: input, shape index: {}]   ;;  %s9300_s8 = inlined_call_operand.vmem [shape: f32[64,1], index: 8, kind: input, shape index: {}]   ;;  %s9301_s9 = inlined_call_operand.vmem [shape: f32[128,1], index: 9, kind: input, shape index: {}]   ;;  %s9302_s10 = inlined_call_operand.vmem [shape: f32[512,1], index: 10, kind: input, shape index: {}]   ;;  %s9303_s11 = inlined_call_operand.vmem [shape: bf16[2,512,1024], index: 11, kind: output, shape index: {}]  }
   0x1   :  { %s6655_s19 = smov 0   ;;  %s6657_s20 = smov 0  }
   0x2   :  { %s6659_s21 = smov 0   ;;  %s6661_s22 = smov 0  }
   0x3   :  { %s6663_s23 = smov 0  }
   0x4 LB: > { %s30_s24 = sadd.s32 1, %s6578_s21  ;;  %s33_s25 = sadd.s32 1, %s6582_s22  ;;  %s6586_s23 = sphi %s6663_s23, %s21_s23   ;;  %s6582_s22 = sphi %s6661_s22, %s9624_s22   ;;  %s6578_s21 = sphi %s6659_s21, %s9623_s21   ;;  %s6574_s20 = sphi %s6657_s20, %s9622_s20   ;;  %s6570_s19 = sphi %s6655_s19, %s9621_s19   ;;  %s6566_s18 = sphi %s6653_s18, %s9620_s18   ;;  %s6562_s17 = sphi %s6651_s17, %s9619_s17  }
   0x5   : > { %p31_p0 = scmp.ge.s32.totalorder %s30_s24, 2  ;;  %s5882_s26 = sadd.s32 4294967295, %s6586_s23  }
   0x6   : > { %p290_p1 = scmp.ne.s32.totalorder %s6566_s18, %s6562_s17  ;;  %p291_p2 = scmp.eq.s32.totalorder %s5882_s26, 3 }
   0x7   : > { %s9626_s24 = smov (%p31_p0, %s30_s24), 0  ;;  %s9628_s25 = smov (!%p31_p0, %s33_s25), %s6582_s22 }
   0x8   : > { %9403 = sst [smem:[#allocation3_spill]] %s9626_s24  ;;  %s276_s27 = ssub.s32 %s6578_s21, %s9626_s24 }
   0x9   : > { %p35_p3 = scmp.ge.s32.totalorder %s9628_s25, 2  ;;  %p5886_p4 = scmp.ge.s32.totalorder %s6586_s23, 1 }
   0xa   : > { %p6697_p5 = por %p291_p2, %p290_p1  ;;  %p358_p6 = scmp.lt.s32.totalorder %s6586_s23, 5 }
   0xb   : > { %s9630_s25 = smov (%p35_p3, %s9628_s25), 0  ;;  %s280_s12 = sadd.s32 1, %s6566_s18 }
   0xc   : > { %9405 = sst [smem:[#allocation4_spill]] %s9630_s25  ;;  %p359_p7 = pnand %p5886_p4, %p358_p6 }
   0xd   : > { %s275_s29 = ssub.s32 %s6582_s22, %s9630_s25 }
   0xe   : > { %s277_s30 = sor.u32 %s276_s27, %s275_s29  ;;  %362 = sbr.rel (%p359_p7) target bundleno = 1970 (0x7b2), region = 64 }
   0xf   : > { %p278_p8 = scmp.eq.s32.totalorder %s277_s30, 0 }
  0x11   : > { %s6708_s13 = scalar_select %p278_p8, %s6566_s18, %s280_s12  }
  0x13   : > { %v419_v0 = vld [vmem:[%s9293_s1 + $0x30] sm:$0xff]  ;;  %v463_v1 = vlaneseq  ;;  %v6588_v2 = vmov 2   ;;  %v6589_v3 = vmov 1   ;;  %s6716_s16 = sshll.u32 %s6570_s19, 2  ;;  %p402_p9 = scmp.lt.s32.totalorder %s6574_s20, 1  ;;  %v420_v4 = vld [vmem:[%s9293_s1 + $0x38] sm:$0xff] }
  0x14   : > { %6422 = vset.pattern.permute.xlu0 %v6588_v2  ;;  %6421 = vset.pattern.permute.xlu1 %v6589_v3  ;;  %p404_p10 = scmp.lt.s32.totalorder %s6716_s16, 7  ;;  %v417_v5 = vld [vmem:[%s9293_s1 + $0x20] sm:$0xff]  ;;  %v9306_v6 = vmov 0   ;;  %v416_v8 = vld [vmem:[%s9293_s1 + $0x18] sm:$0xff]  ;;  %v415_v16 = vld [vmem:[%s9293_s1 + $0x10] sm:$0xff]  ;;  %vm825_vm0 = vcmask 523264  }
  0x15   : > { %604 = vperm.xlu0 %6422, %v419_v0   ;;  %522 = vperm.xlu1 %6421, %v419_v0   ;;  %s403_s12 = scalar_select %p402_p9, %s6574_s20, 1  ;;  %v6729_v7 = vshrl.u32 %v463_v1, 7  ;;  %v414_v25 = vld [vmem:[%s9293_s1 + $0x8] sm:$0xff]  ;;  %v6798_v31 = vld [vmem:[%s9298_s6 + $0x30] sm:$0xff]  ;;  %v668_v32 = vld [vmem:[%s9298_s6 + $0x38] sm:$0xff] }
  0x16   : > { %870 = vmatprep.mubr.bf16.mxu0 %v9306_v6  ;;  %1055 = vmatprep.mubr.bf16.mxu1 %v9306_v6  ;;  %s405_s19 = scalar_select %p404_p10, %s6716_s16, 7  ;;  %v418_v30 = vld [vmem:[%s9293_s1 + $0x28] sm:$0xff]  ;;  %v413_v33 = vld [vmem:[%s9293_s1] sm:$0xff]  ;;  %v6811_v34 = vld [vmem:[%s9298_s6 + $0x10] sm:$0xff] }
  0x17   : > { %s5889_s14 = sshll.u32 %s403_s12, 3  ;;  %v6736_v9 = vsub.s32 1, %v6729_v7  ;;  %v535_v10 = vsub.s32 5, %v6729_v7  ;;  %v6745_v11 = vsub.s32 0, %v6729_v7  ;;  %v469_v12 = vsub.s32 4, %v6729_v7  ;;  %v662_v35 = vld [vmem:[%s9298_s6 + $0x8] sm:$0xff] }
  0x18   : > { %s407_s15 = sadd.s32 %s5889_s14, %s405_s19  ;;  %v6751_v14 = vsub.s32 2, %v6729_v7  ;;  %v617_v15 = vsub.s32 6, %v6729_v7  ;;  %v764_v36 = vld [vmem:[%s9299_s7 + $0x38] sm:$0xff]  ;;  %v762_v37 = vld [vmem:[%s9299_s7 + $0x28] sm:$0xff]  ;;  %v665_v38 = vld [vmem:[%s9298_s6 + $0x20] sm:$0xff]  ;;  %s398_s25 = sand.u32 1, %s6562_s17  }
  0x19   : > { %526 = vperm.xlu1 %6421, %v420_v4   ;;  %596 = vperm.xlu0 %6422, %v417_v5   ;;  %s5890_s27 = sshll.u32 %s407_s15, 2  ;;  %v760_v39 = vld [vmem:[%s9299_s7 + $0x18] sm:$0xff]  ;;  %v666_v40 = vld [vmem:[%s9298_s6 + $0x28] sm:$0xff]  ;;  %v661_v47 = vld [vmem:[%s9298_s6] sm:$0xff]  ;;  %s5887_s12 = sshll.u32 %s398_s25, 10 }
  0x1a   : > { %s6742_s24 = scalar_lea.vmem %s9292_s0, %s5890_s27  ;;  %v758_v41 = vld [vmem:[%s9299_s7 + $0x8] sm:$0xff]  ;;  %v950_v42 = vld [vmem:[%s9300_s8 + $0x38] sm:$0xff]  ;;  %v763_v48 = vld [vmem:[%s9299_s7 + $0x30] sm:$0xff]  ;;  %s8360_s17 = scalar_lea.vmem [#allocation2], %s5887_s12 }
  0x1b   : > { %v6019_v13 = vld [vmem:[%s6742_s24 + $0x8] sm:$0x77]  ;;  %v946_v44 = vld [vmem:[%s9300_s8 + $0x18] sm:$0xff]  ;;  %v6865_v49 = vld [vmem:[%s9299_s7 + $0x20] sm:$0xff]  ;;  %s6214_s27 = sshll.u32 (%p6697_p5), %s6574_s20, 9 }
  0x1c   : > { %v3066_v17 = vrot.slane %v6019_v13, %v6736_v9  ;;  %v3070_v18 = vrot.slane %v6019_v13, %v535_v10  ;;  %v3032_v19 = vrot.slane %v6019_v13, %v6745_v11  ;;  %v3036_v20 = vrot.slane %v6019_v13, %v469_v12  ;;  %v948_v43 = vld [vmem:[%s9300_s8 + $0x28] sm:$0xff]  ;;  %v664_v46 = vld [vmem:[%s9298_s6 + $0x18] sm:$0xff]  ;;  %v6871_v50 = vld [vmem:[%s9299_s7 + $0x10] sm:$0xff]  ;;  %s5537_s28 = sadd.s32 (%p6697_p5), %s6214_s27, %s6716_s16 }
  0x1d   : > { %6423 = vset.pattern.permute.xlu1 %v6588_v2  ;;  %592 = vperm.xlu0 %6422, %v416_v8   ;;  %v3116_v26 = vrot.slane %v6019_v13, %v6751_v14  ;;  %v3120_v27 = vrot.slane %v6019_v13, %v617_v15  ;;  %v944_v45 = vld [vmem:[%s9300_s8 + $0x8] sm:$0xff]  ;;  %v6877_v51 = vld [vmem:[%s9299_s7] sm:$0xff]  ;;  %v6883_v52 = vld [vmem:[%s9300_s8 + $0x30] sm:$0xff]  ;;  %s6215_s29 = sshll.u32 (%p6697_p5), %s5537_s28, 2 }
  0x1e   : > { %608 = vperm.xlu1 %6423, %v420_v4   ;;  %v6765_v21 = vrot.slane %v3066_v17, %v6736_v9  ;;  %v6768_v22 = vrot.slane %v3070_v18, %v6736_v9  ;;  %v6771_v23 = vrot.slane %v3032_v19, %v6745_v11  ;;  %v6774_v24 = vrot.slane %v3036_v20, %v6745_v11  ;;  %v6889_v53 = vld [vmem:[%s9300_s8 + $0x20] sm:$0xff]  ;;  %v6895_v54 = vld [vmem:[%s9300_s8 + $0x10] sm:$0xff]  ;;  %v6912_v60 = vld [vmem:[%s9301_s9 + $0x78] sm:$0xff]  ;;  %s9022_s25 = scalar_lea.vmem (%p6697_p5), %s9303_s11, %s6215_s29 }
  0x1f   : > { %v6784_v28 = vrot.slane %v3116_v26, %v6751_v14  ;;  %v6787_v29 = vrot.slane %v3120_v27, %v6751_v14  ;;  %v6901_v55 = vld [vmem:[%s9300_s8] sm:$0xff]  ;;  %v6921_v62 = vld [vmem:[%s9301_s9 + $0x68] sm:$0xff]  ;;  %v6930_v1 = vld [vmem:[%s9301_s9 + $0x58] sm:$0xff] }
  0x20   : > { %v6949_v18 = vld [vmem:[%s9301_s9 + $0x48] sm:$0xff] }
  0x21   : > { %6430 = vset.pattern.permute.xlu0 %v6589_v3 }
  0x22   : > { %6424 = vset.pattern.permute.xlu1 %v9306_v6  ;;  %506 = vperm.xlu0 %6430, %v415_v16  }
  0x23   : > { %444 = vperm.xlu1 %6424, %v417_v5  }
  0x26   : > { %502 = vperm.xlu0 %6430, %v414_v25  }
  0x27   : > { %6425 = vset.pattern.permute.xlu1 %v6589_v3 }
  0x28   : > { %514 = vperm.xlu1 %6425, %v417_v5  }
  0x2a   : > { %6433 = vset.pattern.permute.xlu0 %v9306_v6 }
  0x2b   : > { %454 = vperm.xlu0 %6433, %v419_v0   ;;  %v421_v0 = vld [vmem:[%s6742_s24] sm:$0x77] }
  0x2c   : > { %518 = vperm.xlu1 %6425, %v418_v30   ;;  %v466_v5 = vrot.slane %v421_v0, %v6745_v11  ;;  %v536_v13 = vrot.slane %v421_v0, %v535_v10  ;;  %v618_v17 = vrot.slane %v421_v0, %v617_v15 }
  0x2e   : > { %v6957_v10 = vrot.slane %v466_v5, %v6745_v11  ;;  %v6963_v7 = vrot.slane %v536_v13, %v6736_v9  ;;  %v6972_v26 = vrot.slane %v618_v17, %v6751_v14 }
  0x2f   : > { %459 = vperm.xlu0 %6433, %v420_v4  }
  0x30   : > { %6426 = vset.pattern.permute.xlu1 %v6588_v2 }
  0x31   : > { %600 = vperm.xlu1 %6426, %v418_v30  }
  0x33   : > { %449 = vperm.xlu0 %6433, %v418_v30  }
  0x35   : > { %6427 = vset.pattern.permute.xlu1 %v9306_v6 }
  0x36   : > { %701 = vperm.xlu1 %6427, %v6798_v31  }
  0x37   : > { %706 = vperm.xlu0 %6433, %v668_v32  }
  0x3a   : > { %434 = vperm.xlu1 %6427, %v415_v16  }
  0x3b   : > { %424 = vperm.xlu0 %6433, %v413_v33  }
  0x3e   : > { %439 = vperm.xlu1 %6427, %v416_v8  }
  0x3f   : > { %681 = vperm.xlu0 %6433, %v6811_v34  }
  0x42   : > { %6428 = vset.pattern.permute.xlu1 %v6589_v3 }
  0x43   : > { %510 = vperm.xlu1 %6428, %v416_v8   ;;  %676 = vperm.xlu0 %6433, %v662_v35   ;;  %v470_v8 = vrot.slane %v421_v0, %v469_v12 }
  0x45   : > { %v6960_v20 = vrot.slane %v470_v8, %v6745_v11 }
  0x47   : > { %6429 = vset.pattern.permute.xlu1 %v6588_v2  ;;  %802 = vperm.xlu0 %6433, %v764_v36  }
  0x48   : > { %588 = vperm.xlu1 %6429, %v415_v16   ;;  %v614_v16 = vrot.slane %v421_v0, %v6751_v14 }
  0x4b   : > { %792 = vperm.xlu0 %6433, %v762_v37  }
  0x4c   : > { %6431 = vset.pattern.permute.xlu1 %v9306_v6 }
  0x4d   : > { %691 = vperm.xlu1 %6431, %v665_v38  }
  0x4f   : > { %782 = vperm.xlu0 %6433, %v760_v39  }
  0x51   : > { %696 = vperm.xlu1 %6431, %v666_v40  }
  0x53   : > { %772 = vperm.xlu0 %6433, %v758_v41  }
  0x55   : > { %429 = vperm.xlu1 %6431, %v414_v25  }
  0x57   : > { %988 = vperm.xlu0 %6433, %v950_v42  }
  0x59   : > { %6432 = vset.pattern.permute.xlu1 %v6589_v3 }
  0x5a   : > { %498 = vperm.xlu1 %6432, %v413_v33  }
  0x5b   : > { %978 = vperm.xlu0 %6433, %v948_v43  }
  0x5e   : > { %6434 = vset.pattern.permute.xlu1 %v6588_v2  ;;  %v532_v2 = vrot.slane %v421_v0, %v6736_v9 }
  0x5f   : > { %968 = vperm.xlu0 %6433, %v946_v44   ;;  %580 = vperm.xlu1 %6434, %v413_v33  }
  0x60   : > { %v6952_v19 = vrot.slane %v532_v2, %v6736_v9 }
  0x63   : > { %958 = vperm.xlu0 %6433, %v944_v45   ;;  %584 = vperm.xlu1 %6434, %v414_v25   ;;  %v6969_v25 = vrot.slane %v614_v16, %v6751_v14 }
  0x67   : > { %3208 = vperm.xlu0 %6433, %v668_v32   ;;  %6435 = vset.pattern.permute.xlu1 %v9306_v6 }
  0x68   : > { %686 = vperm.xlu1 %6435, %v664_v46  }
  0x6b   : > { %3198 = vperm.xlu0 %6433, %v666_v40  }
  0x6c   : > { %671 = vperm.xlu1 %6435, %v661_v47  }
  0x6f   : > { %3188 = vperm.xlu0 %6433, %v664_v46  }
  0x70   : > { %797 = vperm.xlu1 %6435, %v763_v48  }
  0x73   : > { %3178 = vperm.xlu0 %6433, %v662_v35  }
  0x74   : > { %787 = vperm.xlu1 %6435, %v6865_v49  }
  0x77   : > { %3304 = vperm.xlu0 %6433, %v764_v36  }
  0x78   : > { %777 = vperm.xlu1 %6435, %v6871_v50  }
  0x7b   : > { %3294 = vperm.xlu0 %6433, %v762_v37  }
  0x7c   : > { %767 = vperm.xlu1 %6435, %v6877_v51  }
  0x7f   : > { %3284 = vperm.xlu0 %6433, %v760_v39  }
  0x80   : > { %983 = vperm.xlu1 %6435, %v6883_v52  }
  0x83   : > { %3274 = vperm.xlu0 %6433, %v758_v41  }
  0x84   : > { %973 = vperm.xlu1 %6435, %v6889_v53  }
  0x87   : > { %3489 = vperm.xlu0 %6433, %v950_v42  }
  0x88   : > { %963 = vperm.xlu1 %6435, %v6895_v54  }
  0x8b   : > { %3479 = vperm.xlu0 %6433, %v948_v43  }
  0x8c   : > { %953 = vperm.xlu1 %6435, %v6901_v55  }
  0x8f   : > { %3469 = vperm.xlu0 %6433, %v946_v44  }
  0x90   : > { %v523_v56 = vpop.permute.xlu1 %522  ;;  %3203 = vperm.xlu1 %6435, %v6798_v31   ;;  %v605_v57 = vpop.permute.xlu0 %604  ;;  %v6986_v31 = vld [vmem:[%s9301_s9 + $0x38] sm:$0xff] }
  0x91   : > { %v559_v14 = vmul.f32 %v6952_v19, %v523_v56  ;;  %v3093_v32 = vmul.f32 %v6765_v21, %v523_v56  ;;  %v3094_v33 = vmul.f32 %v6768_v22, %v523_v56  ;;  %v560_v44 = vmul.f32 %v6963_v7, %v523_v56 }
  0x93   : > { %3459 = vperm.xlu0 %6433, %v944_v45   ;;  %v7007_v45 = vld [vmem:[%s9301_s9 + $0x28] sm:$0xff] }
  0x94   : > { %v6905_v58 = vpop.permute.xlu1 %526  ;;  %3193 = vperm.xlu1 %6435, %v665_v38   ;;  %v6907_v59 = vpop.permute.xlu0 %596 }
  0x95   : > { %v3139_v38 = vmul.f32 %v6784_v28, %v6907_v59  ;;  %v3140_v39 = vmul.f32 %v6787_v29, %v6907_v59  ;;  %v561_v0 = vmul.f32 %v6952_v19, %v6905_v58  ;;  %v3095_v56 = vmul.f32 %v6765_v21, %v6905_v58 }
  0x96   : > { %v562_v2 = vmul.f32 %v6963_v7, %v6905_v58 }
  0x97   : > { %1229 = vperm.xlu0 %6433, %v6912_v60  }
  0x98   : > { %3183 = vperm.xlu1 %6435, %v6811_v34   ;;  %v6916_v61 = vpop.permute.xlu0 %592  ;;  %v641_v34 = vmul.f32 %v6969_v25, %v605_v57 }
  0x99   : > { %v6923_v63 = vpop.permute.xlu1 %608 }
  0x9b   : > { %1219 = vperm.xlu0 %6433, %v6921_v62  }
  0x9c   : > { %3173 = vperm.xlu1 %6435, %v661_v47   ;;  %v642_v47 = vmul.f32 %v6972_v26, %v605_v57 }
  0x9d   : > { %v6933_v3 = vpop.permute.xlu0 %506 }
  0x9e   : > { %v6935_v4 = vpop.permute.xlu1 %444 }
  0x9f   : > { %1209 = vperm.xlu0 %6433, %v6930_v1   ;;  %v3055_v27 = vmul.f32 %v6771_v23, %v6935_v4  ;;  %v3056_v11 = vmul.f32 %v6774_v24, %v6935_v4 }
  0xa0   : > { %3299 = vperm.xlu1 %6435, %v763_v48   ;;  %v3143_v48 = vmul.f32 %v6784_v28, %v605_v57 }
  0xa1   : > { %v6954_v12 = vpop.permute.xlu0 %502 }
  0xa3   : > { %v6965_v15 = vpop.permute.xlu1 %514  ;;  %1199 = vperm.xlu0 %6433, %v6949_v18  }
  0xa4   : > { %v3089_v9 = vmul.f32 %v6765_v21, %v6965_v15  ;;  %v3090_v30 = vmul.f32 %v6768_v22, %v6965_v15  ;;  %3289 = vperm.xlu1 %6435, %v6865_v49   ;;  %v3144_v49 = vmul.f32 %v6787_v29, %v605_v57 }
  0xa6   : > { %v455_v35 = vpop.permute.xlu0 %454  ;;  %v3105_v36 = vadd.f32 %v3089_v9, %v3055_v27  ;;  %v3106_v37 = vadd.f32 %v3090_v30, %v3056_v11 }
  0xa7   : > { %v493_v40 = vmul.f32 %v6957_v10, %v455_v35  ;;  %v3059_v41 = vmul.f32 %v6771_v23, %v455_v35  ;;  %v3060_v42 = vmul.f32 %v6774_v24, %v455_v35  ;;  %v6999_v43 = vpop.permute.xlu1 %518  ;;  %1189 = vperm.xlu0 %6433, %v6986_v31   ;;  %v494_v46 = vmul.f32 %v6960_v20, %v455_v35 }
  0xa8   : > { %3279 = vperm.xlu1 %6435, %v6871_v50   ;;  %v3096_v50 = vmul.f32 %v6768_v22, %v6905_v58  ;;  %v7021_v16 = vadd.f32 %v3139_v38, %v3105_v36  ;;  %v7023_v17 = vadd.f32 %v3140_v39, %v3106_v37  ;;  %v7035_v58 = vld [vmem:[%s9301_s9 + $0x18] sm:$0xff]  ;;  %v644_v38 = vmul.f32 %v6972_v26, %v6923_v63 }
  0xa9   : > { %v3109_v8 = vadd.f32 %v3093_v32, %v3059_v41  ;;  %v3110_v13 = vadd.f32 %v3094_v33, %v3060_v42  ;;  %v575_v9 = vadd.f32 %v559_v14, %v493_v40  ;;  %v576_v33 = vadd.f32 %v560_v44, %v494_v46 }
  0xaa   : > { %v460_v5 = vpop.permute.xlu0 %459  ;;  %9406 = vst [vmem:[#allocation5_spill] sm:$0xff] %v7023_v17  ;;  %v643_v14 = vmul.f32 %v6969_v25, %v6923_v63  ;;  %v3145_v42 = vmul.f32 %v6784_v28, %v6923_v63  ;;  %v3146_v44 = vmul.f32 %v6787_v29, %v6923_v63  ;;  %v3091_v46 = vmul.f32 %v6765_v21, %v6999_v43  ;;  %v7065_v63 = vld [vmem:[%s9301_s9 + $0x8] sm:$0xff] }
  0xab   : > { %v495_v57 = vmul.f32 %v6957_v10, %v460_v5  ;;  %v3061_v27 = vmul.f32 %v6771_v23, %v460_v5  ;;  %v3062_v11 = vmul.f32 %v6774_v24, %v460_v5  ;;  %1179 = vperm.xlu0 %6433, %v7007_v45   ;;  %v496_v32 = vmul.f32 %v6960_v20, %v460_v5 }
  0xac   : > { %v7029_v30 = vpop.permute.xlu1 %600  ;;  %3269 = vperm.xlu1 %6435, %v6877_v51   ;;  %v7038_v35 = vadd.f32 %v3143_v48, %v3109_v8  ;;  %v7040_v36 = vadd.f32 %v3144_v49, %v3110_v13  ;;  %v3092_v48 = vmul.f32 %v6768_v22, %v6999_v43 }
  0xad   : > { %v577_v37 = vadd.f32 %v561_v0, %v495_v57  ;;  %v3111_v51 = vadd.f32 %v3095_v56, %v3061_v27  ;;  %v578_v40 = vadd.f32 %v562_v2, %v496_v32  ;;  %v3112_v41 = vadd.f32 %v3096_v50, %v3062_v11 }
  0xae   : > { %v7046_v39 = vpop.permute.xlu0 %449  ;;  %v657_v56 = vadd.f32 %v641_v34, %v575_v9  ;;  %v658_v50 = vadd.f32 %v642_v47, %v576_v33  ;;  %v3142_v34 = vmul.f32 %v6787_v29, %v7029_v30  ;;  %v7080_v33 = vld [vmem:[%s9302_s10 + $0x8] sm:$0xff] }
  0xaf   : > { %v3057_v49 = vmul.f32 %v6771_v23, %v7046_v39  ;;  %v3058_v0 = vmul.f32 %v6774_v24, %v7046_v39  ;;  %1169 = vperm.xlu0 %6433, %v7035_v58   ;;  %v7067_v2 = vadd.f32 %v3145_v42, %v3111_v51  ;;  %v7069_v5 = vadd.f32 %v3146_v44, %v3112_v41 }
  0xb0   : > { %3484 = vperm.xlu1 %6435, %v6883_v52   ;;  %v659_v13 = vadd.f32 %v643_v14, %v577_v37  ;;  %v660_v57 = vadd.f32 %v644_v38, %v578_v40  ;;  %v3141_v52 = vmul.f32 %v6784_v28, %v7029_v30  ;;  %9407 = vst [vmem:[#allocation6_spill] sm:$0xff] %v7080_v33 }
  0xb1   : > { %v702_v8 = vpop.permute.xlu1 %701  ;;  %v3107_v27 = vadd.f32 %v3091_v46, %v3057_v49  ;;  %v3108_v11 = vadd.f32 %v3092_v48, %v3058_v0  ;;  %v3085_v40 = vmul.f32 %v6765_v21, %v6933_v3  ;;  %v3086_v41 = vmul.f32 %v6768_v22, %v6933_v3  ;;  %v7103_v0 = vld [vmem:[%s9302_s10 + $0x18] sm:$0xff] }
  0xb2   : > { %v721_v32 = vadd.f32 %v702_v8, %v657_v56  ;;  %v707_v6 = vpop.permute.xlu0 %706  ;;  %v722_v17 = vadd.f32 %v702_v8, %v658_v50  ;;  %9408 = vst [vmem:[#allocation7_spill] sm:$0xff] %v7103_v0 }
  0xb3   : > { %v723_v9 = vadd.f32 %v707_v6, %v659_v13  ;;  %1159 = vperm.xlu0 %6433, %v7065_v63   ;;  %v724_v47 = vadd.f32 %v707_v6, %v660_v57  ;;  %v7082_v38 = vadd.f32 %v3141_v52, %v3107_v27  ;;  %v7084_v51 = vadd.f32 %v3142_v34, %v3108_v11  ;;  %v7119_v57 = vld [vmem:[%s9301_s9 + $0x70] sm:$0xff] }
  0xb4   : > { %3474 = vperm.xlu1 %6435, %v6889_v53   ;;  %v738_v37 = vmax.f32 %v722_v17, 0.0  ;;  %v737_v14 = vmax.f32 %v721_v32, 0.0  ;;  %9410 = vst [vmem:[#allocation9_spill] sm:$0xff] %v7119_v57 }
  0xb5   : > { %v7090_v6 = vpop.permute.xlu1 %434  ;;  %v740_v53 = vmax.f32 %v724_v47, 0.0  ;;  %v739_v42 = vmax.f32 %v723_v9, 0.0  ;;  %v7138_v9 = vld [vmem:[%s9302_s10 + $0x38] sm:$0xff]  ;;  %v7143_v47 = vld [vmem:[%s9301_s9 + $0x60] sm:$0xff] }
  0xb6   : > { %v3051_v44 = vmul.f32 %v6771_v23, %v7090_v6  ;;  %v3052_v17 = vmul.f32 %v6774_v24, %v7090_v6  ;;  %v7096_v46 = vpop.permute.xlu0 %424  ;;  %9411 = vst [vmem:[#allocation10_spill] sm:$0xff] %v7138_v9  ;;  %9412 = vst [vmem:[#allocation11_spill] sm:$0xff] %v7143_v47 }
  0xb7   : > { %1592 = vperm.xlu0 %6433, %v7080_v33   ;;  %v756_v48 = vpack.c.bf16 %v740_v53, %v738_v37  ;;  %v755_v49 = vpack.c.bf16 %v739_v42, %v737_v14  ;;  %v555_v53 = vmul.f32 %v6952_v19, %v6965_v15  ;;  %v556_v42 = vmul.f32 %v6963_v7, %v6965_v15 }
  0xb8   : > { %3464 = vperm.xlu1 %6435, %v6895_v54   ;;  %v3101_v50 = vadd.f32 %v3085_v40, %v3051_v44  ;;  %v3102_v8 = vadd.f32 %v3086_v41, %v3052_v17  ;;  %v7114_v54 = vld [vmem:[%s9302_s10 + $0x28] sm:$0xff]  ;;  %v3137_v40 = vmul.f32 %v6784_v28, %v6916_v61  ;;  %v3138_v41 = vmul.f32 %v6787_v29, %v6916_v61 }
  0xb9   : > { %v7105_v56 = vpop.permute.xlu1 %439  ;;  %846 = vmatprep.subr.bf16.mxu0 %v756_v48  ;;  %9409 = vst [vmem:[#allocation8_spill] sm:$0xff] %v7114_v54  ;;  %v491_v17 = vmul.f32 %v6957_v10, %v7046_v39  ;;  %v492_v48 = vmul.f32 %v6960_v20, %v7046_v39  ;;  %v490_v15 = vmul.f32 %v6960_v20, %v6935_v4  ;;  %v7174_v39 = vld [vmem:[%s9302_s10 + $0x48] sm:$0xff] }
  0xba   : > { %v7107_v13 = vpop.permute.xlu0 %681  ;;  %847 = vmatpush1.bf16.msra.mxu0 %v755_v49  ;;  %v3053_v32 = vmul.f32 %v6771_v23, %v7105_v56  ;;  %9415 = vst [vmem:[#allocation14_spill] sm:$0xff] %v7174_v39 }
  0xbb   : > { %1602 = vperm.xlu0 %6433, %v7103_v0   ;;  %v572_v0 = vadd.f32 %v556_v42, %v490_v15 }
  0xbc   : > { %3454 = vperm.xlu1 %6435, %v6901_v55   ;;  %v3054_v55 = vmul.f32 %v6774_v24, %v7105_v56 }
  0xbe   : > { %v7121_v27 = vpop.permute.xlu1 %510  ;;  %v7123_v11 = vpop.permute.xlu0 %676 }
  0xbf   : > { %v3087_v52 = vmul.f32 %v6765_v21, %v7121_v27  ;;  %v3088_v34 = vmul.f32 %v6768_v22, %v7121_v27  ;;  %1612 = vperm.xlu0 %6433, %v7114_v54  }
  0xc0   : > { %1224 = vperm.xlu1 %6435, %v7119_v57  }
  0xc1   : > { %v3103_v37 = vadd.f32 %v3087_v52, %v3053_v32  ;;  %v3104_v14 = vadd.f32 %v3088_v34, %v3054_v55  ;;  %v489_v52 = vmul.f32 %v6957_v10, %v6935_v4  ;;  %v637_v4 = vmul.f32 %v6969_v25, %v6907_v59 }
  0xc2   : > { %v7153_v44 = vpop.permute.xlu0 %802 }
  0xc3   : > { %9413 = vst [vmem:[#allocation12_spill] sm:$0xff] %v7153_v44  ;;  %v7159_v49 = vpop.permute.xlu1 %588  ;;  %1622 = vperm.xlu0 %6433, %v7138_v9   ;;  %v7162_v32 = vadd.f32 %v3137_v40, %v3103_v37  ;;  %v7164_v55 = vadd.f32 %v3138_v41, %v3104_v14  ;;  %v557_v14 = vmul.f32 %v6952_v19, %v6999_v43  ;;  %v7191_v44 = vld [vmem:[%s9301_s9 + $0x50] sm:$0xff] }
  0xc4   : > { %1214 = vperm.xlu1 %6435, %v7143_v47   ;;  %v3135_v34 = vmul.f32 %v6784_v28, %v7159_v49  ;;  %v3136_v37 = vmul.f32 %v6787_v29, %v7159_v49  ;;  %v558_v40 = vmul.f32 %v6963_v7, %v6999_v43  ;;  %v638_v41 = vmul.f32 %v6972_v26, %v6907_v59  ;;  %v7204_v59 = vld [vmem:[%s9302_s10 + $0x58] sm:$0xff] }
  0xc5   : > { %9414 = vst [vmem:[#allocation13_spill] sm:$0xff] %v7164_v55  ;;  %v571_v54 = vadd.f32 %v555_v53, %v489_v52  ;;  %v573_v43 = vadd.f32 %v557_v14, %v491_v17  ;;  %9417 = vst [vmem:[#allocation16_spill] sm:$0xff] %v7204_v59  ;;  %v639_v53 = vmul.f32 %v6969_v25, %v7029_v30 }
  0xc6   : > { %v7193_v9 = vpop.permute.xlu0 %792  ;;  %v7195_v33 = vadd.f32 %v3135_v34, %v3101_v50  ;;  %v7197_v47 = vadd.f32 %v3136_v37, %v3102_v8  ;;  %v574_v57 = vadd.f32 %v558_v40, %v492_v48  ;;  %v640_v50 = vmul.f32 %v6972_v26, %v7029_v30  ;;  %v7213_v8 = vld [vmem:[%s9301_s9 + $0x40] sm:$0xff]  ;;  %v7222_v30 = vld [vmem:[%s9302_s10 + $0x68] sm:$0xff] }
  0xc7   : > { %9416 = vst [vmem:[#allocation15_spill] sm:$0xff] %v7193_v9  ;;  %1632 = vperm.xlu0 %6433, %v7174_v39   ;;  %v653_v42 = vadd.f32 %v637_v4, %v571_v54  ;;  %v654_v17 = vadd.f32 %v638_v41, %v572_v0  ;;  %v655_v52 = vadd.f32 %v639_v53, %v573_v43  ;;  %9419 = vst [vmem:[#allocation18_spill] sm:$0xff] %v7222_v30  ;;  %v7227_v0 = vld [vmem:[%s9301_s9 + $0x30] sm:$0xff]  ;;  %v7236_v53 = vld [vmem:[%s9302_s10 + $0x78] sm:$0xff] }
  0xc8   : > { %v692_v55 = vpop.permute.xlu1 %691  ;;  %1204 = vperm.xlu1 %6435, %v7191_v44   ;;  %v656_v15 = vadd.f32 %v640_v50, %v574_v57  ;;  %9421 = vst [vmem:[#allocation20_spill] sm:$0xff] %v7236_v53  ;;  %v3083_v50 = vmul.f32 %v6765_v21, %v6954_v12 }
  0xc9   : > { %v717_v34 = vadd.f32 %v692_v55, %v653_v42  ;;  %v718_v37 = vadd.f32 %v692_v55, %v654_v17  ;;  %v3084_v42 = vmul.f32 %v6768_v22, %v6954_v12 }
  0xca   : > { %v7215_v48 = vpop.permute.xlu0 %782 }
  0xcb   : > { %9418 = vst [vmem:[#allocation17_spill] sm:$0xff] %v7215_v48  ;;  %1642 = vperm.xlu0 %6433, %v7204_v59   ;;  %v733_v55 = vmax.f32 %v717_v34, 0.0  ;;  %v734_v41 = vmax.f32 %v718_v37, 0.0  ;;  %v551_v48 = vmul.f32 %v6952_v19, %v6933_v3  ;;  %v488_v59 = vmul.f32 %v6960_v20, %v7105_v56 }
  0xcc   : > { %v697_v14 = vpop.permute.xlu1 %696  ;;  %1194 = vperm.xlu1 %6435, %v7213_v8  }
  0xcd   : > { %v719_v40 = vadd.f32 %v697_v14, %v655_v52  ;;  %v720_v9 = vadd.f32 %v697_v14, %v656_v15  ;;  %v7247_v52 = vld [vmem:[%s9301_s9 + $0x20] sm:$0xff] }
  0xce   : > { %v7229_v54 = vpop.permute.xlu0 %772 }
  0xcf   : > { %9420 = vst [vmem:[#allocation19_spill] sm:$0xff] %v7229_v54  ;;  %v735_v57 = vmax.f32 %v719_v40, 0.0  ;;  %v736_v4 = vmax.f32 %v720_v9, 0.0  ;;  %1652 = vperm.xlu0 %6433, %v7222_v30   ;;  %v7260_v54 = vld [vmem:[%s9302_s10 + $0x88] sm:$0xff]  ;;  %v487_v30 = vmul.f32 %v6957_v10, %v7105_v56  ;;  %v481_v56 = vmul.f32 %v6957_v10, %v7096_v46 }
  0xd0   : > { %v430_v43 = vpop.permute.xlu1 %429  ;;  %1184 = vperm.xlu1 %6435, %v7227_v0   ;;  %9423 = vst [vmem:[#allocation22_spill] sm:$0xff] %v7260_v54 }
  0xd1   : > { %v3049_v9 = vmul.f32 %v6771_v23, %v430_v43  ;;  %v3050_v17 = vmul.f32 %v6774_v24, %v430_v43  ;;  %v754_v34 = vpack.c.bf16 %v736_v4, %v734_v41  ;;  %v753_v37 = vpack.c.bf16 %v735_v57, %v733_v55 }
  0xd2   : > { %v7249_v15 = vpop.permute.xlu0 %988  ;;  %v552_v57 = vmul.f32 %v6963_v7, %v6933_v3  ;;  %v485_v4 = vmul.f32 %v6957_v10, %v7090_v6  ;;  %v486_v55 = vmul.f32 %v6960_v20, %v7090_v6  ;;  %v633_v6 = vmul.f32 %v6969_v25, %v7159_v49 }
  0xd3   : > { %9422 = vst [vmem:[#allocation21_spill] sm:$0xff] %v7249_v15  ;;  %1662 = vperm.xlu0 %6433, %v7236_v53   ;;  %v7252_v14 = vadd.f32 %v3083_v50, %v3049_v9  ;;  %v7254_v40 = vadd.f32 %v3084_v42, %v3050_v17  ;;  %848 = vmatprep.subr.bf16.mxu0 %v754_v34  ;;  %v7273_v50 = vld [vmem:[%s9301_s9 + $0x10] sm:$0xff] }
  0xd4   : > { %1174 = vperm.xlu1 %6435, %v7247_v52   ;;  %849 = vmatpush1.bf16.msra.mxu0 %v753_v37  ;;  %9424 = vst [vmem:[#allocation23_spill] sm:$0xff] %v7273_v50  ;;  %v3047_v42 = vmul.f32 %v6771_v23, %v7096_v46  ;;  %v3048_v9 = vmul.f32 %v6774_v24, %v7096_v46  ;;  %v7292_v23 = vld [vmem:[%s9302_s10 + $0x98] sm:$0xff] }
  0xd5   : > { %v499_v41 = vpop.permute.xlu1 %498  ;;  %v634_v37 = vmul.f32 %v6972_v26, %v7159_v49  ;;  %9426 = vst [vmem:[#allocation25_spill] sm:$0xff] %v7292_v23  ;;  %v550_v15 = vmul.f32 %v6963_v7, %v6954_v12  ;;  %v635_v49 = vmul.f32 %v6969_v25, %v6916_v61  ;;  %v567_v53 = vadd.f32 %v551_v48, %v485_v4  ;;  %v7326_v48 = vld [vmem:[%s9302_s10 + $0xa8] sm:$0xff] }
  0xd6   : > { %v3081_v3 = vmul.f32 %v6765_v21, %v499_v41  ;;  %v3082_v17 = vmul.f32 %v6768_v22, %v499_v41  ;;  %v7281_v34 = vpop.permute.xlu0 %978  ;;  %v549_v22 = vmul.f32 %v6952_v19, %v6954_v12 }
  0xd7   : > { %9425 = vst [vmem:[#allocation24_spill] sm:$0xff] %v7281_v34  ;;  %1672 = vperm.xlu0 %6433, %v7260_v54   ;;  %v7301_v34 = vld [vmem:[%s9301_s9] sm:$0xff]  ;;  %v636_v54 = vmul.f32 %v6972_v26, %v6916_v61  ;;  %v649_v4 = vadd.f32 %v633_v6, %v567_v53 }
  0xd8   : > { %1164 = vperm.xlu1 %6435, %v7273_v50   ;;  %v3097_v21 = vadd.f32 %v3081_v3, %v3047_v42  ;;  %v3098_v24 = vadd.f32 %v3082_v17, %v3048_v9  ;;  %9427 = vst [vmem:[#allocation26_spill] sm:$0xff] %v7301_v34  ;;  %v553_v42 = vmul.f32 %v6952_v19, %v7121_v27 }
  0xd9   : > { %v554_v9 = vmul.f32 %v6963_v7, %v7121_v27  ;;  %v568_v17 = vadd.f32 %v552_v57, %v486_v55  ;;  %v483_v50 = vmul.f32 %v6957_v10, %v430_v43  ;;  %v484_v27 = vmul.f32 %v6960_v20, %v430_v43 }
  0xda   : > { %v7311_v3 = vpop.permute.xlu0 %968  ;;  %v581_v12 = vpop.permute.xlu1 %580  ;;  %v482_v55 = vmul.f32 %v6960_v20, %v7096_v46  ;;  %v569_v10 = vadd.f32 %v553_v42, %v487_v30 }
  0xdb   : > { %9428 = vst [vmem:[#allocation27_spill] sm:$0xff] %v7311_v3  ;;  %1682 = vperm.xlu0 %6433, %v7292_v23   ;;  %v3131_v61 = vmul.f32 %v6784_v28, %v581_v12  ;;  %v3132_v39 = vmul.f32 %v6787_v29, %v581_v12  ;;  %v650_v57 = vadd.f32 %v634_v37, %v568_v17  ;;  %v7335_v3 = vld [vmem:[%s9302_s10] sm:$0xff] }
  0xdc   : > { %1154 = vperm.xlu1 %6435, %v7301_v34   ;;  %v547_v34 = vmul.f32 %v6952_v19, %v499_v41  ;;  %v548_v37 = vmul.f32 %v6963_v7, %v499_v41  ;;  %v570_v17 = vadd.f32 %v554_v9, %v488_v59  ;;  %v7354_v19 = vld [vmem:[%s9302_s10 + $0xb8] sm:$0xff]  ;;  %v713_v59 = vadd.f32 %v7107_v13, %v649_v4 }
  0xdd   : > { %v7337_v43 = vadd.f32 %v3131_v61, %v3097_v21  ;;  %v7339_v23 = vadd.f32 %v3132_v39, %v3098_v24  ;;  %v714_v7 = vadd.f32 %v7107_v13, %v650_v57  ;;  %v566_v30 = vadd.f32 %v550_v15, %v484_v27  ;;  %v7361_v24 = vld [vmem:[%s9302_s10 + $0x10] sm:$0xff] }
  0xde   : > { %v7343_v53 = vpop.permute.xlu0 %958  ;;  %v585_v6 = vpop.permute.xlu1 %584  ;;  %v565_v41 = vadd.f32 %v549_v22, %v483_v50  ;;  %v651_v13 = vadd.f32 %v635_v49, %v569_v10  ;;  %v652_v15 = vadd.f32 %v636_v54, %v570_v17  ;;  %v563_v57 = vadd.f32 %v547_v34, %v481_v56  ;;  %v7383_v54 = vld [vmem:[%s9302_s10 + $0x20] sm:$0xff] }
  0xdf   : > { %9429 = vst [vmem:[#allocation28_spill] sm:$0xff] %v7343_v53  ;;  %v631_v20 = vmul.f32 %v6969_v25, %v585_v6  ;;  %v632_v46 = vmul.f32 %v6972_v26, %v585_v6  ;;  %1692 = vperm.xlu0 %6433, %v7326_v48   ;;  %v3133_v21 = vmul.f32 %v6784_v28, %v585_v6  ;;  %v730_v49 = vmax.f32 %v714_v7, 0.0 }
  0xe0   : > { %v3134_v39 = vmul.f32 %v6787_v29, %v585_v6  ;;  %1587 = vperm.xlu1 %6435, %v7335_v3   ;;  %v629_v28 = vmul.f32 %v6969_v25, %v581_v12  ;;  %v630_v29 = vmul.f32 %v6972_v26, %v581_v12  ;;  %v564_v4 = vadd.f32 %v548_v37, %v482_v55  ;;  %v7378_v26 = vld [vmem:[%s9302_s10 + $0xc8] sm:$0xff] }
  0xe1   : > { %v7366_v42 = vadd.f32 %v3133_v21, %v7252_v14  ;;  %v648_v50 = vadd.f32 %v632_v46, %v566_v30  ;;  %v647_v22 = vadd.f32 %v631_v20, %v565_v41  ;;  %v729_v12 = vmax.f32 %v713_v59, 0.0  ;;  %v7399_v59 = vld [vmem:[%s9302_s10 + $0x30] sm:$0xff] }
  0xe2   : > { %v7369_v9 = vadd.f32 %v3134_v39, %v7254_v40  ;;  %v7371_v61 = vpop.permute.xlu0 %3208  ;;  %v645_v14 = vadd.f32 %v629_v28, %v563_v57  ;;  %v646_v40 = vadd.f32 %v630_v29, %v564_v4  ;;  %v7394_v39 = vld [vmem:[%s9302_s10 + $0xd8] sm:$0xff]  ;;  %v6436_v4 = vld [vmem:[%s9294_s2] sm:$0xff]  }
  0xe3   : > { %1702 = vperm.xlu0 %6433, %v7354_v19   ;;  %v687_v27 = vpop.permute.xlu1 %686  ;;  %v712_v37 = vadd.f32 %v7123_v11, %v648_v50  ;;  %v711_v10 = vadd.f32 %v7123_v11, %v647_v22  ;;  %v7410_v50 = vld [vmem:[%s9302_s10 + $0xe8] sm:$0xff] }
  0xe4   : > { %v715_v25 = vadd.f32 %v687_v27, %v651_v13  ;;  %v716_v6 = vadd.f32 %v687_v27, %v652_v15  ;;  %1597 = vperm.xlu1 %6435, %v7361_v24   ;;  %v7415_v27 = vld [vmem:[%s9302_s10 + $0x40] sm:$0xff] }
  0xe5   : > { %v728_v28 = vmax.f32 %v712_v37, 0.0  ;;  %v727_v29 = vmax.f32 %v711_v10, 0.0  ;;  %v7456_v37 = vld [vmem:[%s9302_s10 + $0x70] sm:$0xff] }
  0xe6   : > { %v731_v34 = vmax.f32 %v715_v25, 0.0  ;;  %v732_v56 = vmax.f32 %v716_v6, 0.0  ;;  %v7385_v55 = vpop.permute.xlu0 %3198  ;;  %v7429_v6 = vld [vmem:[%s9302_s10 + $0x50] sm:$0xff] }
  0xe7   : > { %1712 = vperm.xlu0 %6433, %v7378_v26   ;;  %v672_v17 = vpop.permute.xlu1 %671 }
  0xe8   : > { %v709_v20 = vadd.f32 %v672_v17, %v645_v14  ;;  %v710_v46 = vadd.f32 %v672_v17, %v646_v40  ;;  %1607 = vperm.xlu1 %6435, %v7383_v54   ;;  %v752_v21 = vpack.c.bf16 %v732_v56, %v730_v49  ;;  %v751_v7 = vpack.c.bf16 %v731_v34, %v729_v12  ;;  %v7442_v12 = vld [vmem:[%s9302_s10 + $0x60] sm:$0xff]  ;;  %v6437_v56 = vld [vmem:[%s9294_s2 + $0x8] sm:$0xff]  }
  0xe9   : > { %v9431_v49 = vmov 0  }
  0xea   : > { %v725_v11 = vmax.f32 %v709_v20, 0.0  ;;  %v726_v30 = vmax.f32 %v710_v46, 0.0  ;;  %v7401_v41 = vpop.permute.xlu0 %3188  ;;  %850 = vmatprep.subr.bf16.mxu0 %v752_v21  ;;  %v6438_v20 = vld [vmem:[%s9294_s2 + $0x10] sm:$0xff]  }
  0xeb   : > { %1722 = vperm.xlu0 %6433, %v7394_v39   ;;  %v7404_v13 = vpop.permute.xlu1 %797  ;;  %851 = vmatpush1.bf16.msra.mxu0 %v751_v7  ;;  %v7483_v21 = vld [vmem:[%s9302_s10 + $0x90] sm:$0xff] }
  0xec   : > { %1617 = vperm.xlu1 %6435, %v7399_v59   ;;  %v750_v15 = vpack.c.bf16 %v728_v28, %v726_v30  ;;  %v749_v22 = vpack.c.bf16 %v727_v29, %v725_v11  ;;  %v6439_v11 = vld [vmem:[%s9294_s2 + $0x18] sm:$0xff]   ;;  %v3225_v28 = vadd.f32 %v7371_v61, %v7067_v2  ;;  %v3226_v29 = vadd.f32 %v7371_v61, %v7069_v5 }
  0xee   : > { %v7417_v57 = vpop.permute.xlu0 %3178  ;;  %852 = vmatprep.subr.bf16.mxu0 %v750_v15  ;;  %v7512_v15 = vld [vmem:[%s9302_s10 + $0xb0] sm:$0xff]  ;;  %v3241_v2 = vmax.f32 %v3225_v28, 0.0  ;;  %v3242_v5 = vmax.f32 %v3226_v29, 0.0 }
  0xef   : > { %1732 = vperm.xlu0 %6433, %v7410_v50   ;;  %v7423_v25 = vpop.permute.xlu1 %787  ;;  %853 = vmatpush1.bf16.msra.mxu0 %v749_v22 }
  0xf0   : > { %1627 = vperm.xlu1 %6435, %v7415_v27  }
  0xf2   : > { %v7431_v14 = vpop.permute.xlu0 %3304  ;;  %5895 = vmatmul.mubr.msk.bf16.vlgmr.msra.gmra.mxu0 %vm825_vm0, %v6436_v4 }
  0xf3   : > { %9430 = vst [vmem:[#allocation29_spill] sm:$0xff] %v7431_v14  ;;  %3730 = vperm.xlu0 %6433, %v6912_v60   ;;  %v7435_v40 = vpop.permute.xlu1 %777  ;;  %880 = vmatprep.mubr.bf16.mxu0 %v9431_v49 }
  0xf4   : > { %1637 = vperm.xlu1 %6435, %v7429_v6  }
  0xf6   : > { %v7444_v34 = vpop.permute.xlu0 %3294 }
  0xf7   : > { %9432 = vst [vmem:[#allocation30_spill] sm:$0xff] %v7444_v34  ;;  %3720 = vperm.xlu0 %6433, %v6921_v62   ;;  %v7450_v60 = vpop.permute.xlu1 %767  ;;  %v7469_v62 = vld [vmem:[%s9302_s10 + $0x80] sm:$0xff] }
  0xf8   : > { %1647 = vperm.xlu1 %6435, %v7442_v12   ;;  %v7721_v34 = vld [vmem:[%s9302_s10 + $0x120] sm:$0xff] }
  0xfa   : > { %5896 = vmatmul.mubr.msk.bf16.gmra.mxu0 %vm825_vm0, %v6437_v56  ;;  %v7459_v10 = vpop.permute.xlu0 %3284  ;;  %v7525_v56 = vld [vmem:[%s9302_s10 + $0xc0] sm:$0xff] }
  0xfb   : > { %9433 = vst [vmem:[#allocation31_spill] sm:$0xff] %v7459_v10  ;;  %3710 = vperm.xlu0 %6433, %v6930_v1   ;;  %v7462_v17 = vpop.permute.xlu1 %983  ;;  %890 = vmatprep.mubr.bf16.mxu0 %v9431_v49  ;;  %v7705_v10 = vld [vmem:[%s9302_s10 + $0x110] sm:$0xff] }
  0xfc   : > { %9434 = vst [vmem:[#allocation32_spill] sm:$0xff] %v7462_v17  ;;  %1657 = vperm.xlu1 %6435, %v7456_v37  }
  0xfe   : > { %v7478_v1 = vpop.permute.xlu0 %3274 }
  0xff   : > { %3700 = vperm.xlu0 %6433, %v6949_v18   ;;  %v7475_v46 = vpop.permute.xlu1 %973  ;;  %9436 = vst [vmem:[#allocation34_spill] sm:$0xff] %v7478_v1  ;;  %v7494_v18 = vld [vmem:[%s9302_s10 + $0xa0] sm:$0xff] }
 0x100   : > { %9435 = vst [vmem:[#allocation33_spill] sm:$0xff] %v7475_v46  ;;  %1667 = vperm.xlu1 %6435, %v7469_v62  }
 0x102   : > { %5897 = vmatmul.mubr.msk.bf16.gmra.mxu0 %vm825_vm0, %v6438_v20  ;;  %v7499_v30 = vpop.permute.xlu0 %3489  ;;  %v3222_v20 = vadd.f32 %v7385_v55, %v7084_v51  ;;  %v3217_v51 = vadd.f32 %v7401_v41, %v7162_v32 }
 0x103   : > { %3690 = vperm.xlu0 %6433, %v6986_v31   ;;  %v7487_v7 = vpop.permute.xlu1 %963  ;;  %900 = vmatprep.mubr.bf16.mxu0 %v9431_v49  ;;  %9438 = vst [vmem:[#allocation36_spill] sm:$0xff] %v7499_v30 }
 0x104   : > { %9437 = vst [vmem:[#allocation35_spill] sm:$0xff] %v7487_v7  ;;  %1677 = vperm.xlu1 %6435, %v7483_v21   ;;  %v9496_v7 = vld [vmem:[#allocation20_spill] sm:$0xff] }
 0x106   : > { %v7520_v61 = vpop.permute.xlu0 %3479 }
 0x107   : > { %3680 = vperm.xlu0 %6433, %v7007_v45   ;;  %v7502_v31 = vpop.permute.xlu1 %953  ;;  %9440 = vst [vmem:[#allocation38_spill] sm:$0xff] %v7520_v61 }
 0x108   : > { %9439 = vst [vmem:[#allocation37_spill] sm:$0xff] %v7502_v31  ;;  %1687 = vperm.xlu1 %6435, %v7494_v18  }
 0x10a   : > { %5898 = vmatmul.mubr.msk.bf16.gmra.mxu0 %vm825_vm0, %v6439_v11 }
 0x10b   : > { %3670 = vperm.xlu0 %6433, %v7035_v58   ;;  %v3204_v45 = vpop.permute.xlu1 %3203  ;;  %1328 = vmatprep.mubr.bf16.mxu0 %v9431_v49  ;;  %v3221_v58 = vadd.f32 %v7385_v55, %v7082_v38  ;;  %v7540_v38 = vld [vmem:[%s9302_s10 + $0xf8] sm:$0xff] }
 0x10c   : > { %v3223_v22 = vadd.f32 %v3204_v45, %v7038_v35  ;;  %v3224_v4 = vadd.f32 %v3204_v45, %v7040_v36  ;;  %1697 = vperm.xlu1 %6435, %v7512_v15   ;;  %v9442_v45 = vld [vmem:[#allocation5_spill] sm:$0xff] }
 0x10e   : > { %v3239_v35 = vmax.f32 %v3223_v22, 0.0  ;;  %v3240_v11 = vmax.f32 %v3224_v4, 0.0  ;;  %v3237_v22 = vmax.f32 %v3221_v58, 0.0  ;;  %v3238_v4 = vmax.f32 %v3222_v20, 0.0  ;;  %v7564_v58 = vld [vmem:[%s9302_s10 + $0x108] sm:$0xff] }
 0x10f   : > { %3660 = vperm.xlu0 %6433, %v7065_v63   ;;  %v3194_v36 = vpop.permute.xlu1 %3193  ;;  %v9444_v63 = vld [vmem:[#allocation13_spill] sm:$0xff] }
 0x110   : > { %v7532_v28 = vpack.c.bf16 %v3241_v2, %v3239_v35  ;;  %v3219_v29 = vadd.f32 %v3194_v36, %v7021_v16  ;;  %v3220_v61 = vadd.f32 %v3194_v36, %v9442_v45  ;;  %1707 = vperm.xlu1 %6435, %v7525_v56   ;;  %v7542_v30 = vpack.c.bf16 %v3242_v5, %v3240_v11  ;;  %v7551_v16 = vld [vmem:[%s9302_s10 + $0xd0] sm:$0xff]  ;;  %v7553_v36 = vpop.permute.xlu0 %3469  ;;  %v7571_v45 = vld [vmem:[%s9302_s10 + $0xe0] sm:$0xff] }
 0x111   : > { %v3218_v55 = vadd.f32 %v7401_v41, %v9444_v63  ;;  %9445 = vst [vmem:[#allocation13_spill] sm:$0xff] %v7553_v36 }
 0x112   : > { %9441 = vst [vmem:[#allocation39_spill] sm:$0xff] %v7532_v28  ;;  %9443 = vst [vmem:[#allocation5_spill] sm:$0xff] %v7542_v30  ;;  %v3235_v2 = vmax.f32 %v3219_v29, 0.0  ;;  %v3236_v35 = vmax.f32 %v3220_v61, 0.0  ;;  %v3233_v61 = vmax.f32 %v3217_v51, 0.0  ;;  %v9488_v30 = vld [vmem:[#allocation14_spill] sm:$0xff] }
 0x113   : > { %1742 = vperm.xlu0 %6433, %v7540_v38   ;;  %v3184_v5 = vpop.permute.xlu1 %3183  ;;  %v3234_v29 = vmax.f32 %v3218_v55, 0.0 }
 0x114   : > { %v7556_v11 = vpack.c.bf16 %v3237_v22, %v3235_v2  ;;  %v3215_v32 = vadd.f32 %v3184_v5, %v7195_v33  ;;  %v3216_v41 = vadd.f32 %v3184_v5, %v7197_v47  ;;  %1717 = vperm.xlu1 %6435, %v7551_v16   ;;  %v7566_v20 = vpack.c.bf16 %v3238_v4, %v3236_v35 }
 0x115   : > { %v3213_v33 = vadd.f32 %v7417_v57, %v7366_v42  ;;  %v3214_v47 = vadd.f32 %v7417_v57, %v7369_v9  ;;  %v7586_v42 = vld [vmem:[%s9302_s10 + $0x118] sm:$0xff]  ;;  %v7590_v9 = vpop.permute.xlu0 %3459 }
 0x116   : > { %9446 = vst [vmem:[#allocation40_spill] sm:$0xff] %v7556_v11  ;;  %9447 = vst [vmem:[#allocation41_spill] sm:$0xff] %v7566_v20  ;;  %v3231_v63 = vmax.f32 %v3215_v32, 0.0  ;;  %v3232_v22 = vmax.f32 %v3216_v41, 0.0  ;;  %v9481_v11 = vld [vmem:[#allocation7_spill] sm:$0xff] }
 0x117   : > { %1752 = vperm.xlu0 %6433, %v7564_v58   ;;  %v3174_v2 = vpop.permute.xlu1 %3173  ;;  %9450 = vst [vmem:[#allocation44_spill] sm:$0xff] %v7590_v9  ;;  %v3229_v57 = vmax.f32 %v3213_v33, 0.0  ;;  %v3230_v5 = vmax.f32 %v3214_v47, 0.0  ;;  %v9457_v47 = vld [vmem:[#allocation11_spill] sm:$0xff]  ;;  %v7661_v9 = vld [vmem:[%s9302_s10 + $0x188] sm:$0xff] }
 0x118   : > { %v7578_v4 = vpack.c.bf16 %v3233_v61, %v3231_v63  ;;  %v3211_v51 = vadd.f32 %v3174_v2, %v7337_v43  ;;  %v3212_v55 = vadd.f32 %v3174_v2, %v7339_v23  ;;  %1727 = vperm.xlu1 %6435, %v7571_v45   ;;  %v7588_v35 = vpack.c.bf16 %v3234_v29, %v3232_v22  ;;  %v9453_v61 = vld [vmem:[#allocation9_spill] sm:$0xff]  ;;  %v7601_v63 = vld [vmem:[%s9302_s10 + $0x128] sm:$0xff]  ;;  %v7614_v2 = vld [vmem:[%s9302_s10 + $0x138] sm:$0xff] }
 0x119   : > { %v7605_v22 = vpop.permute.xlu0 %1229 }
 0x11a   : > { %9448 = vst [vmem:[#allocation42_spill] sm:$0xff] %v7578_v4  ;;  %9449 = vst [vmem:[#allocation43_spill] sm:$0xff] %v7588_v35  ;;  %v3227_v32 = vmax.f32 %v3211_v51, 0.0  ;;  %v3228_v41 = vmax.f32 %v3212_v55, 0.0  ;;  %v7623_v55 = vld [vmem:[%s9302_s10 + $0x148] sm:$0xff]  ;;  %v7783_v4 = vld [vmem:[%s9302_s10 + $0x170] sm:$0xff] }
 0x11b   : > { %1762 = vperm.xlu0 %6433, %v7586_v42   ;;  %v7593_v43 = vpop.permute.xlu1 %3299  ;;  %9455 = vst [vmem:[#allocation47_spill] sm:$0xff] %v7605_v22  ;;  %v7749_v22 = vld [vmem:[%s9302_s10 + $0x140] sm:$0xff] }
 0x11c   : > { %9451 = vst [vmem:[#allocation45_spill] sm:$0xff] %v7593_v43  ;;  %v7595_v23 = vpack.c.bf16 %v3229_v57, %v3227_v32  ;;  %3725 = vperm.xlu1 %6435, %v9453_v61   ;;  %v7603_v29 = vpack.c.bf16 %v3230_v5, %v3228_v41  ;;  %v7632_v5 = vld [vmem:[%s9302_s10 + $0x158] sm:$0xff]  ;;  %v7716_v43 = vld [vmem:[%s9302_s10 + $0x1c8] sm:$0xff] }
 0x11d   : > { %v7625_v57 = vpop.permute.xlu0 %1219  ;;  %v7652_v61 = vld [vmem:[%s9302_s10 + $0x178] sm:$0xff] }
 0x11e   : > { %9452 = vst [vmem:[#allocation46_spill] sm:$0xff] %v7595_v23  ;;  %9454 = vst [vmem:[#allocation9_spill] sm:$0xff] %v7603_v29  ;;  %v9478_v29 = vld [vmem:[#allocation6_spill] sm:$0xff] }
 0x11f   : > { %1772 = vperm.xlu0 %6433, %v7601_v63   ;;  %v7608_v33 = vpop.permute.xlu1 %3289  ;;  %9459 = vst [vmem:[#allocation49_spill] sm:$0xff] %v7625_v57 }
 0x120   : > { %9456 = vst [vmem:[#allocation48_spill] sm:$0xff] %v7608_v33  ;;  %3715 = vperm.xlu1 %6435, %v9457_v47  }
 0x121   : > { %v7636_v41 = vpop.permute.xlu0 %1209 }
 0x122   : > { %9461 = vst [vmem:[#allocation51_spill] sm:$0xff] %v7636_v41  ;;  %v7744_v41 = vld [vmem:[%s9302_s10 + $0x1e8] sm:$0xff] }
 0x123   : > { %1782 = vperm.xlu0 %6433, %v7614_v2   ;;  %v7617_v51 = vpop.permute.xlu1 %3279 }
 0x124   : > { %9458 = vst [vmem:[#allocation11_spill] sm:$0xff] %v7617_v51  ;;  %3705 = vperm.xlu1 %6435, %v7191_v44   ;;  %v7643_v44 = vld [vmem:[%s9302_s10 + $0x168] sm:$0xff]  ;;  %v7693_v51 = vld [vmem:[%s9302_s10 + $0x100] sm:$0xff] }
 0x125   : > { %v7654_v47 = vpop.permute.xlu0 %1199 }
 0x126   : > { %9463 = vst [vmem:[#allocation53_spill] sm:$0xff] %v7654_v47  ;;  %v7737_v47 = vld [vmem:[%s9302_s10 + $0x130] sm:$0xff] }
 0x127   : > { %1792 = vperm.xlu0 %6433, %v7623_v55   ;;  %v7634_v32 = vpop.permute.xlu1 %3269 }
 0x128   : > { %3695 = vperm.xlu1 %6435, %v7213_v8   ;;  %9460 = vst [vmem:[#allocation50_spill] sm:$0xff] %v7634_v32  ;;  %v7672_v32 = vld [vmem:[%s9302_s10 + $0x198] sm:$0xff] }
 0x12b   : > { %1802 = vperm.xlu0 %6433, %v7632_v5   ;;  %v7646_v8 = vpop.permute.xlu1 %3484 }
 0x12c   : > { %3685 = vperm.xlu1 %6435, %v7227_v0   ;;  %9462 = vst [vmem:[#allocation52_spill] sm:$0xff] %v7646_v8  ;;  %v9464_v0 = vld [vmem:[#allocation23_spill] sm:$0xff]  ;;  %v7665_v8 = vpop.permute.xlu0 %1189 }
 0x12d   : > { %9466 = vst [vmem:[#allocation54_spill] sm:$0xff] %v7665_v8 }
 0x12f   : > { %1812 = vperm.xlu0 %6433, %v7643_v44   ;;  %v7663_v36 = vpop.permute.xlu1 %3474 }
 0x130   : > { %3675 = vperm.xlu1 %6435, %v7247_v52   ;;  %9465 = vst [vmem:[#allocation23_spill] sm:$0xff] %v7663_v36  ;;  %v9467_v52 = vld [vmem:[#allocation26_spill] sm:$0xff]  ;;  %v7688_v36 = vpop.permute.xlu0 %1179 }
 0x131   : > { %9469 = vst [vmem:[#allocation55_spill] sm:$0xff] %v7688_v36 }
 0x133   : > { %1822 = vperm.xlu0 %6433, %v7652_v61   ;;  %v7680_v1 = vpop.permute.xlu1 %3464 }
 0x134   : > { %3665 = vperm.xlu1 %6435, %v9464_v0   ;;  %v7677_v0 = vld [vmem:[%s9302_s10 + $0xf0] sm:$0xff]  ;;  %9468 = vst [vmem:[#allocation26_spill] sm:$0xff] %v7680_v1  ;;  %v7700_v1 = vld [vmem:[%s9302_s10 + $0x1b8] sm:$0xff]  ;;  %v7709_v14 = vpop.permute.xlu0 %1169 }
 0x135   : > { %9471 = vst [vmem:[#allocation57_spill] sm:$0xff] %v7709_v14  ;;  %v7760_v14 = vld [vmem:[%s9302_s10 + $0x1f8] sm:$0xff] }
 0x137   : > { %1832 = vperm.xlu0 %6433, %v7661_v9   ;;  %v7707_v33 = vpop.permute.xlu1 %3454 }
 0x138   : > { %3655 = vperm.xlu1 %6435, %v9467_v52   ;;  %v7686_v52 = vld [vmem:[%s9302_s10 + $0x1a8] sm:$0xff]  ;;  %9470 = vst [vmem:[#allocation56_spill] sm:$0xff] %v7707_v33  ;;  %v7730_v33 = vld [vmem:[%s9302_s10 + $0x1d8] sm:$0xff]  ;;  %v7732_v8 = vpop.permute.xlu0 %1159 }
 0x139   : > { %9473 = vst [vmem:[#allocation59_spill] sm:$0xff] %v7732_v8  ;;  %v7765_v8 = vld [vmem:[%s9302_s10 + $0x150] sm:$0xff] }
 0x13b   : > { %1842 = vperm.xlu0 %6433, %v7672_v32   ;;  %v7724_v36 = vpop.permute.xlu1 %1224 }
 0x13c   : > { %1737 = vperm.xlu1 %6435, %v7677_v0   ;;  %9472 = vst [vmem:[#allocation58_spill] sm:$0xff] %v7724_v36  ;;  %v7753_v57 = vpop.permute.xlu0 %1592 }
 0x13d   : > { %9475 = vst [vmem:[#allocation61_spill] sm:$0xff] %v7753_v57 }
 0x13f   : > { %1852 = vperm.xlu0 %6433, %v7686_v52   ;;  %v7751_v36 = vpop.permute.xlu1 %1214 }
 0x140   : > { %1747 = vperm.xlu1 %6435, %v7693_v51   ;;  %9474 = vst [vmem:[#allocation60_spill] sm:$0xff] %v7751_v36  ;;  %v7771_v57 = vpop.permute.xlu0 %1602  ;;  %v7776_v36 = vld [vmem:[%s9302_s10 + $0x160] sm:$0xff] }
 0x141   : > { %9477 = vst [vmem:[#allocation63_spill] sm:$0xff] %v7771_v57  ;;  %v7794_v57 = vld [vmem:[%s9302_s10 + $0x180] sm:$0xff] }
 0x143   : > { %1862 = vperm.xlu0 %6433, %v7700_v1   ;;  %v7768_v23 = vpop.permute.xlu1 %1204 }
 0x144   : > { %1757 = vperm.xlu1 %6435, %v7705_v10   ;;  %9476 = vst [vmem:[#allocation62_spill] sm:$0xff] %v7768_v23  ;;  %v7787_v23 = vpop.permute.xlu0 %1612 }
 0x145   : > { %9480 = vst [vmem:[#allocation64_spill] sm:$0xff] %v7787_v23  ;;  %v7805_v23 = vld [vmem:[%s9302_s10 + $0x190] sm:$0xff] }
 0x147   : > { %1872 = vperm.xlu0 %6433, %v7716_v43   ;;  %v7785_v35 = vpop.permute.xlu1 %1194 }
 0x148   : > { %1767 = vperm.xlu1 %6435, %v7721_v34   ;;  %9479 = vst [vmem:[#allocation6_spill] sm:$0xff] %v7785_v35  ;;  %v7800_v28 = vpop.permute.xlu0 %1622  ;;  %v7812_v35 = vld [vmem:[%s9302_s10 + $0x1a0] sm:$0xff] }
 0x14b   : > { %1882 = vperm.xlu0 %6433, %v7730_v33   ;;  %v7797_v20 = vpop.permute.xlu1 %1184 }
 0x14c   : > { %1777 = vperm.xlu1 %6435, %v7737_v47   ;;  %9483 = vst [vmem:[#allocation7_spill] sm:$0xff] %v7797_v20  ;;  %v7816_v20 = vpop.permute.xlu0 %1632 }
 0x14d   : > { %9487 = vst [vmem:[#allocation65_spill] sm:$0xff] %v7816_v20  ;;  %v7834_v20 = vld [vmem:[%s9302_s10 + $0x1c0] sm:$0xff] }
 0x14f   : > { %1892 = vperm.xlu0 %6433, %v7744_v41  }
 0x150   : > { %1787 = vperm.xlu1 %6435, %v7749_v22   ;;  %v7829_v53 = vpop.permute.xlu0 %1642 }
 0x153   : > { %1902 = vperm.xlu0 %6433, %v7760_v14  }
 0x154   : > { %1797 = vperm.xlu1 %6435, %v7765_v8  }
 0x157   : > { %4093 = vperm.xlu0 %6433, %v9478_v29   ;;  %v9482_v29 = vld [vmem:[#allocation8_spill] sm:$0xff] }
 0x158   : > { %1807 = vperm.xlu1 %6435, %v7776_v36   ;;  %9484 = vst [vmem:[#allocation8_spill] sm:$0xff] %v7800_v28  ;;  %v7823_v28 = vld [vmem:[%s9302_s10 + $0x1b0] sm:$0xff] }
 0x15b   : > { %4103 = vperm.xlu0 %6433, %v9481_v11   ;;  %v9485_v11 = vld [vmem:[#allocation10_spill] sm:$0xff] }
 0x15c   : > { %1817 = vperm.xlu1 %6435, %v7783_v4  }
 0x15f   : > { %4113 = vperm.xlu0 %6433, %v9482_v29   ;;  %v7814_v29 = vpop.permute.xlu1 %1174 }
 0x160   : > { %1827 = vperm.xlu1 %6435, %v7794_v57   ;;  %9486 = vst [vmem:[#allocation10_spill] sm:$0xff] %v7814_v29  ;;  %v7841_v29 = vld [vmem:[%s9302_s10 + $0x1d0] sm:$0xff] }
 0x163   : > { %4123 = vperm.xlu0 %6433, %v9485_v11   ;;  %v9489_v11 = vld [vmem:[#allocation16_spill] sm:$0xff]  ;;  %v7826_v31 = vpop.permute.xlu1 %1164 }
 0x164   : > { %1837 = vperm.xlu1 %6435, %v7805_v23   ;;  %9490 = vst [vmem:[#allocation14_spill] sm:$0xff] %v7826_v31  ;;  %9491 = vst [vmem:[#allocation16_spill] sm:$0xff] %v7829_v53  ;;  %v7845_v31 = vpop.permute.xlu0 %1652  ;;  %v7852_v53 = vld [vmem:[%s9302_s10 + $0x1e0] sm:$0xff] }
 0x165   : > { %9495 = vst [vmem:[#allocation67_spill] sm:$0xff] %v7845_v31  ;;  %v7863_v31 = vld [vmem:[%s9302_s10 + $0x1f0] sm:$0xff] }
 0x167   : > { %4133 = vperm.xlu0 %6433, %v9488_v30   ;;  %v9492_v30 = vld [vmem:[#allocation18_spill] sm:$0xff] }
 0x168   : > { %1847 = vperm.xlu1 %6435, %v7812_v35   ;;  %9493 = vst [vmem:[#allocation18_spill] sm:$0xff] %v7841_v29  ;;  %v7858_v17 = vpop.permute.xlu0 %1662 }
 0x169   : > { %9498 = vst [vmem:[#allocation20_spill] sm:$0xff] %v7858_v17 }
 0x16b   : > { %4143 = vperm.xlu0 %6433, %v9489_v11   ;;  %v7843_v11 = vpop.permute.xlu1 %1154 }
 0x16c   : > { %1857 = vperm.xlu1 %6435, %v7823_v28   ;;  %9494 = vst [vmem:[#allocation66_spill] sm:$0xff] %v7843_v11 }
 0x16f   : > { %4153 = vperm.xlu0 %6433, %v9492_v30   ;;  %v9497_v30 = vld [vmem:[#allocation22_spill] sm:$0xff]  ;;  %v7855_v46 = vpop.permute.xlu1 %1587 }
 0x170   : > { %1867 = vperm.xlu1 %6435, %v7834_v20  }
 0x173   : > { %4163 = vperm.xlu0 %6433, %v9496_v7   ;;  %v9499_v7 = vld [vmem:[#allocation25_spill] sm:$0xff]  ;;  %v7867_v11 = vpop.permute.xlu1 %1597 }
 0x174   : > { %1877 = vperm.xlu1 %6435, %v7841_v29   ;;  %9500 = vst [vmem:[#allocation22_spill] sm:$0xff] %v7867_v11  ;;  %v7869_v29 = vpop.permute.xlu0 %1672 }
 0x177   : > { %4173 = vperm.xlu0 %6433, %v9497_v30   ;;  %v7874_v30 = vpop.permute.xlu1 %1607 }
 0x178   : > { %1887 = vperm.xlu1 %6435, %v7852_v53   ;;  %v7877_v17 = vpop.permute.xlu0 %1682 }
 0x179   : > { %9501 = vst [vmem:[#allocation25_spill] sm:$0xff] %v7877_v17 }
 0x17b   : > { %4183 = vperm.xlu0 %6433, %v9499_v7   ;;  %v7881_v7 = vpop.permute.xlu1 %1617 }
 0x17c   : > { %1897 = vperm.xlu1 %6435, %v7863_v31   ;;  %v7883_v11 = vpop.permute.xlu0 %1692 }
 0x17d   : > { %9502 = vst [vmem:[#allocation68_spill] sm:$0xff] %v7883_v11 }
 0x17f   : > { %4193 = vperm.xlu0 %6433, %v7326_v48  }
 0x180   : > { %4088 = vperm.xlu1 %6435, %v7335_v3   ;;  %v7888_v3 = vpop.permute.xlu1 %1627  ;;  %v7891_v48 = vpop.permute.xlu0 %1702 }
 0x181   : > { %9503 = vst [vmem:[#allocation69_spill] sm:$0xff] %v7891_v48 }
 0x183   : > { %4203 = vperm.xlu0 %6433, %v7354_v19  }
 0x184   : > { %4098 = vperm.xlu1 %6435, %v7361_v24   ;;  %v7895_v19 = vpop.permute.xlu1 %1637  ;;  %v7897_v24 = vpop.permute.xlu0 %1712 }
 0x185   : > { %9504 = vst [vmem:[#allocation70_spill] sm:$0xff] %v7897_v24 }
 0x187   : > { %4213 = vperm.xlu0 %6433, %v7378_v26  }
 0x188   : > { %4108 = vperm.xlu1 %6435, %v7383_v54   ;;  %v7902_v26 = vpop.permute.xlu1 %1647  ;;  %v7905_v54 = vpop.permute.xlu0 %1722 }
 0x189   : > { %9505 = vst [vmem:[#allocation71_spill] sm:$0xff] %v7905_v54 }
 0x18b   : > { %4223 = vperm.xlu0 %6433, %v7394_v39  }
 0x18c   : > { %4118 = vperm.xlu1 %6435, %v7399_v59   ;;  %v7909_v39 = vpop.permute.xlu1 %1657  ;;  %v7911_v59 = vpop.permute.xlu0 %1732 }
 0x18d   : > { %9506 = vst [vmem:[#allocation72_spill] sm:$0xff] %v7911_v59 }
 0x18f   : > { %4233 = vperm.xlu0 %6433, %v7410_v50  }
 0x190   : > { %4128 = vperm.xlu1 %6435, %v7415_v27   ;;  %v7916_v50 = vpop.permute.xlu1 %1667  ;;  %v7919_v27 = vpop.permute.xlu0 %3730 }
 0x191   : > { %9507 = vst [vmem:[#allocation73_spill] sm:$0xff] %v7919_v27  ;;  %v9520_v27 = vld [vmem:[#allocation12_spill] sm:$0xff] }
 0x193   : > { %4243 = vperm.xlu0 %6433, %v7540_v38  }
 0x194   : > { %4138 = vperm.xlu1 %6435, %v7429_v6   ;;  %v7923_v6 = vpop.permute.xlu1 %1677 }
 0x197   : > { %4253 = vperm.xlu0 %6433, %v7564_v58  }
 0x198   : > { %4148 = vperm.xlu1 %6435, %v7442_v12   ;;  %v7925_v12 = vpop.permute.xlu0 %3720 }
 0x199   : > { %9508 = vst [vmem:[#allocation74_spill] sm:$0xff] %v7925_v12 }
 0x19b   : > { %4263 = vperm.xlu0 %6433, %v7586_v42  }
 0x19c   : > { %4158 = vperm.xlu1 %6435, %v7456_v37  }
 0x19f   : > { %4273 = vperm.xlu0 %6433, %v7601_v63  }
 0x1a0   : > { %4168 = vperm.xlu1 %6435, %v7469_v62   ;;  %v7932_v62 = vpop.permute.xlu1 %1687 }
 0x1a1   : > { %9509 = vst [vmem:[#allocation75_spill] sm:$0xff] %v7932_v62 }
 0x1a3   : > { %4283 = vperm.xlu0 %6433, %v7614_v2  }
 0x1a4   : > { %4178 = vperm.xlu1 %6435, %v7483_v21  }
 0x1a7   : > { %4293 = vperm.xlu0 %6433, %v7623_v55  }
 0x1a8   : > { %4188 = vperm.xlu1 %6435, %v7494_v18   ;;  %v7937_v18 = vpop.permute.xlu0 %3710 }
 0x1a9   : > { %9510 = vst [vmem:[#allocation76_spill] sm:$0xff] %v7937_v18 }
 0x1ab   : > { %4303 = vperm.xlu0 %6433, %v7632_v5  }
 0x1ac   : > { %4198 = vperm.xlu1 %6435, %v7512_v15   ;;  %v7945_v42 = vpop.permute.xlu0 %3700 }
 0x1ad   : > { %9512 = vst [vmem:[#allocation78_spill] sm:$0xff] %v7945_v42  ;;  %v9519_v42 = vld [vmem:[#allocation15_spill] sm:$0xff] }
 0x1af   : > { %4313 = vperm.xlu0 %6433, %v7643_v44  }
 0x1b0   : > { %4208 = vperm.xlu1 %6435, %v7525_v56   ;;  %v7943_v56 = vpop.permute.xlu1 %1697 }
 0x1b1   : > { %9511 = vst [vmem:[#allocation77_spill] sm:$0xff] %v7943_v56 }
 0x1b2   : > { %v7929_v37 = vpop.f32.mrf.mxu0 }
 0x1b3   : > { %4323 = vperm.xlu0 %6433, %v7652_v61  }
 0x1b4   : > { %4218 = vperm.xlu1 %6435, %v7551_v16   ;;  %v7935_v21 = vpop.f32.mrf.mxu0  ;;  %v7950_v2 = vpop.permute.xlu1 %1707 }
 0x1b5   : > { %9513 = vst [vmem:[#allocation79_spill] sm:$0xff] %v7950_v2  ;;  %v9557_v2 = vld [vmem:[#allocation51_spill] sm:$0xff] }
 0x1b6   : > { %v7939_v15 = vpop.f32.mrf.mxu0 }
 0x1b7   : > { %4333 = vperm.xlu0 %6433, %v7661_v9  }
 0x1b8   : > { %4228 = vperm.xlu1 %6435, %v7571_v45   ;;  %v878_v38 = vpop.f32.mrf.mxu0  ;;  %v7953_v45 = vpop.permute.xlu0 %3690 }
 0x1b9   : > { %9514 = vst [vmem:[#allocation80_spill] sm:$0xff] %v7953_v45 }
 0x1ba   : > { %v882_v58 = vpop.f32.mrf.mxu0 }
 0x1bb   : > { %4343 = vperm.xlu0 %6433, %v7672_v32   ;;  %v7957_v32 = vpop.permute.xlu1 %1717 }
 0x1bc   : > { %4238 = vperm.xlu1 %6435, %v7677_v0   ;;  %v884_v16 = vpop.f32.mrf.mxu0  ;;  %9515 = vst [vmem:[#allocation81_spill] sm:$0xff] %v7957_v32  ;;  %v7959_v61 = vpop.permute.xlu0 %3680 }
 0x1bd   : > { %9516 = vst [vmem:[#allocation82_spill] sm:$0xff] %v7959_v61 }
 0x1be   : > { %v886_v63 = vpop.f32.mrf.mxu0 }
 0x1bf   : > { %4353 = vperm.xlu0 %6433, %v7686_v52   ;;  %v7964_v52 = vpop.permute.xlu1 %1727 }
 0x1c0   : > { %4248 = vperm.xlu1 %6435, %v7693_v51   ;;  %v888_v9 = vpop.f32.mrf.mxu0  ;;  %9517 = vst [vmem:[#allocation83_spill] sm:$0xff] %v7964_v52 }
 0x1c2   : > { %v892_v55 = vpop.f32.mrf.mxu0 }
 0x1c3   : > { %4363 = vperm.xlu0 %6433, %v7700_v1   ;;  %v7977_v59 = vpop.permute.xlu1 %3725 }
 0x1c4   : > { %4258 = vperm.xlu1 %6435, %v7705_v10   ;;  %v894_v5 = vpop.f32.mrf.mxu0  ;;  %v7967_v10 = vpop.permute.xlu0 %3670  ;;  %9521 = vst [vmem:[#allocation15_spill] sm:$0xff] %v7977_v59  ;;  %v9524_v59 = vld [vmem:[#allocation19_spill] sm:$0xff] }
 0x1c5   : > { %9518 = vst [vmem:[#allocation84_spill] sm:$0xff] %v7967_v10  ;;  %v895_v12 = vadd.f32 %v894_v5, %v7423_v25 }
 0x1c6   : > { %v896_v44 = vpop.f32.mrf.mxu0 }
 0x1c7   : > { %4373 = vperm.xlu0 %6433, %v7716_v43   ;;  %v897_v10 = vadd.f32 %v896_v44, %v9519_v42  ;;  %v920_v5 = vmax.f32 %v895_v12, 0.0 }
 0x1c8   : > { %4268 = vperm.xlu1 %6435, %v7721_v34   ;;  %v898_v0 = vpop.f32.mrf.mxu0  ;;  %v7980_v52 = vpop.permute.xlu0 %3660 }
 0x1c9   : > { %v899_v18 = vadd.f32 %v898_v0, %v9519_v42  ;;  %9522 = vst [vmem:[#allocation12_spill] sm:$0xff] %v7980_v52  ;;  %v921_v44 = vmax.f32 %v897_v10, 0.0 }
 0x1ca   : > { %v902_v51 = vpop.f32.mrf.mxu0 }
 0x1cb   : > { %4383 = vperm.xlu0 %6433, %v7730_v33   ;;  %v903_v34 = vadd.f32 %v902_v51, %v7404_v13  ;;  %v922_v54 = vmax.f32 %v899_v18, 0.0 }
 0x1cc   : > { %4278 = vperm.xlu1 %6435, %v7737_v47   ;;  %v904_v1 = vpop.f32.mrf.mxu0 }
 0x1cd   : > { %v905_v61 = vadd.f32 %v904_v1, %v7404_v13  ;;  %v9523_v1 = vld [vmem:[#allocation17_spill] sm:$0xff]  ;;  %v923_v51 = vmax.f32 %v903_v34, 0.0  ;;  %v873_v34 = vadd.f32 %v7929_v37, %v7450_v60 }
 0x1ce   : > { %v906_v45 = vpop.f32.mrf.mxu0  ;;  %v887_v42 = vadd.f32 %v886_v63, %v9523_v1 }
 0x1cf   : > { %v907_v43 = vadd.f32 %v906_v45, %v9520_v27  ;;  %4393 = vperm.xlu0 %6433, %v7744_v41   ;;  %v889_v45 = vadd.f32 %v888_v9, %v9523_v1  ;;  %v924_v41 = vmax.f32 %v905_v61, 0.0  ;;  %v879_v9 = vadd.f32 %v878_v38, %v9524_v59 }
 0x1d0   : > { %4288 = vperm.xlu1 %6435, %v7749_v22   ;;  %v908_v33 = vpop.f32.mrf.mxu0  ;;  %v893_v22 = vadd.f32 %v892_v55, %v7423_v25  ;;  %v940_v61 = vpack.c.bf16 %v922_v54, %v920_v5  ;;  %v883_v25 = vadd.f32 %v882_v58, %v7435_v40  ;;  %v917_v38 = vmax.f32 %v887_v42, 0.0 }
 0x1d1   : > { %v909_v47 = vadd.f32 %v908_v33, %v9520_v27  ;;  %v925_v0 = vmax.f32 %v907_v43, 0.0  ;;  %v885_v27 = vadd.f32 %v884_v16, %v7435_v40  ;;  %v918_v18 = vmax.f32 %v889_v45, 0.0 }
 0x1d2   : > { %v919_v55 = vmax.f32 %v893_v22, 0.0  ;;  %v877_v16 = vadd.f32 %v7939_v15, %v9524_v59  ;;  %v914_v10 = vmax.f32 %v879_v9, 0.0  ;;  %v915_v40 = vmax.f32 %v883_v25, 0.0 }
 0x1d3   : > { %4403 = vperm.xlu0 %6433, %v7760_v14   ;;  %v926_v13 = vmax.f32 %v909_v47, 0.0  ;;  %v941_v43 = vpack.c.bf16 %v925_v0, %v923_v51  ;;  %v7989_v14 = vpop.permute.xlu1 %3715  ;;  %v916_v12 = vmax.f32 %v885_v27, 0.0  ;;  %v911_v1 = vmax.f32 %v873_v34, 0.0 }
 0x1d4   : > { %4298 = vperm.xlu1 %6435, %v7765_v8   ;;  %9525 = vst [vmem:[#allocation17_spill] sm:$0xff] %v7989_v14  ;;  %v875_v8 = vadd.f32 %v7935_v21, %v7450_v60  ;;  %v939_v63 = vpack.c.bf16 %v921_v44, %v919_v55  ;;  %v913_v21 = vmax.f32 %v877_v16, 0.0  ;;  %v937_v47 = vpack.c.bf16 %v917_v38, %v915_v40  ;;  %v6440_v60 = vld [vmem:[%s9295_s3] sm:$0xff]   ;;  %v9556_v14 = vld [vmem:[#allocation60_spill] sm:$0xff] }
 0x1d5   : > { %v942_v33 = vpack.c.bf16 %v926_v13, %v924_v41  ;;  %v938_v54 = vpack.c.bf16 %v918_v18, %v916_v12  ;;  %v9535_v16 = vld [vmem:[#allocation21_spill] sm:$0xff] }
 0x1d6   : > { %v935_v59 = vpack.c.bf16 %v913_v21, %v911_v1 }
 0x1d7   : > { %1031 = vmatprep.subr.bf16.mxu1 %v942_v33  ;;  %v8000_v58 = vpop.permute.xlu1 %3705 }
 0x1d8   : > { %4308 = vperm.xlu1 %6435, %v7776_v36   ;;  %1032 = vmatpush1.bf16.msra.mxu1 %v941_v43  ;;  %v912_v36 = vmax.f32 %v875_v8, 0.0  ;;  %9526 = vst [vmem:[#allocation19_spill] sm:$0xff] %v8000_v58  ;;  %v9534_v8 = vld [vmem:[#allocation32_spill] sm:$0xff] }
 0x1d9   : > { %1033 = vmatprep.subr.bf16.mxu1 %v940_v61 }
 0x1da   : > { %v936_v0 = vpack.c.bf16 %v914_v10, %v912_v36 }
 0x1db   : > { %v8006_v37 = vpop.permute.xlu1 %3695 }
 0x1dc   : > { %4318 = vperm.xlu1 %6435, %v7783_v4   ;;  %1034 = vmatpush1.bf16.msra.mxu1 %v939_v63  ;;  %9527 = vst [vmem:[#allocation85_spill] sm:$0xff] %v8006_v37 }
 0x1dd   : > { %1035 = vmatprep.subr.bf16.mxu1 %v938_v54  ;;  %v9536_v54 = vld [vmem:[#allocation33_spill] sm:$0xff] }
 0x1df   : > { %v8012_v4 = vpop.permute.xlu1 %3685 }
 0x1e0   : > { %4328 = vperm.xlu1 %6435, %v7794_v57   ;;  %1036 = vmatpush1.bf16.msra.mxu1 %v937_v47  ;;  %9528 = vst [vmem:[#allocation86_spill] sm:$0xff] %v8012_v4  ;;  %v6441_v57 = vld [vmem:[%s9295_s3 + $0x8] sm:$0xff]   ;;  %v9537_v47 = vld [vmem:[#allocation27_spill] sm:$0xff] }
 0x1e1   : > { %1037 = vmatprep.subr.bf16.mxu1 %v936_v0 }
 0x1e3   : > { %v8019_v15 = vpop.permute.xlu1 %3675 }
 0x1e4   : > { %4338 = vperm.xlu1 %6435, %v7805_v23   ;;  %1038 = vmatpush1.bf16.msra.mxu1 %v935_v59  ;;  %9529 = vst [vmem:[#allocation87_spill] sm:$0xff] %v8019_v15  ;;  %v9530_v23 = vld [vmem:[#allocation18_spill] sm:$0xff]  ;;  %v9555_v15 = vld [vmem:[#allocation47_spill] sm:$0xff] }
 0x1e7   : > { %5903 = vmatmul.mubr.msk.bf16.vlgmr.msra.gmra.mxu1 %vm825_vm0, %v6440_v60  ;;  %v8027_v45 = vpop.permute.xlu1 %3665 }
 0x1e8   : > { %4348 = vperm.xlu1 %6435, %v7812_v35   ;;  %1065 = vmatprep.mubr.bf16.mxu1 %v9431_v49  ;;  %v6442_v35 = vld [vmem:[%s9295_s3 + $0x10] sm:$0xff]   ;;  %9531 = vst [vmem:[#allocation18_spill] sm:$0xff] %v8027_v45 }
 0x1ec   : > { %4358 = vperm.xlu1 %6435, %v7823_v28   ;;  %v6443_v28 = vld [vmem:[%s9295_s3 + $0x18] sm:$0xff]  }
 0x1ef   : > { %5904 = vmatmul.mubr.msk.bf16.gmra.mxu1 %vm825_vm0, %v6441_v57 }
 0x1f0   : > { %4368 = vperm.xlu1 %6435, %v7834_v20   ;;  %1075 = vmatprep.mubr.bf16.mxu1 %v9431_v49  ;;  %v8035_v20 = vpop.permute.xlu1 %3655 }
 0x1f1   : > { %9532 = vst [vmem:[#allocation88_spill] sm:$0xff] %v8035_v20 }
 0x1f4   : > { %4378 = vperm.xlu1 %6435, %v9530_v23   ;;  %v9538_v23 = vld [vmem:[#allocation35_spill] sm:$0xff] }
 0x1f7   : > { %5905 = vmatmul.mubr.msk.bf16.gmra.mxu1 %vm825_vm0, %v6442_v35 }
 0x1f8   : > { %4388 = vperm.xlu1 %6435, %v7852_v53   ;;  %1085 = vmatprep.mubr.bf16.mxu1 %v9431_v49 }
 0x1fc   : > { %4398 = vperm.xlu1 %6435, %v7863_v31   ;;  %v9533_v31 = vld [vmem:[#allocation24_spill] sm:$0xff] }
 0x1ff   : > { %5906 = vmatmul.mubr.msk.bf16.gmra.mxu1 %vm825_vm0, %v6443_v28 }
 0x200   : > { %2129 = vmatprep.mubr.bf16.mxu1 %v9431_v49 }
 0x2a7   : > { %v1057_v41 = vpop.f32.mrf.mxu1 }
 0x2a9   : > { %v1059_v13 = vpop.f32.mrf.mxu1 }
 0x2ab   : > { %v1061_v22 = vpop.f32.mrf.mxu1 }
 0x2ad   : > { %v1063_v51 = vpop.f32.mrf.mxu1 }
 0x2af   : > { %v1067_v27 = vpop.f32.mrf.mxu1 }
 0x2b1   : > { %v1069_v53 = vpop.f32.mrf.mxu1 }
 0x2b2   : > { %v1070_v28 = vadd.f32 %v1069_v53, %v9538_v23 }
 0x2b3   : > { %v1071_v5 = vpop.f32.mrf.mxu1 }
 0x2b5   : > { %v1073_v33 = vpop.f32.mrf.mxu1 }
 0x2b6   : > { %v1074_v0 = vadd.f32 %v1073_v33, %v9537_v47  ;;  %v1068_v33 = vadd.f32 %v1067_v27, %v9538_v23  ;;  %v9547_v23 = vld [vmem:[#allocation9_spill] sm:$0xff] }
 0x2b7   : > { %v1077_v42 = vpop.f32.mrf.mxu1 }
 0x2b8   : > { %v1078_v57 = vadd.f32 %v1077_v42, %v9536_v54 }
 0x2b9   : > { %v1079_v44 = vpop.f32.mrf.mxu1 }
 0x2ba   : > { %v1080_v34 = vadd.f32 %v1079_v44, %v9536_v54 }
 0x2bb   : > { %v1081_v43 = vpop.f32.mrf.mxu1 }
 0x2bc   : > { %v1082_v36 = vadd.f32 %v1081_v43, %v9533_v31  ;;  %v1103_v43 = vmax.f32 %v1074_v0, 0.0  ;;  %v9541_v0 = vld [vmem:[#allocation5_spill] sm:$0xff] }
 0x2bd   : > { %v1083_v9 = vpop.f32.mrf.mxu1 }
 0x2be   : > { %v1084_v55 = vadd.f32 %v1083_v9, %v9533_v31  ;;  %v1105_v9 = vmax.f32 %v1080_v34, 0.0  ;;  %v1106_v44 = vmax.f32 %v1082_v36, 0.0 }
 0x2bf   : > { %v1087_v18 = vpop.f32.mrf.mxu1 }
 0x2c0   : > { %v1088_v63 = vadd.f32 %v1087_v18, %v9534_v8  ;;  %v1107_v1 = vmax.f32 %v1084_v55, 0.0  ;;  %v1104_v55 = vmax.f32 %v1078_v57, 0.0  ;;  %v9545_v57 = vld [vmem:[#allocation43_spill] sm:$0xff] }
 0x2c1   : > { %v1089_v61 = vpop.f32.mrf.mxu1 }
 0x2c2   : > { %v1090_v12 = vadd.f32 %v1089_v61, %v9534_v8  ;;  %v1108_v35 = vmax.f32 %v1088_v63, 0.0  ;;  %v1072_v61 = vadd.f32 %v1071_v5, %v9537_v47  ;;  %v9539_v8 = vld [vmem:[#allocation28_spill] sm:$0xff]  ;;  %v1133_v31 = vpack.c.bf16 %v1107_v1, %v1105_v9  ;;  %v9543_v1 = vld [vmem:[#allocation41_spill] sm:$0xff]  ;;  %v9548_v9 = vld [vmem:[#allocation46_spill] sm:$0xff] }
 0x2c3   : > { %v1091_v25 = vpop.f32.mrf.mxu1  ;;  %v1062_v53 = vadd.f32 %v1061_v22, %v9539_v8  ;;  %v6444_v22 = vld [vmem:[%s9296_s4] sm:$0xff]  }
 0x2c4   : > { %v1092_v38 = vadd.f32 %v1091_v25, %v9535_v16  ;;  %v1109_v59 = vmax.f32 %v1090_v12, 0.0  ;;  %v9540_v12 = vld [vmem:[#allocation37_spill] sm:$0xff]  ;;  %v1102_v63 = vmax.f32 %v1072_v61, 0.0 }
 0x2c5   : > { %v1093_v10 = vpop.f32.mrf.mxu1  ;;  %v1060_v42 = vadd.f32 %v1059_v13, %v9540_v12  ;;  %v1058_v34 = vadd.f32 %v1057_v41, %v9540_v12  ;;  %v1098_v36 = vmax.f32 %v1062_v53, 0.0  ;;  %v9542_v41 = vld [vmem:[#allocation39_spill] sm:$0xff]  ;;  %v6448_v61 = vld [vmem:[%s9296_s4 + $0x20] sm:$0xff]  }
 0x2c6   : > { %v1094_v40 = vadd.f32 %v1093_v10, %v9535_v16  ;;  %v1110_v21 = vmax.f32 %v1092_v38, 0.0  ;;  %v1064_v16 = vadd.f32 %v1063_v51, %v9539_v8  ;;  %v1101_v38 = vmax.f32 %v1070_v28, 0.0  ;;  %v6446_v28 = vld [vmem:[%s9296_s4 + $0x10] sm:$0xff]   ;;  %v6451_v8 = vld [vmem:[%s9296_s4 + $0x38] sm:$0xff]  }
 0x2c7   : > { %v1132_v10 = vpack.c.bf16 %v1106_v44, %v1104_v55  ;;  %v1100_v51 = vmax.f32 %v1068_v33, 0.0  ;;  %v1096_v47 = vmax.f32 %v1058_v34, 0.0  ;;  %v6449_v44 = vld [vmem:[%s9296_s4 + $0x28] sm:$0xff]   ;;  %v6455_v33 = vld [vmem:[%s9294_s2 + $0x18] sm:$0xff]  }
 0x2c8   : > { %v1111_v60 = vmax.f32 %v1094_v40, 0.0  ;;  %v1134_v25 = vpack.c.bf16 %v1110_v21, %v1108_v35  ;;  %v1099_v5 = vmax.f32 %v1064_v16, 0.0  ;;  %v1131_v54 = vpack.c.bf16 %v1103_v43, %v1101_v38  ;;  %v9546_v35 = vld [vmem:[#allocation42_spill] sm:$0xff]  ;;  %v6452_v16 = vld [vmem:[%s9294_s2] sm:$0xff]  }
 0x2c9   : > { %v1097_v40 = vmax.f32 %v1060_v42, 0.0  ;;  %v1130_v27 = vpack.c.bf16 %v1102_v63, %v1100_v51  ;;  %v1128_v13 = vpack.c.bf16 %v1098_v36, %v1096_v47  ;;  %v6453_v43 = vld [vmem:[%s9294_s2 + $0x8] sm:$0xff]   ;;  %v9550_v63 = vld [vmem:[#allocation59_spill] sm:$0xff] }
 0x2ca   : > { %v1135_v18 = vpack.c.bf16 %v1111_v60, %v1109_v59  ;;  %v6445_v59 = vld [vmem:[%s9296_s4 + $0x8] sm:$0xff]   ;;  %v9544_v60 = vld [vmem:[#allocation40_spill] sm:$0xff] }
 0x2cb   : > { %v1129_v21 = vpack.c.bf16 %v1099_v5, %v1097_v40  ;;  %v9549_v42 = vld [vmem:[#allocation66_spill] sm:$0xff] }
 0x2cc   : > { %1304 = vmatprep.subr.bf16.mxu0 %v1135_v18  ;;  %v6447_v18 = vld [vmem:[%s9296_s4 + $0x18] sm:$0xff]  }
 0x2cd   : > { %1305 = vmatpush1.bf16.msra.mxu0 %v1134_v25  ;;  %v6450_v25 = vld [vmem:[%s9296_s4 + $0x30] sm:$0xff]  }
 0x2ce   : > { %1306 = vmatprep.subr.bf16.mxu0 %v1133_v31  ;;  %v6454_v31 = vld [vmem:[%s9294_s2 + $0x10] sm:$0xff]  }
 0x2d1   : > { %1307 = vmatpush1.bf16.msra.mxu0 %v1132_v10 }
 0x2d2   : > { %1308 = vmatprep.subr.bf16.mxu0 %v1131_v54 }
 0x2d5   : > { %1309 = vmatpush1.bf16.msra.mxu0 %v1130_v27  ;;  %v9551_v27 = vld [vmem:[#allocation14_spill] sm:$0xff] }
 0x2d6   : > { %1310 = vmatprep.subr.bf16.mxu0 %v1129_v21 }
 0x2d9   : > { %1311 = vmatpush1.bf16.msra.mxu0 %v1128_v13  ;;  %v9552_v13 = vld [vmem:[#allocation57_spill] sm:$0xff] }
 0x2da   : > { %3347 = vmatprep.subr.bf16.mxu0 %v9541_v0 }
 0x2dc   : > { %5915 = vmatmul.mubr.msk.bf16.vlgmr.msra.gmra.mxu0 %vm825_vm0, %v6444_v22 }
 0x2dd   : > { %3348 = vmatpush1.bf16.msra.mxu0 %v9542_v41  ;;  %1338 = vmatprep.mubr.bf16.mxu0 %v9431_v49 }
 0x2de   : > { %3349 = vmatprep.subr.bf16.mxu0 %v9543_v1 }
 0x2e1   : > { %3350 = vmatpush1.bf16.msra.mxu0 %v9544_v60 }
 0x2e2   : > { %3351 = vmatprep.subr.bf16.mxu0 %v9545_v57 }
 0x2e4   : > { %5916 = vmatmul.mubr.msk.bf16.gmra.mxu0 %vm825_vm0, %v6445_v59 }
 0x2e5   : > { %3352 = vmatpush1.bf16.msra.mxu0 %v9546_v35  ;;  %1348 = vmatprep.mubr.bf16.mxu0 %v9431_v49 }
 0x2e6   : > { %3353 = vmatprep.subr.bf16.mxu0 %v9547_v23 }
 0x2e9   : > { %3354 = vmatpush1.bf16.msra.mxu0 %v9548_v9 }
 0x2ec   : > { %5917 = vmatmul.mubr.msk.bf16.gmra.mxu0 %vm825_vm0, %v6446_v28 }
 0x2ed   : > { %1358 = vmatprep.mubr.bf16.mxu0 %v9431_v49 }
 0x2f4   : > { %5918 = vmatmul.mubr.msk.bf16.gmra.mxu0 %vm825_vm0, %v6447_v18 }
 0x2f5   : > { %1368 = vmatprep.mubr.bf16.mxu0 %v9431_v49 }
 0x2fc   : > { %5919 = vmatmul.mubr.msk.bf16.gmra.mxu0 %vm825_vm0, %v6448_v61 }
 0x2fd   : > { %1378 = vmatprep.mubr.bf16.mxu0 %v9431_v49 }
 0x304   : > { %5920 = vmatmul.mubr.msk.bf16.gmra.mxu0 %vm825_vm0, %v6449_v44 }
 0x305   : > { %1388 = vmatprep.mubr.bf16.mxu0 %v9431_v49 }
 0x30c   : > { %5921 = vmatmul.mubr.msk.bf16.gmra.mxu0 %vm825_vm0, %v6450_v25 }
 0x30d   : > { %1398 = vmatprep.mubr.bf16.mxu0 %v9431_v49 }
 0x314   : > { %5922 = vmatmul.mubr.msk.bf16.gmra.mxu0 %vm825_vm0, %v6451_v8 }
 0x315   : > { %3371 = vmatprep.mubr.bf16.mxu0 %v9431_v49 }
 0x31c   : > { %6024 = vmatmul.mubr.msk.bf16.vlgmr.msra.gmra.mxu0 %vm825_vm0, %v6452_v16 }
 0x31d   : > { %3381 = vmatprep.mubr.bf16.mxu0 %v9431_v49 }
 0x324   : > { %6025 = vmatmul.mubr.msk.bf16.gmra.mxu0 %vm825_vm0, %v6453_v43 }
 0x325   : > { %3391 = vmatprep.mubr.bf16.mxu0 %v9431_v49 }
 0x32c   : > { %6026 = vmatmul.mubr.msk.bf16.gmra.mxu0 %vm825_vm0, %v6454_v31 }
 0x32d   : > { %3401 = vmatprep.mubr.bf16.mxu0 %v9431_v49 }
 0x334   : > { %6027 = vmatmul.mubr.msk.bf16.gmra.mxu0 %vm825_vm0, %v6455_v33 }
 0x335   : > { %3556 = vmatprep.mubr.bf16.mxu0 %v9431_v49 }
 0x39c   : > { %v1330_v55 = vpop.f32.mrf.mxu0 }
 0x39d   : > { %v1331_v38 = vadd.f32 %v1330_v55, %v9549_v42 }
 0x39e   : > { %v8124_v12 = vpop.f32.mrf.mxu0 }
 0x39f   : > { %v1409_v54 = vmax.f32 %v1331_v38, 0.0 }
 0x3a0   : > { %v1334_v53 = vpop.f32.mrf.mxu0 }
 0x3a1   : > { %v1335_v10 = vadd.f32 %v1334_v53, %v9550_v63 }
 0x3a2   : > { %v8128_v5 = vpop.f32.mrf.mxu0 }
 0x3a3   : > { %v1411_v34 = vmax.f32 %v1335_v10, 0.0 }
 0x3a4   : > { %v1340_v51 = vpop.f32.mrf.mxu0 }
 0x3a5   : > { %v8130_v40 = vpack.c.bf16 %v1411_v34, %v1409_v54  ;;  %v1341_v21 = vadd.f32 %v1340_v51, %v9551_v27 }
 0x3a6   : > { %v8132_v36 = vpop.f32.mrf.mxu0 }
 0x3a7   : > { %v1413_v41 = vmax.f32 %v1341_v21, 0.0 }
 0x3a8   : > { %v1344_v47 = vpop.f32.mrf.mxu0 }
 0x3a9   : > { %v1345_v22 = vadd.f32 %v1344_v47, %v9552_v13  ;;  %v9553_v47 = vld [vmem:[#allocation49_spill] sm:$0xff] }
 0x3aa   : > { %v8136_v0 = vpop.f32.mrf.mxu0 }
 0x3ab   : > { %v1415_v1 = vmax.f32 %v1345_v22, 0.0 }
 0x3ac   : > { %v8138_v59 = vpop.f32.mrf.mxu0 }
 0x3ad   : > { %v8140_v60 = vpack.c.bf16 %v1415_v1, %v1413_v41  ;;  %v9554_v41 = vld [vmem:[#allocation58_spill] sm:$0xff] }
 0x3ae   : > { %v8142_v57 = vpop.f32.mrf.mxu0 }
 0x3b0   : > { %v8144_v35 = vpop.f32.mrf.mxu0 }
 0x3b2   : > { %v8146_v23 = vpop.f32.mrf.mxu0 }
 0x3b4   : > { %v8148_v28 = vpop.f32.mrf.mxu0 }
 0x3b6   : > { %v8150_v9 = vpop.f32.mrf.mxu0 }
 0x3b8   : > { %v8152_v18 = vpop.f32.mrf.mxu0 }
 0x3ba   : > { %v1366_v61 = vpop.f32.mrf.mxu0 }
 0x3bc   : > { %v1370_v44 = vpop.f32.mrf.mxu0 }
 0x3be   : > { %v1372_v25 = vpop.f32.mrf.mxu0 }
 0x3c0   : > { %v1374_v8 = vpop.f32.mrf.mxu0 }
 0x3c2   : > { %v1376_v16 = vpop.f32.mrf.mxu0 }
 0x3c4   : > { %v1380_v43 = vpop.f32.mrf.mxu0 }
 0x3c6   : > { %v1382_v31 = vpop.f32.mrf.mxu0 }
 0x3c8   : > { %v1384_v33 = vpop.f32.mrf.mxu0 }
 0x3ca   : > { %v1386_v55 = vpop.f32.mrf.mxu0 }
 0x3cb   : > { %v1387_v48 = vadd.f32 %v1386_v55, %v9557_v2 }
 0x3cc   : > { %v1390_v38 = vpop.f32.mrf.mxu0 }
 0x3ce   : > { %v1392_v53 = vpop.f32.mrf.mxu0 }
 0x3cf   : > { %v1393_v45 = vadd.f32 %v1392_v53, %v9556_v14 }
 0x3d0   : > { %v1394_v10 = vpop.f32.mrf.mxu0 }
 0x3d1   : > { %v1395_v20 = vadd.f32 %v1394_v10, %v9553_v47  ;;  %v1434_v53 = vmax.f32 %v1393_v45, 0.0 }
 0x3d2   : > { %v1396_v54 = vpop.f32.mrf.mxu0 }
 0x3d3   : > { %v1397_v22 = vadd.f32 %v1396_v54, %v9553_v47  ;;  %v9559_v47 = vld [vmem:[#allocation53_spill] sm:$0xff] }
 0x3d4   : > { %v1400_v34 = vpop.f32.mrf.mxu0  ;;  %v1377_v55 = vadd.f32 %v1376_v16, %v9559_v47  ;;  %v9561_v16 = vld [vmem:[#allocation54_spill] sm:$0xff] }
 0x3d5   : > { %v1401_v37 = vadd.f32 %v1400_v34, %v9554_v41  ;;  %v1436_v56 = vmax.f32 %v1397_v22, 0.0  ;;  %v9558_v34 = vld [vmem:[#allocation62_spill] sm:$0xff]  ;;  %v1432_v22 = vmax.f32 %v1387_v48, 0.0  ;;  %v1367_v48 = vadd.f32 %v1366_v61, %v9561_v16  ;;  %v9563_v61 = vld [vmem:[#allocation55_spill] sm:$0xff] }
 0x3d6   : > { %v1402_v51 = vpop.f32.mrf.mxu0 }
 0x3d7   : > { %v1403_v1 = vadd.f32 %v1402_v51, %v9554_v41  ;;  %v1391_v51 = vadd.f32 %v1390_v38, %v9556_v14  ;;  %v1383_v41 = vadd.f32 %v1382_v31, %v9558_v34  ;;  %v1381_v14 = vadd.f32 %v1380_v43, %v9558_v34  ;;  %v9560_v31 = vld [vmem:[#allocation6_spill] sm:$0xff] }
 0x3d8   : > { %v1404_v21 = vpop.f32.mrf.mxu0  ;;  %v1373_v45 = vadd.f32 %v1372_v25, %v9560_v31  ;;  %v1371_v43 = vadd.f32 %v1370_v44, %v9560_v31  ;;  %v1424_v44 = vmax.f32 %v1367_v48, 0.0 }
 0x3d9   : > { %v1405_v4 = vadd.f32 %v1404_v21, %v9555_v15  ;;  %v1438_v54 = vmax.f32 %v1403_v1, 0.0  ;;  %v1437_v21 = vmax.f32 %v1401_v37, 0.0  ;;  %v1433_v37 = vmax.f32 %v1391_v51, 0.0  ;;  %v9562_v51 = vld [vmem:[#allocation7_spill] sm:$0xff] }
 0x3da   : > { %v1406_v58 = vpop.f32.mrf.mxu0  ;;  %v1429_v1 = vmax.f32 %v1381_v14, 0.0  ;;  %v1363_v25 = vadd.f32 %v8150_v9, %v9562_v51 }
 0x3db   : > { %v1407_v52 = vadd.f32 %v1406_v58, %v9555_v15  ;;  %v1439_v32 = vmax.f32 %v1405_v4, 0.0  ;;  %v1385_v58 = vadd.f32 %v1384_v33, %v9557_v2  ;;  %v1435_v15 = vmax.f32 %v1395_v20, 0.0 }
 0x3dc   : > { %v8161_v24 = vpop.f32.mrf.mxu0  ;;  %v1375_v2 = vadd.f32 %v1374_v8, %v9559_v47  ;;  %v1365_v8 = vadd.f32 %v8152_v18, %v9561_v16  ;;  %v1425_v47 = vmax.f32 %v1371_v43, 0.0  ;;  %v1355_v18 = vadd.f32 %v8144_v35, %v9563_v61 }
 0x3dd   : > { %v1440_v11 = vmax.f32 %v1407_v52, 0.0  ;;  %v1519_v4 = vpack.c.bf16 %v1439_v32, %v1437_v21  ;;  %v1518_v52 = vpack.c.bf16 %v1436_v56, %v1434_v53  ;;  %v1431_v32 = vmax.f32 %v1385_v58, 0.0 }
 0x3de   : > { %v8165_v62 = vpop.f32.mrf.mxu0  ;;  %v1517_v20 = vpack.c.bf16 %v1435_v15, %v1433_v37  ;;  %v1426_v21 = vmax.f32 %v1373_v45, 0.0  ;;  %v1427_v34 = vmax.f32 %v1375_v2, 0.0  ;;  %v1357_v58 = vadd.f32 %v8146_v23, %v9563_v61 }
 0x3df   : > { %v1520_v17 = vpack.c.bf16 %v1440_v11, %v1438_v54  ;;  %v1430_v11 = vmax.f32 %v1383_v41, 0.0  ;;  %v1515_v41 = vpack.c.bf16 %v1431_v32, %v1429_v1  ;;  %v1423_v14 = vmax.f32 %v1365_v8, 0.0 }
 0x3e0   : > { %v8169_v10 = vpop.f32.mrf.mxu0  ;;  %v1513_v37 = vpack.c.bf16 %v1427_v34, %v1425_v47  ;;  %v1347_v23 = vadd.f32 %v8136_v0, %v9552_v13  ;;  %v1420_v45 = vmax.f32 %v1357_v58, 0.0  ;;  %v1419_v35 = vmax.f32 %v1355_v18, 0.0  ;;  %v9567_v58 = vld [vmem:[#allocation29_spill] sm:$0xff]  ;;  %v9569_v18 = vld [vmem:[#allocation31_spill] sm:$0xff] }
 0x3e1   : > { %2097 = vmatprep.subr.bf16.mxu1 %v1520_v17  ;;  %v1428_v17 = vmax.f32 %v1377_v55, 0.0  ;;  %v1516_v56 = vpack.c.bf16 %v1432_v22, %v1430_v11  ;;  %v9564_v55 = vld [vmem:[#allocation10_spill] sm:$0xff] }
 0x3e2   : > { %2098 = vmatpush1.bf16.msra.mxu1 %v1519_v4  ;;  %v8173_v38 = vpop.f32.mrf.mxu0  ;;  %v1361_v4 = vadd.f32 %v8148_v28, %v9562_v51  ;;  %v1353_v22 = vadd.f32 %v8142_v57, %v9564_v55  ;;  %v1351_v28 = vadd.f32 %v8138_v59, %v9564_v55  ;;  %v1343_v57 = vadd.f32 %v8132_v36, %v9551_v27 }
 0x3e3   : > { %2099 = vmatprep.subr.bf16.mxu1 %v1518_v52  ;;  %v1514_v15 = vpack.c.bf16 %v1428_v17, %v1426_v21  ;;  %v1422_v52 = vmax.f32 %v1363_v25, 0.0  ;;  %v1337_v17 = vadd.f32 %v8128_v5, %v9550_v63  ;;  %v1416_v13 = vmax.f32 %v1347_v23, 0.0  ;;  %v9565_v63 = vld [vmem:[#allocation30_spill] sm:$0xff] }
 0x3e4   : > { %v8177_v33 = vpop.f32.mrf.mxu0  ;;  %v1421_v2 = vmax.f32 %v1361_v4, 0.0  ;;  %v1333_v59 = vadd.f32 %v8124_v12, %v9549_v42  ;;  %v1414_v1 = vmax.f32 %v1343_v57, 0.0  ;;  %v9568_v4 = vld [vmem:[#allocation48_spill] sm:$0xff] }
 0x3e5   : > { %v1512_v11 = vpack.c.bf16 %v1424_v44, %v1422_v52  ;;  %v1412_v27 = vmax.f32 %v1337_v17, 0.0 }
 0x3e6   : > { %2100 = vmatpush1.bf16.msra.mxu1 %v1517_v20  ;;  %v8181_v54 = vpop.f32.mrf.mxu0  ;;  %v1418_v20 = vmax.f32 %v1353_v22, 0.0  ;;  %v1511_v16 = vpack.c.bf16 %v1423_v14, %v1421_v2  ;;  %v1508_v25 = vpack.c.bf16 %v1416_v13, %v1414_v1  ;;  %v1410_v8 = vmax.f32 %v1333_v59, 0.0  ;;  %v9570_v2 = vld [vmem:[#allocation11_spill] sm:$0xff] }
 0x3e7   : > { %2101 = vmatprep.subr.bf16.mxu1 %v1516_v56  ;;  %v1417_v56 = vmax.f32 %v1351_v28, 0.0 }
 0x3e8   : > { %v8187_v53 = vpop.f32.mrf.mxu0  ;;  %v1510_v0 = vpack.c.bf16 %v1420_v45, %v1418_v20 }
 0x3e9   : > { %v1509_v51 = vpack.c.bf16 %v1419_v35, %v1417_v56 }
 0x3ea   : > { %2102 = vmatpush1.bf16.msra.mxu1 %v1515_v41  ;;  %v3389_v9 = vpop.f32.mrf.mxu0  ;;  %v9566_v41 = vld [vmem:[#allocation45_spill] sm:$0xff] }
 0x3eb   : > { %2103 = vmatprep.subr.bf16.mxu1 %v1514_v15  ;;  %v1506_v15 = vpack.c.bf16 %v1412_v27, %v1410_v8  ;;  %v3390_v14 = vadd.f32 %v3389_v9, %v9569_v18  ;;  %v3388_v9 = vadd.f32 %v8187_v53, %v9569_v18  ;;  %v6473_v18 = vld [vmem:[%s9297_s5 + $0x68] sm:$0xff]  }
 0x3ec   : > { %v3393_v31 = vpop.f32.mrf.mxu0 }
 0x3ed   : > { %v3419_v13 = vmax.f32 %v3390_v14, 0.0  ;;  %v6474_v14 = vld [vmem:[%s9297_s5 + $0x70] sm:$0xff]  }
 0x3ee   : > { %2104 = vmatpush1.bf16.msra.mxu1 %v1513_v37  ;;  %v3395_v32 = vpop.f32.mrf.mxu0 }
 0x3ef   : > { %2105 = vmatprep.subr.bf16.mxu1 %v1512_v11  ;;  %v3396_v47 = vadd.f32 %v3395_v32, %v9568_v4  ;;  %v6456_v11 = vld [vmem:[%s9297_s5] sm:$0xff]   ;;  %v3386_v32 = vadd.f32 %v8181_v54, %v9570_v2  ;;  %v9572_v54 = vld [vmem:[#allocation50_spill] sm:$0xff] }
 0x3f0   : > { %v3397_v48 = vpop.f32.mrf.mxu0  ;;  %v3376_v56 = vadd.f32 %v8165_v62, %v9572_v54 }
 0x3f1   : > { %v3398_v22 = vadd.f32 %v3397_v48, %v9565_v63  ;;  %v3421_v57 = vmax.f32 %v3396_v47, 0.0  ;;  %v9571_v48 = vld [vmem:[#allocation34_spill] sm:$0xff]  ;;  %v3417_v53 = vmax.f32 %v3386_v32, 0.0  ;;  %v6482_v32 = vld [vmem:[%s9297_s5 + $0xb0] sm:$0xff]  }
 0x3f2   : > { %2106 = vmatpush1.bf16.msra.mxu1 %v1511_v16  ;;  %v3399_v43 = vpop.f32.mrf.mxu0  ;;  %v3380_v17 = vadd.f32 %v8173_v38, %v9571_v48  ;;  %v3418_v38 = vmax.f32 %v3388_v9, 0.0  ;;  %v6469_v47 = vld [vmem:[%s9297_s5 + $0x48] sm:$0xff]  }
 0x3f3   : > { %2107 = vmatprep.subr.bf16.mxu1 %v1510_v0  ;;  %v3400_v5 = vadd.f32 %v3399_v43, %v9565_v63  ;;  %v3422_v35 = vmax.f32 %v3398_v22, 0.0  ;;  %v3378_v43 = vadd.f32 %v8169_v10, %v9571_v48  ;;  %v6458_v63 = vld [vmem:[%s9297_s5 + $0x10] sm:$0xff]   ;;  %v6471_v22 = vld [vmem:[%s9297_s5 + $0x58] sm:$0xff]  }
 0x3f4   : > { %v3403_v36 = vpop.f32.mrf.mxu0  ;;  %v3415_v1 = vmax.f32 %v3380_v17, 0.0 }
 0x3f5   : > { %v3404_v12 = vadd.f32 %v3403_v36, %v9566_v41  ;;  %v3423_v37 = vmax.f32 %v3400_v5, 0.0  ;;  %v3374_v36 = vadd.f32 %v8161_v24, %v9572_v54  ;;  %v3414_v62 = vmax.f32 %v3378_v43, 0.0  ;;  %v6459_v24 = vld [vmem:[%s9295_s3] sm:$0xff]   ;;  %v6460_v5 = vld [vmem:[%s9297_s5 + $0x18] sm:$0xff]  }
 0x3f6   : > { %2108 = vmatpush1.bf16.msra.mxu1 %v1509_v51  ;;  %v3405_v21 = vpop.f32.mrf.mxu0  ;;  %v3439_v51 = vpack.c.bf16 %v3419_v13, %v3417_v53  ;;  %v6485_v13 = vld [vmem:[%s9297_s5 + $0xc8] sm:$0xff]  }
 0x3f7   : > { %2109 = vmatprep.subr.bf16.mxu1 %v1508_v25  ;;  %v3406_v61 = vadd.f32 %v3405_v21, %v9566_v41  ;;  %v3424_v28 = vmax.f32 %v3404_v12, 0.0  ;;  %v3413_v25 = vmax.f32 %v3376_v56, 0.0  ;;  %v3412_v10 = vmax.f32 %v3374_v36, 0.0  ;;  %v6461_v41 = vld [vmem:[%s9295_s3 + $0x8] sm:$0xff]   ;;  %v6466_v12 = vld [vmem:[%s9297_s5 + $0x30] sm:$0xff]  }
 0x3f8   : > { %v3407_v34 = vpop.f32.mrf.mxu0 }
 0x3f9   : > { %v3408_v44 = vadd.f32 %v3407_v34, %v9567_v58  ;;  %v3425_v23 = vmax.f32 %v3406_v61, 0.0  ;;  %v3437_v8 = vpack.c.bf16 %v3415_v1, %v3413_v25  ;;  %v3436_v34 = vpack.c.bf16 %v3414_v62, %v3412_v10  ;;  %v6462_v61 = vld [vmem:[%s9297_s5 + $0x20] sm:$0xff]   ;;  %v9574_v1 = vld [vmem:[#allocation22_spill] sm:$0xff]  ;;  %v6486_v62 = vld [vmem:[%s9297_s5 + $0xd0] sm:$0xff]  }
 0x3fa   : > { %2110 = vmatpush1.bf16.msra.mxu1 %v8140_v60  ;;  %v3409_v42 = vpop.f32.mrf.mxu0  ;;  %v3394_v60 = vadd.f32 %v3393_v31, %v9568_v4  ;;  %v3441_v31 = vpack.c.bf16 %v3423_v37, %v3421_v57  ;;  %v6468_v4 = vld [vmem:[%s9297_s5 + $0x40] sm:$0xff]   ;;  %v6475_v37 = vld [vmem:[%s9297_s5 + $0x78] sm:$0xff]   ;;  %v9575_v10 = vld [vmem:[#allocation63_spill] sm:$0xff] }
 0x3fb   : > { %v3410_v55 = vadd.f32 %v3409_v42, %v9567_v58  ;;  %2111 = vmatprep.subr.bf16.mxu1 %v1506_v15  ;;  %v3426_v52 = vmax.f32 %v3408_v44, 0.0  ;;  %v6463_v58 = vld [vmem:[%s9295_s3 + $0x10] sm:$0xff]   ;;  %v6464_v44 = vld [vmem:[%s9297_s5 + $0x28] sm:$0xff]   ;;  %v6465_v15 = vld [vmem:[%s9295_s3 + $0x18] sm:$0xff]  }
 0x3fc   : > { %v3420_v0 = vmax.f32 %v3394_v60, 0.0  ;;  %v6467_v42 = vld [vmem:[%s9297_s5 + $0x38] sm:$0xff]  }
 0x3fd   : > { %v3427_v45 = vmax.f32 %v3410_v55, 0.0  ;;  %v3442_v16 = vpack.c.bf16 %v3426_v52, %v3424_v28  ;;  %v6470_v55 = vld [vmem:[%s9297_s5 + $0x50] sm:$0xff]   ;;  %v6472_v52 = vld [vmem:[%s9297_s5 + $0x60] sm:$0xff]   ;;  %v6479_v60 = vld [vmem:[%s9297_s5 + $0x98] sm:$0xff]  }
 0x3fe   : > { %2112 = vmatpush1.bf16.msra.mxu1 %v8130_v40  ;;  %v3384_v40 = vadd.f32 %v8177_v33, %v9570_v2  ;;  %v3440_v59 = vpack.c.bf16 %v3422_v35, %v3420_v0  ;;  %v6457_v33 = vld [vmem:[%s9297_s5 + $0x8] sm:$0xff]   ;;  %v6480_v28 = vld [vmem:[%s9297_s5 + $0xa0] sm:$0xff]   ;;  %v6483_v57 = vld [vmem:[%s9297_s5 + $0xb8] sm:$0xff]  }
 0x3ff   : > { %v3443_v20 = vpack.c.bf16 %v3427_v45, %v3425_v23  ;;  %v6476_v23 = vld [vmem:[%s9297_s5 + $0x80] sm:$0xff]   ;;  %v6477_v45 = vld [vmem:[%s9297_s5 + $0x88] sm:$0xff]  }
 0x400   : > { %v3416_v27 = vmax.f32 %v3384_v40, 0.0  ;;  %v6481_v2 = vld [vmem:[%s9297_s5 + $0xa8] sm:$0xff]   ;;  %v9573_v0 = vld [vmem:[#allocation61_spill] sm:$0xff] }
 0x401   : > { %2130 = vmatmul.mubr.bf16.vlgmr.msra.gmra.mxu1 %v6456_v11  ;;  %3532 = vmatprep.subr.bf16.mxu0 %v3443_v20  ;;  %v6478_v11 = vld [vmem:[%s9297_s5 + $0x90] sm:$0xff]   ;;  %v6484_v20 = vld [vmem:[%s9297_s5 + $0xc0] sm:$0xff]  }
 0x402   : > { %3533 = vmatpush1.bf16.msra.mxu0 %v3442_v16  ;;  %2139 = vmatprep.mubr.bf16.mxu1 %v9431_v49  ;;  %v3438_v21 = vpack.c.bf16 %v3418_v38, %v3416_v27 }
 0x403   : > { %3534 = vmatprep.subr.bf16.mxu0 %v3441_v31 }
 0x406   : > { %3535 = vmatpush1.bf16.msra.mxu0 %v3440_v59 }
 0x407   : > { %3536 = vmatprep.subr.bf16.mxu0 %v3439_v51 }
 0x409   : > { %2140 = vmatmul.mubr.bf16.gmra.mxu1 %v6457_v33 }
 0x40a   : > { %3537 = vmatpush1.bf16.msra.mxu0 %v3438_v21  ;;  %2149 = vmatprep.mubr.bf16.mxu1 %v9431_v49 }
 0x40b   : > { %3538 = vmatprep.subr.bf16.mxu0 %v3437_v8 }
 0x40e   : > { %3539 = vmatpush1.bf16.msra.mxu0 %v3436_v34 }
 0x411   : > { %2150 = vmatmul.mubr.bf16.gmra.mxu1 %v6458_v63  ;;  %6032 = vmatmul.mubr.msk.bf16.vlgmr.msra.gmra.mxu0 %vm825_vm0, %v6459_v24 }
 0x412   : > { %2159 = vmatprep.mubr.bf16.mxu1 %v9431_v49  ;;  %3566 = vmatprep.mubr.bf16.mxu0 %v9431_v49 }
 0x419   : > { %2160 = vmatmul.mubr.bf16.gmra.mxu1 %v6460_v5  ;;  %6033 = vmatmul.mubr.msk.bf16.gmra.mxu0 %vm825_vm0, %v6461_v41 }
 0x41a   : > { %2169 = vmatprep.mubr.bf16.mxu1 %v9431_v49  ;;  %3576 = vmatprep.mubr.bf16.mxu0 %v9431_v49 }
 0x421   : > { %2170 = vmatmul.mubr.bf16.gmra.mxu1 %v6462_v61  ;;  %6034 = vmatmul.mubr.msk.bf16.gmra.mxu0 %vm825_vm0, %v6463_v58 }
 0x422   : > { %2179 = vmatprep.mubr.bf16.mxu1 %v9431_v49  ;;  %3586 = vmatprep.mubr.bf16.mxu0 %v9431_v49 }
 0x429   : > { %2180 = vmatmul.mubr.bf16.gmra.mxu1 %v6464_v44  ;;  %6035 = vmatmul.mubr.msk.bf16.gmra.mxu0 %vm825_vm0, %v6465_v15 }
 0x42a   : > { %2189 = vmatprep.mubr.bf16.mxu1 %v9431_v49  ;;  %3829 = vmatprep.mubr.bf16.mxu0 %v9431_v49 }
 0x431   : > { %2190 = vmatmul.mubr.bf16.gmra.mxu1 %v6466_v12 }
 0x432   : > { %2199 = vmatprep.mubr.bf16.mxu1 %v9431_v49 }
 0x439   : > { %2200 = vmatmul.mubr.bf16.gmra.mxu1 %v6467_v42 }
 0x43a   : > { %2209 = vmatprep.mubr.bf16.mxu1 %v9431_v49 }
 0x441   : > { %2210 = vmatmul.mubr.bf16.gmra.mxu1 %v6468_v4 }
 0x442   : > { %2219 = vmatprep.mubr.bf16.mxu1 %v9431_v49 }
 0x449   : > { %2220 = vmatmul.mubr.bf16.gmra.mxu1 %v6469_v47 }
 0x44a   : > { %2229 = vmatprep.mubr.bf16.mxu1 %v9431_v49 }
 0x451   : > { %2230 = vmatmul.mubr.bf16.gmra.mxu1 %v6470_v55 }
 0x452   : > { %2239 = vmatprep.mubr.bf16.mxu1 %v9431_v49 }
 0x459   : > { %2240 = vmatmul.mubr.bf16.gmra.mxu1 %v6471_v22 }
 0x45a   : > { %2249 = vmatprep.mubr.bf16.mxu1 %v9431_v49 }
 0x461   : > { %2250 = vmatmul.mubr.bf16.gmra.mxu1 %v6472_v52  ;;  %v6487_v52 = vld [vmem:[%s9297_s5 + $0xd8] sm:$0xff]  }
 0x462   : > { %2259 = vmatprep.mubr.bf16.mxu1 %v9431_v49 }
 0x469   : > { %2260 = vmatmul.mubr.bf16.gmra.mxu1 %v6473_v18 }
 0x46a   : > { %2269 = vmatprep.mubr.bf16.mxu1 %v9431_v49 }
 0x471   : > { %2270 = vmatmul.mubr.bf16.gmra.mxu1 %v6474_v14 }
 0x472   : > { %2279 = vmatprep.mubr.bf16.mxu1 %v9431_v49 }
 0x479   : > { %2280 = vmatmul.mubr.bf16.gmra.mxu1 %v6475_v37  ;;  %v9576_v37 = vld [vmem:[#allocation64_spill] sm:$0xff] }
 0x47a   : > { %2289 = vmatprep.mubr.bf16.mxu1 %v9431_v49 }
 0x481   : > { %2290 = vmatmul.mubr.bf16.gmra.mxu1 %v6476_v23 }
 0x482   : > { %2299 = vmatprep.mubr.bf16.mxu1 %v9431_v49 }
 0x489   : > { %2300 = vmatmul.mubr.bf16.gmra.mxu1 %v6477_v45 }
 0x48a   : > { %2309 = vmatprep.mubr.bf16.mxu1 %v9431_v49 }
 0x491   : > { %2310 = vmatmul.mubr.bf16.gmra.mxu1 %v6478_v11 }
 0x492   : > { %2319 = vmatprep.mubr.bf16.mxu1 %v9431_v49 }
 0x499   : > { %2320 = vmatmul.mubr.bf16.gmra.mxu1 %v6479_v60 }
 0x49a   : > { %2329 = vmatprep.mubr.bf16.mxu1 %v9431_v49 }
 0x4a1   : > { %2330 = vmatmul.mubr.bf16.gmra.mxu1 %v6480_v28 }
 0x4a2   : > { %2339 = vmatprep.mubr.bf16.mxu1 %v9431_v49 }
 0x4a9   : > { %2340 = vmatmul.mubr.bf16.gmra.mxu1 %v6481_v2 }
 0x4aa   : > { %2349 = vmatprep.mubr.bf16.mxu1 %v9431_v49 }
 0x4b1   : > { %2350 = vmatmul.mubr.bf16.gmra.mxu1 %v6482_v32 }
 0x4b2   : > { %2359 = vmatprep.mubr.bf16.mxu1 %v9431_v49 }
 0x4b9   : > { %2360 = vmatmul.mubr.bf16.gmra.mxu1 %v6483_v57 }
 0x4ba   : > { %2369 = vmatprep.mubr.bf16.mxu1 %v9431_v49 }
 0x4c1   : > { %v2131_v9 = vpop.f32.mrf.mxu1  ;;  %2370 = vmatmul.mubr.bf16.gmra.mxu1 %v6484_v20 }
 0x4c2   : > { %v2132_v35 = vadd.f32 %v2131_v9, %v7855_v46  ;;  %2379 = vmatprep.mubr.bf16.mxu1 %v9431_v49 }
 0x4c3   : > { %v2133_v16 = vpop.f32.mrf.mxu1 }
 0x4c4   : > { %v2134_v48 = vadd.f32 %v2133_v16, %v7855_v46  ;;  %v2450_v31 = vmax.f32 %v2132_v35, 0.0 }
 0x4c5   : > { %v2135_v17 = vpop.f32.mrf.mxu1 }
 0x4c6   : > { %v2451_v40 = vmax.f32 %v2134_v48, 0.0  ;;  %v2136_v54 = vadd.f32 %v2135_v17, %v9573_v0 }
 0x4c7   : > { %v2137_v56 = vpop.f32.mrf.mxu1 }
 0x4c8   : > { %v6218_v53 = vpack.c.bf16 %v2451_v40, %v2450_v31  ;;  %v2138_v43 = vadd.f32 %v2137_v56, %v9573_v0  ;;  %v2452_v46 = vmax.f32 %v2136_v54, 0.0  ;;  %v6488_v31 = vld [vmem:[%s9297_s5 + $0xe0] sm:$0xff]   ;;  %v9577_v54 = vld [vmem:[#allocation8_spill] sm:$0xff] }
 0x4c9   : > { %v2141_v38 = vpop.f32.mrf.mxu1  ;;  %2380 = vmatmul.mubr.bf16.gmra.mxu1 %v6485_v13 }
 0x4ca   : > { %2962 = vst [vmem:[%s8360_s17] sm:$0xff] %v6218_v53  ;;  %v2453_v59 = vmax.f32 %v2138_v43, 0.0  ;;  %v2142_v51 = vadd.f32 %v2141_v38, %v9574_v1  ;;  %2389 = vmatprep.mubr.bf16.mxu1 %v9431_v49 }
 0x4cb   : > { %v2143_v33 = vpop.f32.mrf.mxu1 }
 0x4cc   : > { %v6219_v36 = vpack.c.bf16 %v2453_v59, %v2452_v46  ;;  %v2144_v27 = vadd.f32 %v2143_v33, %v9574_v1  ;;  %v2454_v21 = vmax.f32 %v2142_v51, 0.0 }
 0x4cd   : > { %v2145_v25 = vpop.f32.mrf.mxu1 }
 0x4ce   : > { %2963 = vst [vmem:[%s8360_s17 + $0x10] sm:$0xff] %v6219_v36  ;;  %v2455_v8 = vmax.f32 %v2144_v27, 0.0  ;;  %v2146_v34 = vadd.f32 %v2145_v25, %v9575_v10 }
 0x4cf   : > { %v2147_v63 = vpop.f32.mrf.mxu1 }
 0x4d0   : > { %v6220_v24 = vpack.c.bf16 %v2455_v8, %v2454_v21  ;;  %v2148_v5 = vadd.f32 %v2147_v63, %v9575_v10  ;;  %v2456_v58 = vmax.f32 %v2146_v34, 0.0  ;;  %v6489_v10 = vld [vmem:[%s9297_s5 + $0xe8] sm:$0xff]  }
 0x4d1   : > { %v2151_v41 = vpop.f32.mrf.mxu1  ;;  %2390 = vmatmul.mubr.bf16.gmra.mxu1 %v6486_v62  ;;  %v8372_v61 = vpop.f32.mrf.mxu0 }
 0x4d2   : > { %2964 = vst [vmem:[%s8360_s17 + $0x20] sm:$0xff] %v6220_v24  ;;  %v2457_v44 = vmax.f32 %v2148_v5, 0.0  ;;  %v2152_v15 = vadd.f32 %v2151_v41, %v7874_v30  ;;  %2399 = vmatprep.mubr.bf16.mxu1 %v9431_v49  ;;  %v9578_v24 = vld [vmem:[#allocation65_spill] sm:$0xff] }
 0x4d3   : > { %v2153_v12 = vpop.f32.mrf.mxu1  ;;  %v8377_v42 = vpop.f32.mrf.mxu0 }
 0x4d4   : > { %v6221_v4 = vpack.c.bf16 %v2457_v44, %v2456_v58  ;;  %v2154_v47 = vadd.f32 %v2153_v12, %v7874_v30  ;;  %v2458_v18 = vmax.f32 %v2152_v15, 0.0 }
 0x4d5   : > { %v2155_v55 = vpop.f32.mrf.mxu1  ;;  %v8380_v22 = vpop.f32.mrf.mxu0 }
 0x4d6   : > { %2965 = vst [vmem:[%s8360_s17 + $0x30] sm:$0xff] %v6221_v4  ;;  %v2459_v14 = vmax.f32 %v2154_v47, 0.0  ;;  %v2156_v23 = vadd.f32 %v2155_v55, %v9576_v37 }
 0x4d7   : > { %v2157_v45 = vpop.f32.mrf.mxu1  ;;  %v8387_v11 = vpop.f32.mrf.mxu0 }
 0x4d8   : > { %v6222_v60 = vpack.c.bf16 %v2459_v14, %v2458_v18  ;;  %v2158_v28 = vadd.f32 %v2157_v45, %v9576_v37  ;;  %v2460_v32 = vmax.f32 %v2156_v23, 0.0 }
 0x4d9   : > { %v2161_v30 = vpop.f32.mrf.mxu1  ;;  %2400 = vmatmul.mubr.bf16.gmra.mxu1 %v6487_v52  ;;  %v8390_v2 = vpop.f32.mrf.mxu0 }
 0x4da   : > { %2966 = vst [vmem:[%s8360_s17 + $0x40] sm:$0xff] %v6222_v60  ;;  %v2461_v57 = vmax.f32 %v2158_v28, 0.0  ;;  %v2162_v20 = vadd.f32 %v2161_v30, %v7881_v7  ;;  %2409 = vmatprep.mubr.bf16.mxu1 %v9431_v49  ;;  %v6490_v60 = vld [vmem:[%s9297_s5 + $0xf0] sm:$0xff]  }
 0x4db   : > { %v2163_v9 = vpop.f32.mrf.mxu1  ;;  %v8395_v35 = vpop.f32.mrf.mxu0 }
 0x4dc   : > { %v6223_v16 = vpack.c.bf16 %v2461_v57, %v2460_v32  ;;  %v2164_v48 = vadd.f32 %v2163_v9, %v7881_v7  ;;  %v2462_v40 = vmax.f32 %v2162_v20, 0.0  ;;  %v9579_v32 = vld [vmem:[#allocation16_spill] sm:$0xff] }
 0x4dd   : > { %v2165_v17 = vpop.f32.mrf.mxu1  ;;  %v8398_v13 = vpop.f32.mrf.mxu0  ;;  %v9580_v20 = vld [vmem:[#allocation36_spill] sm:$0xff] }
 0x4de   : > { %2967 = vst [vmem:[%s8360_s17 + $0x50] sm:$0xff] %v6223_v16  ;;  %v2463_v0 = vmax.f32 %v2164_v48, 0.0  ;;  %v2166_v56 = vadd.f32 %v2165_v17, %v9577_v54  ;;  %v9581_v16 = vld [vmem:[#allocation38_spill] sm:$0xff]  ;;  %v9582_v17 = vld [vmem:[#allocation52_spill] sm:$0xff] }
 0x4df   : > { %v2167_v53 = vpop.f32.mrf.mxu1  ;;  %v8405_v43 = vpop.f32.mrf.mxu0 }
 0x4e0   : > { %v6224_v38 = vpack.c.bf16 %v2463_v0, %v2462_v40  ;;  %v2168_v46 = vadd.f32 %v2167_v53, %v9577_v54  ;;  %v2464_v1 = vmax.f32 %v2166_v56, 0.0  ;;  %v9583_v53 = vld [vmem:[#allocation26_spill] sm:$0xff] }
 0x4e1   : > { %v2171_v7 = vpop.f32.mrf.mxu1  ;;  %2410 = vmatmul.mubr.bf16.gmra.mxu1 %v6488_v31  ;;  %v8408_v59 = vpop.f32.mrf.mxu0 }
 0x4e2   : > { %2968 = vst [vmem:[%s8360_s17 + $0x60] sm:$0xff] %v6224_v38  ;;  %v2465_v51 = vmax.f32 %v2168_v46, 0.0  ;;  %v2172_v33 = vadd.f32 %v2171_v7, %v7888_v3  ;;  %2419 = vmatprep.mubr.bf16.mxu1 %v9431_v49  ;;  %v3571_v38 = vadd.f32 %v8395_v35, %v9583_v53  ;;  %v9584_v46 = vld [vmem:[#allocation23_spill] sm:$0xff] }
 0x4e3   : > { %v2173_v36 = vpop.f32.mrf.mxu1  ;;  %v3580_v27 = vpop.f32.mrf.mxu0 }
 0x4e4   : > { %v6225_v25 = vpack.c.bf16 %v2465_v51, %v2464_v1  ;;  %v2174_v62 = vadd.f32 %v2173_v36, %v7888_v3  ;;  %v2466_v34 = vmax.f32 %v2172_v33, 0.0  ;;  %v3581_v7 = vadd.f32 %v3580_v27, %v9584_v46 }
 0x4e5   : > { %v2175_v21 = vpop.f32.mrf.mxu1  ;;  %v3582_v8 = vpop.f32.mrf.mxu0 }
 0x4e6   : > { %2969 = vst [vmem:[%s8360_s17 + $0x70] sm:$0xff] %v6225_v25  ;;  %v2467_v63 = vmax.f32 %v2174_v62, 0.0  ;;  %v2176_v5 = vadd.f32 %v2175_v21, %v9578_v24  ;;  %v3583_v1 = vadd.f32 %v3582_v8, %v9581_v16 }
 0x4e7   : > { %v2177_v41 = vpop.f32.mrf.mxu1  ;;  %v3584_v58 = vpop.f32.mrf.mxu0 }
 0x4e8   : > { %v6226_v44 = vpack.c.bf16 %v2467_v63, %v2466_v34  ;;  %v2178_v15 = vadd.f32 %v2177_v41, %v9578_v24  ;;  %v2468_v4 = vmax.f32 %v2176_v5, 0.0  ;;  %v3585_v48 = vadd.f32 %v3584_v58, %v9581_v16 }
 0x4e9   : > { %v2181_v12 = vpop.f32.mrf.mxu1  ;;  %2420 = vmatmul.mubr.bf16.gmra.mxu1 %v6489_v10  ;;  %v3588_v3 = vpop.f32.mrf.mxu0  ;;  %v9585_v10 = vld [vmem:[#allocation13_spill] sm:$0xff]  ;;  %v3579_v24 = vadd.f32 %v8408_v59, %v9584_v46  ;;  %v9586_v59 = vld [vmem:[#allocation67_spill] sm:$0xff] }
 0x4ea   : > { %2970 = vst [vmem:[%s8360_s17 + $0x80] sm:$0xff] %v6226_v44  ;;  %v2469_v47 = vmax.f32 %v2178_v15, 0.0  ;;  %v2182_v55 = vadd.f32 %v2181_v12, %v7895_v19  ;;  %2429 = vmatprep.mubr.bf16.mxu1 %v9431_v49  ;;  %v3589_v0 = vadd.f32 %v3588_v3, %v9582_v17  ;;  %v3575_v34 = vadd.f32 %v8405_v43, %v9585_v10  ;;  %v6491_v43 = vld [vmem:[%s9297_s5 + $0xf8] sm:$0xff]  }
 0x4eb   : > { %v2183_v52 = vpop.f32.mrf.mxu1  ;;  %v3590_v18 = vpop.f32.mrf.mxu0  ;;  %v3608_v35 = vmax.f32 %v3585_v48, 0.0  ;;  %v3573_v44 = vadd.f32 %v8398_v13, %v9585_v10  ;;  %v3606_v15 = vmax.f32 %v3581_v7, 0.0  ;;  %v3607_v12 = vmax.f32 %v3583_v1, 0.0 }
 0x4ec   : > { %v6227_v14 = vpack.c.bf16 %v2469_v47, %v2468_v4  ;;  %v2184_v37 = vadd.f32 %v2183_v52, %v7895_v19  ;;  %v2470_v28 = vmax.f32 %v2182_v55, 0.0  ;;  %v3591_v31 = vadd.f32 %v3590_v18, %v9582_v17 }
 0x4ed   : > { %v2185_v23 = vpop.f32.mrf.mxu1  ;;  %v3592_v45 = vpop.f32.mrf.mxu0  ;;  %v3609_v5 = vmax.f32 %v3589_v0, 0.0 }
 0x4ee   : > { %2971 = vst [vmem:[%s8360_s17 + $0x90] sm:$0xff] %v6227_v14  ;;  %v2471_v30 = vmax.f32 %v2184_v37, 0.0  ;;  %v2186_v57 = vadd.f32 %v2185_v23, %v9579_v32  ;;  %v3593_v9 = vadd.f32 %v3592_v45, %v9580_v20  ;;  %v3610_v27 = vmax.f32 %v3591_v31, 0.0  ;;  %v9587_v14 = vld [vmem:[#allocation44_spill] sm:$0xff] }
 0x4ef   : > { %v2187_v40 = vpop.f32.mrf.mxu1  ;;  %v3594_v19 = vpop.f32.mrf.mxu0  ;;  %v3604_v37 = vmax.f32 %v3575_v34, 0.0  ;;  %v3634_v23 = vpack.c.bf16 %v3608_v35, %v3606_v15  ;;  %v3569_v45 = vadd.f32 %v8390_v2, %v9583_v53 }
 0x4f0   : > { %v6228_v54 = vpack.c.bf16 %v2471_v30, %v2470_v28  ;;  %v2188_v56 = vadd.f32 %v2187_v40, %v9579_v32  ;;  %v3595_v51 = vadd.f32 %v3594_v19, %v9580_v20  ;;  %v2472_v36 = vmax.f32 %v2186_v57, 0.0  ;;  %v9588_v32 = vld [vmem:[#allocation56_spill] sm:$0xff] }
 0x4f1   : > { %v2191_v33 = vpop.f32.mrf.mxu1  ;;  %2430 = vmatmul.mubr.bf16.gmra.mxu1 %v6490_v60  ;;  %v3611_v25 = vmax.f32 %v3593_v9, 0.0  ;;  %v3605_v60 = vmax.f32 %v3579_v24, 0.0  ;;  %v3561_v57 = vadd.f32 %v8377_v42, %v9588_v32  ;;  %v3563_v20 = vadd.f32 %v8380_v22, %v9587_v14  ;;  %v6492_v24 = vld [vmem:[%s9296_s4] sm:$0xff]  }
 0x4f2   : > { %2972 = vst [vmem:[%s8360_s17 + $0xa0] sm:$0xff] %v6228_v54  ;;  %v2473_v62 = vmax.f32 %v2188_v56, 0.0  ;;  %v2192_v21 = vadd.f32 %v2191_v33, %v7902_v26  ;;  %2439 = vmatprep.mubr.bf16.mxu1 %v9431_v49  ;;  %v3612_v63 = vmax.f32 %v3595_v51, 0.0  ;;  %v3603_v9 = vmax.f32 %v3573_v44, 0.0  ;;  %v9589_v33 = vld [vmem:[#allocation20_spill] sm:$0xff] }
 0x4f3   : > { %v2193_v8 = vpop.f32.mrf.mxu1  ;;  %v3635_v47 = vpack.c.bf16 %v3611_v25, %v3609_v5  ;;  %v3633_v48 = vpack.c.bf16 %v3607_v12, %v3605_v60  ;;  %v3559_v22 = vadd.f32 %v8372_v61, %v9588_v32  ;;  %v3601_v0 = vmax.f32 %v3569_v45, 0.0 }
 0x4f4   : > { %v6229_v41 = vpack.c.bf16 %v2473_v62, %v2472_v36  ;;  %v2194_v58 = vadd.f32 %v2193_v8, %v7902_v26  ;;  %v3636_v4 = vpack.c.bf16 %v3612_v63, %v3610_v27  ;;  %v2474_v55 = vmax.f32 %v2192_v21, 0.0 }
 0x4f5   : > { %v2195_v3 = vpop.f32.mrf.mxu1  ;;  %v3565_v26 = vadd.f32 %v8387_v11, %v9587_v14  ;;  %v3602_v11 = vmax.f32 %v3571_v38, 0.0  ;;  %v3598_v53 = vmax.f32 %v3561_v57, 0.0  ;;  %v3599_v38 = vmax.f32 %v3563_v20, 0.0 }
 0x4f6   : > { %2973 = vst [vmem:[%s8360_s17 + $0xb0] sm:$0xff] %v6229_v41  ;;  %v2475_v52 = vmax.f32 %v2194_v58, 0.0  ;;  %v2196_v18 = vadd.f32 %v2195_v3, %v9586_v59  ;;  %3805 = vmatprep.subr.bf16.mxu0 %v3636_v4  ;;  %v3631_v7 = vpack.c.bf16 %v3603_v9, %v3601_v0  ;;  %v3597_v21 = vmax.f32 %v3559_v22, 0.0 }
 0x4f7   : > { %v2197_v13 = vpop.f32.mrf.mxu1  ;;  %3806 = vmatpush1.bf16.msra.mxu0 %v3635_v47  ;;  %v3600_v40 = vmax.f32 %v3565_v26, 0.0  ;;  %v3632_v42 = vpack.c.bf16 %v3604_v37, %v3602_v11 }
 0x4f8   : > { %v6230_v28 = vpack.c.bf16 %v2475_v52, %v2474_v55  ;;  %v2198_v30 = vadd.f32 %v2197_v13, %v9586_v59  ;;  %3807 = vmatprep.subr.bf16.mxu0 %v3634_v23  ;;  %v2476_v17 = vmax.f32 %v2196_v18, 0.0  ;;  %v3629_v34 = vpack.c.bf16 %v3599_v38, %v3597_v21  ;;  %v6493_v18 = vld [vmem:[%s9296_s4 + $0x8] sm:$0xff]   ;;  %v9590_v23 = vld [vmem:[#allocation25_spill] sm:$0xff] }
 0x4f9   : > { %v2201_v16 = vpop.f32.mrf.mxu1  ;;  %2440 = vmatmul.mubr.bf16.gmra.mxu1 %v6491_v43  ;;  %v3630_v62 = vpack.c.bf16 %v3600_v40, %v3598_v53 }
 0x4fa   : > { %2974 = vst [vmem:[%s8360_s17 + $0xc0] sm:$0xff] %v6230_v28  ;;  %v2477_v2 = vmax.f32 %v2198_v30, 0.0  ;;  %v2202_v31 = vadd.f32 %v2201_v16, %v7909_v39  ;;  %4830 = vmatprep.mubr.bf16.mxu1 %v9431_v49  ;;  %v6494_v16 = vld [vmem:[%s9296_s4 + $0x10] sm:$0xff]  }
 0x4fb   : > { %v2203_v19 = vpop.f32.mrf.mxu1  ;;  %3808 = vmatpush1.bf16.msra.mxu0 %v3633_v48 }
 0x4fc   : > { %v6231_v54 = vpack.c.bf16 %v2477_v2, %v2476_v17  ;;  %v2204_v56 = vadd.f32 %v2203_v19, %v7909_v39  ;;  %3809 = vmatprep.subr.bf16.mxu0 %v3632_v42  ;;  %v2478_v1 = vmax.f32 %v2202_v31, 0.0  ;;  %v9592_v19 = vld [vmem:[#allocation68_spill] sm:$0xff] }
 0x4fd   : > { %v2205_v46 = vpop.f32.mrf.mxu1 }
 0x4fe   : > { %2975 = vst [vmem:[%s8360_s17 + $0xd0] sm:$0xff] %v6231_v54  ;;  %v2479_v51 = vmax.f32 %v2204_v56, 0.0  ;;  %v2206_v36 = vadd.f32 %v2205_v46, %v9589_v33  ;;  %v9593_v46 = vld [vmem:[#allocation77_spill] sm:$0xff] }
 0x4ff   : > { %v2207_v25 = vpop.f32.mrf.mxu1  ;;  %3810 = vmatpush1.bf16.msra.mxu0 %v3631_v7 }
 0x500   : > { %v6232_v61 = vpack.c.bf16 %v2479_v51, %v2478_v1  ;;  %v2208_v10 = vadd.f32 %v2207_v25, %v9589_v33  ;;  %3811 = vmatprep.subr.bf16.mxu0 %v3630_v62  ;;  %v2480_v35 = vmax.f32 %v2206_v36, 0.0  ;;  %v6495_v51 = vld [vmem:[%s9296_s4 + $0x18] sm:$0xff]  }
 0x501   : > { %v2211_v39 = vpop.f32.mrf.mxu1 }
 0x502   : > { %2976 = vst [vmem:[%s8360_s17 + $0xe0] sm:$0xff] %v6232_v61  ;;  %v2481_v27 = vmax.f32 %v2208_v10, 0.0  ;;  %v2212_v63 = vadd.f32 %v2211_v39, %v7916_v50  ;;  %v9594_v61 = vld [vmem:[#allocation69_spill] sm:$0xff] }
 0x503   : > { %v2213_v8 = vpop.f32.mrf.mxu1  ;;  %3812 = vmatpush1.bf16.msra.mxu0 %v3629_v34 }
 0x504   : > { %v6233_v5 = vpack.c.bf16 %v2481_v27, %v2480_v35  ;;  %v2214_v41 = vadd.f32 %v2213_v8, %v7916_v50  ;;  %v2482_v44 = vmax.f32 %v2212_v63, 0.0 }
 0x505   : > { %v2215_v58 = vpop.f32.mrf.mxu1 }
 0x506   : > { %2977 = vst [vmem:[%s8360_s17 + $0xf0] sm:$0xff] %v6233_v5  ;;  %v2483_v15 = vmax.f32 %v2214_v41, 0.0  ;;  %v2216_v12 = vadd.f32 %v2215_v58, %v7869_v29  ;;  %6044 = vmatmul.mubr.msk.bf16.vlgmr.msra.gmra.mxu0 %vm825_vm0, %v6492_v24  ;;  %v9595_v24 = vld [vmem:[#allocation79_spill] sm:$0xff]  ;;  %v6496_v58 = vld [vmem:[%s9296_s4 + $0x20] sm:$0xff]  }
 0x507   : > { %v2217_v3 = vpop.f32.mrf.mxu1  ;;  %3839 = vmatprep.mubr.bf16.mxu0 %v9431_v49 }
 0x508   : > { %v6234_v4 = vpack.c.bf16 %v2483_v15, %v2482_v44  ;;  %v2218_v43 = vadd.f32 %v2217_v3, %v7869_v29  ;;  %v2484_v55 = vmax.f32 %v2216_v12, 0.0 }
 0x509   : > { %v2221_v47 = vpop.f32.mrf.mxu1 }
 0x50a   : > { %2978 = vst [vmem:[%s8360_s17 + $0x100] sm:$0xff] %v6234_v4  ;;  %v2485_v50 = vmax.f32 %v2218_v43, 0.0  ;;  %v2222_v52 = vadd.f32 %v2221_v47, %v7923_v6  ;;  %v9596_v43 = vld [vmem:[#allocation70_spill] sm:$0xff] }
 0x50b   : > { %v2223_v59 = vpop.f32.mrf.mxu1 }
 0x50c   : > { %v6235_v14 = vpack.c.bf16 %v2485_v50, %v2484_v55  ;;  %v2224_v26 = vadd.f32 %v2223_v59, %v7923_v6  ;;  %v2486_v29 = vmax.f32 %v2222_v52, 0.0  ;;  %v9591_v6 = vld [vmem:[#allocation75_spill] sm:$0xff] }
 0x50d   : > { %v2225_v37 = vpop.f32.mrf.mxu1 }
 0x50e   : > { %2979 = vst [vmem:[%s8360_s17 + $0x110] sm:$0xff] %v6235_v14  ;;  %v2487_v13 = vmax.f32 %v2224_v26, 0.0  ;;  %v2226_v45 = vadd.f32 %v2225_v37, %v9590_v23  ;;  %6045 = vmatmul.mubr.msk.bf16.gmra.mxu0 %vm825_vm0, %v6493_v18  ;;  %v9597_v26 = vld [vmem:[#allocation81_spill] sm:$0xff] }
 0x50f   : > { %v2227_v60 = vpop.f32.mrf.mxu1  ;;  %3849 = vmatprep.mubr.bf16.mxu0 %v9431_v49 }
 0x510   : > { %v6236_v28 = vpack.c.bf16 %v2487_v13, %v2486_v29  ;;  %v2228_v30 = vadd.f32 %v2227_v60, %v9590_v23  ;;  %v2488_v57 = vmax.f32 %v2226_v45, 0.0  ;;  %v6497_v13 = vld [vmem:[%s9296_s4 + $0x28] sm:$0xff]  }
 0x511   : > { %v2231_v32 = vpop.f32.mrf.mxu1 }
 0x512   : > { %2980 = vst [vmem:[%s8360_s17 + $0x120] sm:$0xff] %v6236_v28  ;;  %v2489_v20 = vmax.f32 %v2228_v30, 0.0  ;;  %v2232_v11 = vadd.f32 %v2231_v32, %v9591_v6  ;;  %v9598_v32 = vld [vmem:[#allocation71_spill] sm:$0xff] }
 0x513   : > { %v2233_v9 = vpop.f32.mrf.mxu1 }
 0x514   : > { %v6237_v48 = vpack.c.bf16 %v2489_v20, %v2488_v57  ;;  %v2234_v17 = vadd.f32 %v2233_v9, %v9591_v6  ;;  %v2490_v31 = vmax.f32 %v2232_v11, 0.0 }
 0x515   : > { %v2235_v2 = vpop.f32.mrf.mxu1 }
 0x516   : > { %2981 = vst [vmem:[%s8360_s17 + $0x130] sm:$0xff] %v6237_v48  ;;  %v2491_v40 = vmax.f32 %v2234_v17, 0.0  ;;  %v2236_v42 = vadd.f32 %v2235_v2, %v9592_v19  ;;  %6046 = vmatmul.mubr.msk.bf16.gmra.mxu0 %vm825_vm0, %v6494_v16  ;;  %v9599_v17 = vld [vmem:[#allocation83_spill] sm:$0xff] }
 0x517   : > { %v2237_v22 = vpop.f32.mrf.mxu1  ;;  %3859 = vmatprep.mubr.bf16.mxu0 %v9431_v49 }
 0x518   : > { %v6238_v0 = vpack.c.bf16 %v2491_v40, %v2490_v31  ;;  %v2238_v54 = vadd.f32 %v2237_v22, %v9592_v19  ;;  %v2492_v53 = vmax.f32 %v2236_v42, 0.0  ;;  %v6498_v40 = vld [vmem:[%s9296_s4 + $0x30] sm:$0xff]  }
 0x519   : > { %v2241_v56 = vpop.f32.mrf.mxu1 }
 0x51a   : > { %2982 = vst [vmem:[%s8360_s17 + $0x140] sm:$0xff] %v6238_v0  ;;  %v2493_v38 = vmax.f32 %v2238_v54, 0.0  ;;  %v2242_v7 = vadd.f32 %v2241_v56, %v9593_v46  ;;  %v9600_v56 = vld [vmem:[#allocation72_spill] sm:$0xff] }
 0x51b   : > { %v2243_v1 = vpop.f32.mrf.mxu1 }
 0x51c   : > { %v6239_v33 = vpack.c.bf16 %v2493_v38, %v2492_v53  ;;  %v2244_v36 = vadd.f32 %v2243_v1, %v9593_v46  ;;  %v2494_v62 = vmax.f32 %v2242_v7, 0.0  ;;  %v1738_v1 = vpop.permute.xlu1 %1737 }
 0x51d   : > { %v2245_v25 = vpop.f32.mrf.mxu1 }
 0x51e   : > { %2983 = vst [vmem:[%s8360_s17 + $0x150] sm:$0xff] %v6239_v33  ;;  %v2495_v21 = vmax.f32 %v2244_v36, 0.0  ;;  %v2246_v10 = vadd.f32 %v2245_v25, %v9594_v61  ;;  %6047 = vmatmul.mubr.msk.bf16.gmra.mxu0 %vm825_vm0, %v6495_v51 }
 0x51f   : > { %v2247_v39 = vpop.f32.mrf.mxu1  ;;  %3869 = vmatprep.mubr.bf16.mxu0 %v9431_v49 }
 0x520   : > { %v6240_v34 = vpack.c.bf16 %v2495_v21, %v2494_v62  ;;  %v2248_v35 = vadd.f32 %v2247_v39, %v9594_v61  ;;  %v2496_v63 = vmax.f32 %v2246_v10, 0.0  ;;  %v6499_v21 = vld [vmem:[%s9296_s4 + $0x38] sm:$0xff]   ;;  %v1743_v39 = vpop.permute.xlu0 %1742 }
 0x521   : > { %v2251_v27 = vpop.f32.mrf.mxu1 }
 0x522   : > { %2984 = vst [vmem:[%s8360_s17 + $0x160] sm:$0xff] %v6240_v34  ;;  %v2497_v8 = vmax.f32 %v2248_v35, 0.0  ;;  %v2252_v5 = vadd.f32 %v2251_v27, %v9595_v24 }
 0x523   : > { %v2253_v41 = vpop.f32.mrf.mxu1 }
 0x524   : > { %v6241_v44 = vpack.c.bf16 %v2497_v8, %v2496_v63  ;;  %v2254_v15 = vadd.f32 %v2253_v41, %v9595_v24  ;;  %v2498_v3 = vmax.f32 %v2252_v5, 0.0  ;;  %v1748_v41 = vpop.permute.xlu1 %1747 }
 0x525   : > { %v2255_v12 = vpop.f32.mrf.mxu1 }
 0x526   : > { %2985 = vst [vmem:[%s8360_s17 + $0x170] sm:$0xff] %v6241_v44  ;;  %v2499_v4 = vmax.f32 %v2254_v15, 0.0  ;;  %v2256_v47 = vadd.f32 %v2255_v12, %v9596_v43  ;;  %6048 = vmatmul.mubr.msk.bf16.gmra.mxu0 %vm825_vm0, %v6496_v58 }
 0x527   : > { %v2257_v55 = vpop.f32.mrf.mxu1  ;;  %3879 = vmatprep.mubr.bf16.mxu0 %v9431_v49 }
 0x528   : > { %v6242_v50 = vpack.c.bf16 %v2499_v4, %v2498_v3  ;;  %v2258_v52 = vadd.f32 %v2257_v55, %v9596_v43  ;;  %v2500_v18 = vmax.f32 %v2256_v47, 0.0  ;;  %v1753_v47 = vpop.permute.xlu0 %1752 }
 0x529   : > { %v2261_v59 = vpop.f32.mrf.mxu1 }
 0x52a   : > { %2986 = vst [vmem:[%s8360_s17 + $0x180] sm:$0xff] %v6242_v50  ;;  %v2501_v14 = vmax.f32 %v2258_v52, 0.0  ;;  %v2262_v37 = vadd.f32 %v2261_v59, %v9597_v26 }
 0x52b   : > { %v2263_v29 = vpop.f32.mrf.mxu1 }
 0x52c   : > { %v6243_v23 = vpack.c.bf16 %v2501_v14, %v2500_v18  ;;  %v2264_v45 = vadd.f32 %v2263_v29, %v9597_v26  ;;  %v2502_v28 = vmax.f32 %v2262_v37, 0.0  ;;  %v1758_v37 = vpop.permute.xlu1 %1757 }
 0x52d   : > { %v2265_v60 = vpop.f32.mrf.mxu1 }
 0x52e   : > { %2987 = vst [vmem:[%s8360_s17 + $0x190] sm:$0xff] %v6243_v23  ;;  %v2503_v30 = vmax.f32 %v2264_v45, 0.0  ;;  %v2266_v57 = vadd.f32 %v2265_v60, %v9598_v32  ;;  %6049 = vmatmul.mubr.msk.bf16.gmra.mxu0 %vm825_vm0, %v6497_v13 }
 0x52f   : > { %v2267_v20 = vpop.f32.mrf.mxu1  ;;  %3889 = vmatprep.mubr.bf16.mxu0 %v9431_v49 }
 0x530   : > { %v6244_v6 = vpack.c.bf16 %v2503_v30, %v2502_v28  ;;  %v2268_v11 = vadd.f32 %v2267_v20, %v9598_v32  ;;  %v2504_v16 = vmax.f32 %v2266_v57, 0.0  ;;  %v1763_v32 = vpop.permute.xlu0 %1762 }
 0x531   : > { %v2271_v9 = vpop.f32.mrf.mxu1 }
 0x532   : > { %2988 = vst [vmem:[%s8360_s17 + $0x1a0] sm:$0xff] %v6244_v6  ;;  %v2505_v48 = vmax.f32 %v2268_v11, 0.0  ;;  %v2272_v2 = vadd.f32 %v2271_v9, %v9599_v17 }
 0x533   : > { %v2273_v31 = vpop.f32.mrf.mxu1 }
 0x534   : > { %v6245_v19 = vpack.c.bf16 %v2505_v48, %v2504_v16  ;;  %v2274_v42 = vadd.f32 %v2273_v31, %v9599_v17  ;;  %v2506_v0 = vmax.f32 %v2272_v2, 0.0  ;;  %v1768_v17 = vpop.permute.xlu1 %1767 }
 0x535   : > { %v2275_v22 = vpop.f32.mrf.mxu1 }
 0x536   : > { %2989 = vst [vmem:[%s8360_s17 + $0x1b0] sm:$0xff] %v6245_v19  ;;  %v2507_v54 = vmax.f32 %v2274_v42, 0.0  ;;  %v2276_v53 = vadd.f32 %v2275_v22, %v9600_v56  ;;  %6050 = vmatmul.mubr.msk.bf16.gmra.mxu0 %vm825_vm0, %v6498_v40 }
 0x537   : > { %v2277_v38 = vpop.f32.mrf.mxu1  ;;  %3899 = vmatprep.mubr.bf16.mxu0 %v9431_v49 }
 0x538   : > { %v6246_v46 = vpack.c.bf16 %v2507_v54, %v2506_v0  ;;  %v2278_v7 = vadd.f32 %v2277_v38, %v9600_v56  ;;  %v2508_v33 = vmax.f32 %v2276_v53, 0.0  ;;  %v1773_v54 = vpop.permute.xlu0 %1772 }
 0x539   : > { %v2281_v51 = vpop.f32.mrf.mxu1 }
 0x53a   : > { %2990 = vst [vmem:[%s8360_s17 + $0x1c0] sm:$0xff] %v6246_v46  ;;  %v2509_v36 = vmax.f32 %v2278_v7, 0.0  ;;  %v2282_v25 = vadd.f32 %v2281_v51, %v1738_v1 }
 0x53b   : > { %v2283_v62 = vpop.f32.mrf.mxu1 }
 0x53c   : > { %v6247_v61 = vpack.c.bf16 %v2509_v36, %v2508_v33  ;;  %v2284_v10 = vadd.f32 %v2283_v62, %v1738_v1  ;;  %v2510_v35 = vmax.f32 %v2282_v25, 0.0  ;;  %v1778_v33 = vpop.permute.xlu1 %1777 }
 0x53d   : > { %v2285_v34 = vpop.f32.mrf.mxu1 }
 0x53e   : > { %2991 = vst [vmem:[%s8360_s17 + $0x1d0] sm:$0xff] %v6247_v61  ;;  %v2511_v27 = vmax.f32 %v2284_v10, 0.0  ;;  %v2286_v63 = vadd.f32 %v2285_v34, %v1743_v39  ;;  %6051 = vmatmul.mubr.msk.bf16.gmra.mxu0 %vm825_vm0, %v6499_v21  ;;  %v1783_v34 = vpop.permute.xlu0 %1782 }
 0x53f   : > { %v2287_v8 = vpop.f32.mrf.mxu1  ;;  %4630 = vmatprep.mubr.bf16.mxu0 %v9431_v49 }
 0x540   : > { %v6248_v24 = vpack.c.bf16 %v2511_v27, %v2510_v35  ;;  %v2288_v5 = vadd.f32 %v2287_v8, %v1743_v39  ;;  %v2512_v44 = vmax.f32 %v2286_v63, 0.0 }
 0x541   : > { %v2291_v58 = vpop.f32.mrf.mxu1 }
 0x542   : > { %2992 = vst [vmem:[%s8360_s17 + $0x1e0] sm:$0xff] %v6248_v24  ;;  %v2513_v15 = vmax.f32 %v2288_v5, 0.0  ;;  %v2292_v12 = vadd.f32 %v2291_v58, %v1748_v41  ;;  %v1788_v58 = vpop.permute.xlu1 %1787 }
 0x543   : > { %v2293_v3 = vpop.f32.mrf.mxu1 }
 0x544   : > { %v6249_v4 = vpack.c.bf16 %v2513_v15, %v2512_v44  ;;  %v2294_v43 = vadd.f32 %v2293_v3, %v1748_v41  ;;  %v2514_v50 = vmax.f32 %v2292_v12, 0.0 }
 0x545   : > { %v2295_v55 = vpop.f32.mrf.mxu1 }
 0x546   : > { %2993 = vst [vmem:[%s8360_s17 + $0x1f0] sm:$0xff] %v6249_v4  ;;  %v2515_v52 = vmax.f32 %v2294_v43, 0.0  ;;  %v2296_v59 = vadd.f32 %v2295_v55, %v1753_v47  ;;  %v1793_v55 = vpop.permute.xlu0 %1792 }
 0x547   : > { %v2297_v18 = vpop.f32.mrf.mxu1 }
 0x548   : > { %v6250_v14 = vpack.c.bf16 %v2515_v52, %v2514_v50  ;;  %v2298_v26 = vadd.f32 %v2297_v18, %v1753_v47  ;;  %v2516_v13 = vmax.f32 %v2296_v59, 0.0 }
 0x549   : > { %v2301_v29 = vpop.f32.mrf.mxu1 }
 0x54a   : > { %2994 = vst [vmem:[%s8360_s17 + $0x200] sm:$0xff] %v6250_v14  ;;  %v2517_v23 = vmax.f32 %v2298_v26, 0.0  ;;  %v2302_v45 = vadd.f32 %v2301_v29, %v1758_v37  ;;  %v1798_v29 = vpop.permute.xlu1 %1797 }
 0x54b   : > { %v2303_v60 = vpop.f32.mrf.mxu1 }
 0x54c   : > { %v6251_v28 = vpack.c.bf16 %v2517_v23, %v2516_v13  ;;  %v2304_v30 = vadd.f32 %v2303_v60, %v1758_v37  ;;  %v2518_v20 = vmax.f32 %v2302_v45, 0.0 }
 0x54d   : > { %v2305_v57 = vpop.f32.mrf.mxu1 }
 0x54e   : > { %2995 = vst [vmem:[%s8360_s17 + $0x210] sm:$0xff] %v6251_v28  ;;  %v2519_v6 = vmax.f32 %v2304_v30, 0.0  ;;  %v2306_v11 = vadd.f32 %v2305_v57, %v1763_v32  ;;  %v1803_v57 = vpop.permute.xlu0 %1802 }
 0x54f   : > { %v2307_v9 = vpop.f32.mrf.mxu1 }
 0x550   : > { %v6252_v16 = vpack.c.bf16 %v2519_v6, %v2518_v20  ;;  %v2308_v48 = vadd.f32 %v2307_v9, %v1763_v32  ;;  %v2520_v31 = vmax.f32 %v2306_v11, 0.0 }
 0x551   : > { %v2311_v2 = vpop.f32.mrf.mxu1 }
 0x552   : > { %2996 = vst [vmem:[%s8360_s17 + $0x220] sm:$0xff] %v6252_v16  ;;  %v2521_v40 = vmax.f32 %v2308_v48, 0.0  ;;  %v2312_v19 = vadd.f32 %v2311_v2, %v1768_v17  ;;  %v1808_v2 = vpop.permute.xlu1 %1807 }
 0x553   : > { %v2313_v42 = vpop.f32.mrf.mxu1 }
 0x554   : > { %v6253_v22 = vpack.c.bf16 %v2521_v40, %v2520_v31  ;;  %v2314_v0 = vadd.f32 %v2313_v42, %v1768_v17  ;;  %v2522_v53 = vmax.f32 %v2312_v19, 0.0 }
 0x555   : > { %v2315_v56 = vpop.f32.mrf.mxu1 }
 0x556   : > { %2997 = vst [vmem:[%s8360_s17 + $0x230] sm:$0xff] %v6253_v22  ;;  %v2523_v38 = vmax.f32 %v2314_v0, 0.0  ;;  %v2316_v46 = vadd.f32 %v2315_v56, %v1773_v54  ;;  %v1813_v56 = vpop.permute.xlu0 %1812 }
 0x557   : > { %v2317_v7 = vpop.f32.mrf.mxu1 }
 0x558   : > { %v6254_v1 = vpack.c.bf16 %v2523_v38, %v2522_v53  ;;  %v2318_v51 = vadd.f32 %v2317_v7, %v1773_v54  ;;  %v2524_v25 = vmax.f32 %v2316_v46, 0.0 }
 0x559   : > { %v2321_v36 = vpop.f32.mrf.mxu1 }
 0x55a   : > { %2998 = vst [vmem:[%s8360_s17 + $0x240] sm:$0xff] %v6254_v1  ;;  %v2525_v62 = vmax.f32 %v2318_v51, 0.0  ;;  %v2322_v21 = vadd.f32 %v2321_v36, %v1778_v33  ;;  %v1818_v36 = vpop.permute.xlu1 %1817 }
 0x55b   : > { %v2323_v61 = vpop.f32.mrf.mxu1 }
 0x55c   : > { %v6255_v10 = vpack.c.bf16 %v2525_v62, %v2524_v25  ;;  %v2324_v39 = vadd.f32 %v2323_v61, %v1778_v33  ;;  %v2526_v27 = vmax.f32 %v2322_v21, 0.0 }
 0x55d   : > { %v2325_v35 = vpop.f32.mrf.mxu1 }
 0x55e   : > { %2999 = vst [vmem:[%s8360_s17 + $0x250] sm:$0xff] %v6255_v10  ;;  %v2527_v63 = vmax.f32 %v2324_v39, 0.0  ;;  %v2326_v8 = vadd.f32 %v2325_v35, %v1783_v34  ;;  %v1823_v35 = vpop.permute.xlu0 %1822 }
 0x55f   : > { %v2327_v24 = vpop.f32.mrf.mxu1 }
 0x560   : > { %v6256_v5 = vpack.c.bf16 %v2527_v63, %v2526_v27  ;;  %v2328_v41 = vadd.f32 %v2327_v24, %v1783_v34  ;;  %v2528_v15 = vmax.f32 %v2326_v8, 0.0 }
 0x561   : > { %v2331_v44 = vpop.f32.mrf.mxu1 }
 0x562   : > { %3000 = vst [vmem:[%s8360_s17 + $0x260] sm:$0xff] %v6256_v5  ;;  %v2529_v12 = vmax.f32 %v2328_v41, 0.0  ;;  %v2332_v3 = vadd.f32 %v2331_v44, %v1788_v58  ;;  %v1828_v44 = vpop.permute.xlu1 %1827 }
 0x563   : > { %v2333_v4 = vpop.f32.mrf.mxu1 }
 0x564   : > { %v6257_v43 = vpack.c.bf16 %v2529_v12, %v2528_v15  ;;  %v2334_v47 = vadd.f32 %v2333_v4, %v1788_v58  ;;  %v2530_v52 = vmax.f32 %v2332_v3, 0.0 }
 0x565   : > { %v2335_v50 = vpop.f32.mrf.mxu1 }
 0x566   : > { %3001 = vst [vmem:[%s8360_s17 + $0x270] sm:$0xff] %v6257_v43  ;;  %v2531_v59 = vmax.f32 %v2334_v47, 0.0  ;;  %v2336_v18 = vadd.f32 %v2335_v50, %v1793_v55  ;;  %v1833_v50 = vpop.permute.xlu0 %1832 }
 0x567   : > { %v2337_v14 = vpop.f32.mrf.mxu1 }
 0x568   : > { %v6258_v26 = vpack.c.bf16 %v2531_v59, %v2530_v52  ;;  %v2338_v37 = vadd.f32 %v2337_v14, %v1793_v55  ;;  %v2532_v23 = vmax.f32 %v2336_v18, 0.0 }
 0x569   : > { %v2341_v13 = vpop.f32.mrf.mxu1 }
 0x56a   : > { %3002 = vst [vmem:[%s8360_s17 + $0x280] sm:$0xff] %v6258_v26  ;;  %v2533_v45 = vmax.f32 %v2338_v37, 0.0  ;;  %v2342_v60 = vadd.f32 %v2341_v13, %v1798_v29  ;;  %v1838_v13 = vpop.permute.xlu1 %1837 }
 0x56b   : > { %v2343_v28 = vpop.f32.mrf.mxu1 }
 0x56c   : > { %v6259_v30 = vpack.c.bf16 %v2533_v45, %v2532_v23  ;;  %v2344_v32 = vadd.f32 %v2343_v28, %v1798_v29  ;;  %v2534_v6 = vmax.f32 %v2342_v60, 0.0 }
 0x56d   : > { %v2345_v20 = vpop.f32.mrf.mxu1 }
 0x56e   : > { %3003 = vst [vmem:[%s8360_s17 + $0x290] sm:$0xff] %v6259_v30  ;;  %v2535_v11 = vmax.f32 %v2344_v32, 0.0  ;;  %v2346_v9 = vadd.f32 %v2345_v20, %v1803_v57  ;;  %v1843_v20 = vpop.permute.xlu0 %1842 }
 0x56f   : > { %v2347_v16 = vpop.f32.mrf.mxu1 }
 0x570   : > { %v6260_v48 = vpack.c.bf16 %v2535_v11, %v2534_v6  ;;  %v2348_v17 = vadd.f32 %v2347_v16, %v1803_v57  ;;  %v2536_v40 = vmax.f32 %v2346_v9, 0.0 }
 0x571   : > { %v2351_v31 = vpop.f32.mrf.mxu1 }
 0x572   : > { %3004 = vst [vmem:[%s8360_s17 + $0x2a0] sm:$0xff] %v6260_v48  ;;  %v2537_v19 = vmax.f32 %v2348_v17, 0.0  ;;  %v2352_v42 = vadd.f32 %v2351_v31, %v1808_v2  ;;  %v1848_v31 = vpop.permute.xlu1 %1847 }
 0x573   : > { %v2353_v22 = vpop.f32.mrf.mxu1 }
 0x574   : > { %v6261_v0 = vpack.c.bf16 %v2537_v19, %v2536_v40  ;;  %v2354_v54 = vadd.f32 %v2353_v22, %v1808_v2  ;;  %v2538_v38 = vmax.f32 %v2352_v42, 0.0 }
 0x575   : > { %v2355_v53 = vpop.f32.mrf.mxu1 }
 0x576   : > { %3005 = vst [vmem:[%s8360_s17 + $0x2b0] sm:$0xff] %v6261_v0  ;;  %v2539_v46 = vmax.f32 %v2354_v54, 0.0  ;;  %v2356_v7 = vadd.f32 %v2355_v53, %v1813_v56  ;;  %v1853_v53 = vpop.permute.xlu0 %1852 }
 0x577   : > { %v2357_v1 = vpop.f32.mrf.mxu1 }
 0x578   : > { %v6262_v51 = vpack.c.bf16 %v2539_v46, %v2538_v38  ;;  %v2358_v33 = vadd.f32 %v2357_v1, %v1813_v56  ;;  %v2540_v62 = vmax.f32 %v2356_v7, 0.0 }
 0x579   : > { %v2361_v25 = vpop.f32.mrf.mxu1 }
 0x57a   : > { %3006 = vst [vmem:[%s8360_s17 + $0x2c0] sm:$0xff] %v6262_v51  ;;  %v2541_v21 = vmax.f32 %v2358_v33, 0.0  ;;  %v2362_v61 = vadd.f32 %v2361_v25, %v1818_v36  ;;  %v1858_v25 = vpop.permute.xlu1 %1857 }
 0x57b   : > { %v2363_v10 = vpop.f32.mrf.mxu1 }
 0x57c   : > { %v6263_v39 = vpack.c.bf16 %v2541_v21, %v2540_v62  ;;  %v2364_v34 = vadd.f32 %v2363_v10, %v1818_v36  ;;  %v2542_v63 = vmax.f32 %v2362_v61, 0.0 }
 0x57d   : > { %v2365_v27 = vpop.f32.mrf.mxu1 }
 0x57e   : > { %3007 = vst [vmem:[%s8360_s17 + $0x2d0] sm:$0xff] %v6263_v39  ;;  %v2543_v8 = vmax.f32 %v2364_v34, 0.0  ;;  %v2366_v24 = vadd.f32 %v2365_v27, %v1823_v35  ;;  %v1863_v27 = vpop.permute.xlu0 %1862 }
 0x57f   : > { %v2367_v5 = vpop.f32.mrf.mxu1 }
 0x580   : > { %v6264_v41 = vpack.c.bf16 %v2543_v8, %v2542_v63  ;;  %v2368_v58 = vadd.f32 %v2367_v5, %v1823_v35  ;;  %v2544_v12 = vmax.f32 %v2366_v24, 0.0 }
 0x581   : > { %v2371_v15 = vpop.f32.mrf.mxu1 }
 0x582   : > { %3008 = vst [vmem:[%s8360_s17 + $0x2e0] sm:$0xff] %v6264_v41  ;;  %v2545_v3 = vmax.f32 %v2368_v58, 0.0  ;;  %v2372_v4 = vadd.f32 %v2371_v15, %v1828_v44  ;;  %v1868_v15 = vpop.permute.xlu1 %1867 }
 0x583   : > { %v2373_v43 = vpop.f32.mrf.mxu1 }
 0x584   : > { %v6265_v47 = vpack.c.bf16 %v2545_v3, %v2544_v12  ;;  %v2374_v55 = vadd.f32 %v2373_v43, %v1828_v44  ;;  %v2546_v59 = vmax.f32 %v2372_v4, 0.0 }
 0x585   : > { %v2375_v52 = vpop.f32.mrf.mxu1 }
 0x586   : > { %3009 = vst [vmem:[%s8360_s17 + $0x2f0] sm:$0xff] %v6265_v47  ;;  %v2547_v18 = vmax.f32 %v2374_v55, 0.0  ;;  %v2376_v14 = vadd.f32 %v2375_v52, %v1833_v50  ;;  %v1873_v52 = vpop.permute.xlu0 %1872 }
 0x587   : > { %v2377_v26 = vpop.f32.mrf.mxu1 }
 0x588   : > { %v6266_v37 = vpack.c.bf16 %v2547_v18, %v2546_v59  ;;  %v2378_v29 = vadd.f32 %v2377_v26, %v1833_v50  ;;  %v2548_v45 = vmax.f32 %v2376_v14, 0.0 }
 0x589   : > { %v2381_v23 = vpop.f32.mrf.mxu1 }
 0x58a   : > { %3010 = vst [vmem:[%s8360_s17 + $0x300] sm:$0xff] %v6266_v37  ;;  %v2549_v60 = vmax.f32 %v2378_v29, 0.0  ;;  %v2382_v28 = vadd.f32 %v2381_v23, %v1838_v13  ;;  %v1878_v23 = vpop.permute.xlu1 %1877 }
 0x58b   : > { %v2383_v30 = vpop.f32.mrf.mxu1 }
 0x58c   : > { %v6267_v32 = vpack.c.bf16 %v2549_v60, %v2548_v45  ;;  %v2384_v57 = vadd.f32 %v2383_v30, %v1838_v13  ;;  %v2550_v11 = vmax.f32 %v2382_v28, 0.0 }
 0x58d   : > { %v2385_v6 = vpop.f32.mrf.mxu1 }
 0x58e   : > { %3011 = vst [vmem:[%s8360_s17 + $0x310] sm:$0xff] %v6267_v32  ;;  %v2551_v9 = vmax.f32 %v2384_v57, 0.0  ;;  %v2386_v16 = vadd.f32 %v2385_v6, %v1843_v20  ;;  %v1883_v6 = vpop.permute.xlu0 %1882 }
 0x58f   : > { %v2387_v48 = vpop.f32.mrf.mxu1 }
 0x590   : > { %v6268_v17 = vpack.c.bf16 %v2551_v9, %v2550_v11  ;;  %v2388_v2 = vadd.f32 %v2387_v48, %v1843_v20  ;;  %v2552_v19 = vmax.f32 %v2386_v16, 0.0 }
 0x591   : > { %v2391_v40 = vpop.f32.mrf.mxu1 }
 0x592   : > { %3012 = vst [vmem:[%s8360_s17 + $0x320] sm:$0xff] %v6268_v17  ;;  %v2553_v42 = vmax.f32 %v2388_v2, 0.0  ;;  %v2392_v22 = vadd.f32 %v2391_v40, %v1848_v31  ;;  %v1888_v40 = vpop.permute.xlu1 %1887 }
 0x593   : > { %v2393_v0 = vpop.f32.mrf.mxu1 }
 0x594   : > { %v6269_v54 = vpack.c.bf16 %v2553_v42, %v2552_v19  ;;  %v2394_v56 = vadd.f32 %v2393_v0, %v1848_v31  ;;  %v2554_v46 = vmax.f32 %v2392_v22, 0.0 }
 0x595   : > { %v2395_v38 = vpop.f32.mrf.mxu1 }
 0x596   : > { %3013 = vst [vmem:[%s8360_s17 + $0x330] sm:$0xff] %v6269_v54  ;;  %v2555_v7 = vmax.f32 %v2394_v56, 0.0  ;;  %v2396_v1 = vadd.f32 %v2395_v38, %v1853_v53  ;;  %v1893_v38 = vpop.permute.xlu0 %1892 }
 0x597   : > { %v2397_v51 = vpop.f32.mrf.mxu1 }
 0x598   : > { %v6270_v33 = vpack.c.bf16 %v2555_v7, %v2554_v46  ;;  %v2398_v36 = vadd.f32 %v2397_v51, %v1853_v53  ;;  %v2556_v21 = vmax.f32 %v2396_v1, 0.0 }
 0x599   : > { %v2401_v62 = vpop.f32.mrf.mxu1 }
 0x59a   : > { %3014 = vst [vmem:[%s8360_s17 + $0x340] sm:$0xff] %v6270_v33  ;;  %v2557_v61 = vmax.f32 %v2398_v36, 0.0  ;;  %v2402_v10 = vadd.f32 %v2401_v62, %v1858_v25  ;;  %v1898_v62 = vpop.permute.xlu1 %1897 }
 0x59b   : > { %v2403_v39 = vpop.f32.mrf.mxu1 }
 0x59c   : > { %v6271_v34 = vpack.c.bf16 %v2557_v61, %v2556_v21  ;;  %v2404_v35 = vadd.f32 %v2403_v39, %v1858_v25  ;;  %v2558_v8 = vmax.f32 %v2402_v10, 0.0 }
 0x59d   : > { %v2405_v63 = vpop.f32.mrf.mxu1 }
 0x59e   : > { %3015 = vst [vmem:[%s8360_s17 + $0x350] sm:$0xff] %v6271_v34  ;;  %v2559_v24 = vmax.f32 %v2404_v35, 0.0  ;;  %v2406_v5 = vadd.f32 %v2405_v63, %v1863_v27  ;;  %v1903_v63 = vpop.permute.xlu0 %1902 }
 0x59f   : > { %v2407_v41 = vpop.f32.mrf.mxu1 }
 0x5a0   : > { %v6272_v58 = vpack.c.bf16 %v2559_v24, %v2558_v8  ;;  %v2408_v44 = vadd.f32 %v2407_v41, %v1863_v27  ;;  %v2560_v3 = vmax.f32 %v2406_v5, 0.0 }
 0x5a1   : > { %v2411_v12 = vpop.f32.mrf.mxu1 }
 0x5a2   : > { %3016 = vst [vmem:[%s8360_s17 + $0x360] sm:$0xff] %v6272_v58  ;;  %v2561_v4 = vmax.f32 %v2408_v44, 0.0  ;;  %v2412_v43 = vadd.f32 %v2411_v12, %v1868_v15 }
 0x5a3   : > { %v2413_v47 = vpop.f32.mrf.mxu1 }
 0x5a4   : > { %v6273_v55 = vpack.c.bf16 %v2561_v4, %v2560_v3  ;;  %v2414_v50 = vadd.f32 %v2413_v47, %v1868_v15  ;;  %v2562_v18 = vmax.f32 %v2412_v43, 0.0 }
 0x5a5   : > { %v2415_v59 = vpop.f32.mrf.mxu1 }
 0x5a6   : > { %3017 = vst [vmem:[%s8360_s17 + $0x370] sm:$0xff] %v6273_v55  ;;  %v2563_v14 = vmax.f32 %v2414_v50, 0.0  ;;  %v2416_v26 = vadd.f32 %v2415_v59, %v1873_v52  ;;  %v9601_v55 = vld [vmem:[#allocation88_spill] sm:$0xff] }
 0x5a7   : > { %v2417_v37 = vpop.f32.mrf.mxu1 }
 0x5a8   : > { %v6274_v29 = vpack.c.bf16 %v2563_v14, %v2562_v18  ;;  %v2418_v13 = vadd.f32 %v2417_v37, %v1873_v52  ;;  %v2564_v60 = vmax.f32 %v2416_v26, 0.0  ;;  %v9602_v18 = vld [vmem:[#allocation12_spill] sm:$0xff] }
 0x5a9   : > { %v2421_v45 = vpop.f32.mrf.mxu1 }
 0x5aa   : > { %3018 = vst [vmem:[%s8360_s17 + $0x380] sm:$0xff] %v6274_v29  ;;  %v2565_v28 = vmax.f32 %v2418_v13, 0.0  ;;  %v2422_v30 = vadd.f32 %v2421_v45, %v1878_v23 }
 0x5ab   : > { %v2423_v32 = vpop.f32.mrf.mxu1 }
 0x5ac   : > { %v6275_v57 = vpack.c.bf16 %v2565_v28, %v2564_v60  ;;  %v2424_v20 = vadd.f32 %v2423_v32, %v1878_v23  ;;  %v2566_v9 = vmax.f32 %v2422_v30, 0.0 }
 0x5ad   : > { %v2425_v11 = vpop.f32.mrf.mxu1 }
 0x5ae   : > { %3019 = vst [vmem:[%s8360_s17 + $0x390] sm:$0xff] %v6275_v57  ;;  %v2567_v16 = vmax.f32 %v2424_v20, 0.0  ;;  %v2426_v48 = vadd.f32 %v2425_v11, %v1883_v6  ;;  %v9603_v57 = vld [vmem:[#allocation18_spill] sm:$0xff] }
 0x5af   : > { %v2427_v17 = vpop.f32.mrf.mxu1 }
 0x5b0   : > { %v6276_v2 = vpack.c.bf16 %v2567_v16, %v2566_v9  ;;  %v2428_v31 = vadd.f32 %v2427_v17, %v1883_v6  ;;  %v2568_v42 = vmax.f32 %v2426_v48, 0.0  ;;  %v9604_v9 = vld [vmem:[#allocation84_spill] sm:$0xff] }
 0x5b1   : > { %v2431_v19 = vpop.f32.mrf.mxu1 }
 0x5b2   : > { %3020 = vst [vmem:[%s8360_s17 + $0x3a0] sm:$0xff] %v6276_v2  ;;  %v2569_v22 = vmax.f32 %v2428_v31, 0.0  ;;  %v2432_v0 = vadd.f32 %v2431_v19, %v1888_v40 }
 0x5b3   : > { %v2433_v54 = vpop.f32.mrf.mxu1 }
 0x5b4   : > { %v6277_v56 = vpack.c.bf16 %v2569_v22, %v2568_v42  ;;  %v2434_v53 = vadd.f32 %v2433_v54, %v1888_v40  ;;  %v2570_v7 = vmax.f32 %v2432_v0, 0.0 }
 0x5b5   : > { %v2435_v46 = vpop.f32.mrf.mxu1 }
 0x5b6   : > { %3021 = vst [vmem:[%s8360_s17 + $0x3b0] sm:$0xff] %v6277_v56  ;;  %v2571_v1 = vmax.f32 %v2434_v53, 0.0  ;;  %v2436_v51 = vadd.f32 %v2435_v46, %v1893_v38 }
 0x5b7   : > { %v2437_v33 = vpop.f32.mrf.mxu1 }
 0x5b8   : > { %v6278_v36 = vpack.c.bf16 %v2571_v1, %v2570_v7  ;;  %v2438_v25 = vadd.f32 %v2437_v33, %v1893_v38  ;;  %v2572_v61 = vmax.f32 %v2436_v51, 0.0 }
 0x5b9   : > { %v2441_v21 = vpop.f32.mrf.mxu1 }
 0x5ba   : > { %3022 = vst [vmem:[%s8360_s17 + $0x3c0] sm:$0xff] %v6278_v36  ;;  %v2573_v10 = vmax.f32 %v2438_v25, 0.0  ;;  %v2442_v39 = vadd.f32 %v2441_v21, %v1898_v62 }
 0x5bb   : > { %v2443_v34 = vpop.f32.mrf.mxu1 }
 0x5bc   : > { %v6279_v35 = vpack.c.bf16 %v2573_v10, %v2572_v61  ;;  %v2444_v27 = vadd.f32 %v2443_v34, %v1898_v62  ;;  %v2574_v24 = vmax.f32 %v2442_v39, 0.0 }
 0x5bd   : > { %v2445_v8 = vpop.f32.mrf.mxu1 }
 0x5be   : > { %3023 = vst [vmem:[%s8360_s17 + $0x3d0] sm:$0xff] %v6279_v35  ;;  %v2575_v5 = vmax.f32 %v2444_v27, 0.0  ;;  %v2446_v41 = vadd.f32 %v2445_v8, %v1903_v63 }
 0x5bf   : > { %v2447_v58 = vpop.f32.mrf.mxu1 }
 0x5c0   : > { %v6280_v44 = vpack.c.bf16 %v2575_v5, %v2574_v24  ;;  %v2448_v15 = vadd.f32 %v2447_v58, %v1903_v63  ;;  %v2576_v12 = vmax.f32 %v2446_v41, 0.0  ;;  %v9605_v5 = vld [vmem:[#allocation74_spill] sm:$0xff]  ;;  %v9606_v58 = vld [vmem:[#allocation15_spill] sm:$0xff] }
 0x5c2   : > { %3024 = vst [vmem:[%s8360_s17 + $0x3e0] sm:$0xff] %v6280_v44  ;;  %v2577_v3 = vmax.f32 %v2448_v15, 0.0  ;;  %v9607_v15 = vld [vmem:[#allocation73_spill] sm:$0xff] }
 0x5c4   : > { %v6281_v4 = vpack.c.bf16 %v2577_v3, %v2576_v12 }
 0x5c6   : > { %3025 = vst [vmem:[%s8360_s17 + $0x3f0] sm:$0xff] %v6281_v4  ;;  %v3831_v43 = vpop.f32.mrf.mxu0 }
 0x5c7   : > { %v3832_v50 = vadd.f32 %v3831_v43, %v9601_v55  ;;  %v9608_v43 = vld [vmem:[#allocation17_spill] sm:$0xff] }
 0x5c8   : > { %v3833_v47 = vpop.f32.mrf.mxu0 }
 0x5c9   : > { %v3834_v59 = vadd.f32 %v3833_v47, %v9601_v55  ;;  %v3910_v37 = vmax.f32 %v3832_v50, 0.0 }
 0x5ca   : > { %v3835_v52 = vpop.f32.mrf.mxu0 }
 0x5cb   : > { %v3836_v14 = vadd.f32 %v3835_v52, %v9602_v18  ;;  %v3911_v45 = vmax.f32 %v3834_v59, 0.0  ;;  %v9609_v59 = vld [vmem:[#allocation76_spill] sm:$0xff] }
 0x5cc   : > { %v3837_v26 = vpop.f32.mrf.mxu0 }
 0x5cd   : > { %v3912_v29 = vmax.f32 %v3836_v14, 0.0  ;;  %v3838_v13 = vadd.f32 %v3837_v26, %v9602_v18 }
 0x5ce   : > { %v3841_v23 = vpop.f32.mrf.mxu0 }
 0x5cf   : > { %v8594_v60 = vpack.c.bf16 %v3912_v29, %v3910_v37  ;;  %v3913_v28 = vmax.f32 %v3838_v13, 0.0  ;;  %v3842_v20 = vadd.f32 %v3841_v23, %v9603_v57  ;;  %v9610_v23 = vld [vmem:[#allocation19_spill] sm:$0xff] }
 0x5d0   : > { %v3843_v30 = vpop.f32.mrf.mxu0 }
 0x5d1   : > { %v8596_v32 = vpack.c.bf16 %v3913_v28, %v3911_v45  ;;  %v3844_v11 = vadd.f32 %v3843_v30, %v9603_v57  ;;  %v3914_v17 = vmax.f32 %v3842_v20, 0.0 }
 0x5d2   : > { %v3845_v6 = vpop.f32.mrf.mxu0 }
 0x5d3   : > { %v3846_v16 = vadd.f32 %v3845_v6, %v9604_v9  ;;  %v3915_v19 = vmax.f32 %v3844_v11, 0.0  ;;  %v9611_v11 = vld [vmem:[#allocation78_spill] sm:$0xff] }
 0x5d4   : > { %v3847_v48 = vpop.f32.mrf.mxu0 }
 0x5d5   : > { %v3916_v2 = vmax.f32 %v3846_v16, 0.0  ;;  %v3848_v31 = vadd.f32 %v3847_v48, %v9604_v9 }
 0x5d6   : > { %v8602_v40 = vpop.f32.mrf.mxu0 }
 0x5d7   : > { %v8604_v42 = vpack.c.bf16 %v3916_v2, %v3914_v17  ;;  %v3917_v22 = vmax.f32 %v3848_v31, 0.0  ;;  %v9612_v31 = vld [vmem:[#allocation85_spill] sm:$0xff] }
 0x5d8   : > { %v8606_v0 = vpop.f32.mrf.mxu0 }
 0x5d9   : > { %v8608_v54 = vpack.c.bf16 %v3917_v22, %v3915_v19 }
 0x5da   : > { %v8610_v56 = vpop.f32.mrf.mxu0 }
 0x5dc   : > { %v8612_v53 = vpop.f32.mrf.mxu0 }
 0x5de   : > { %v8614_v38 = vpop.f32.mrf.mxu0 }
 0x5e0   : > { %v3863_v46 = vpop.f32.mrf.mxu0 }
 0x5e2   : > { %v8616_v7 = vpop.f32.mrf.mxu0 }
 0x5e4   : > { %v3867_v1 = vpop.f32.mrf.mxu0 }
 0x5e6   : > { %v3871_v51 = vpop.f32.mrf.mxu0 }
 0x5e8   : > { %v3873_v33 = vpop.f32.mrf.mxu0 }
 0x5e9   : > { %v3874_v19 = vadd.f32 %v3873_v33, %v9612_v31 }
 0x5ea   : > { %v3875_v36 = vpop.f32.mrf.mxu0 }
 0x5ec   : > { %v3877_v25 = vpop.f32.mrf.mxu0 }
 0x5ed   : > { %v3878_v9 = vadd.f32 %v3877_v25, %v9611_v11 }
 0x5ee   : > { %v3881_v62 = vpop.f32.mrf.mxu0 }
 0x5ef   : > { %v3882_v17 = vadd.f32 %v3881_v62, %v9610_v23  ;;  %v9614_v62 = vld [vmem:[#allocation86_spill] sm:$0xff] }
 0x5f0   : > { %v3883_v21 = vpop.f32.mrf.mxu0 }
 0x5f1   : > { %v3884_v45 = vadd.f32 %v3883_v21, %v9610_v23  ;;  %v3876_v21 = vadd.f32 %v3875_v36, %v9611_v11  ;;  %v6510_v23 = vld [vmem:[%s9297_s5 + $0x28] sm:$0xff]   ;;  %v6517_v11 = vld [vmem:[%s9297_s5 + $0xe0] sm:$0xff]  }
 0x5f2   : > { %v3885_v61 = vpop.f32.mrf.mxu0 }
 0x5f3   : > { %v3886_v57 = vadd.f32 %v3885_v61, %v9609_v59  ;;  %v3931_v22 = vmax.f32 %v3884_v45, 0.0  ;;  %v3928_v36 = vmax.f32 %v3876_v21, 0.0  ;;  %v6511_v45 = vld [vmem:[%s9297_s5 + $0xc8] sm:$0xff]  }
 0x5f4   : > { %v3887_v10 = vpop.f32.mrf.mxu0 }
 0x5f5   : > { %v3888_v18 = vadd.f32 %v3887_v10, %v9609_v59  ;;  %v3932_v61 = vmax.f32 %v3886_v57, 0.0  ;;  %v6514_v57 = vld [vmem:[%s9297_s5 + $0x38] sm:$0xff]  }
 0x5f6   : > { %v3891_v39 = vpop.f32.mrf.mxu0 }
 0x5f7   : > { %v3892_v29 = vadd.f32 %v3891_v39, %v9608_v43  ;;  %v3933_v16 = vmax.f32 %v3888_v18, 0.0  ;;  %v9613_v39 = vld [vmem:[#allocation80_spill] sm:$0xff] }
 0x5f8   : > { %v3893_v34 = vpop.f32.mrf.mxu0  ;;  %v3868_v25 = vadd.f32 %v3867_v1, %v9613_v39  ;;  %v3866_v33 = vadd.f32 %v8616_v7, %v9613_v39 }
 0x5f9   : > { %v3894_v47 = vadd.f32 %v3893_v34, %v9608_v43  ;;  %v3934_v2 = vmax.f32 %v3892_v29, 0.0  ;;  %v3929_v34 = vmax.f32 %v3878_v9, 0.0  ;;  %v6508_v29 = vld [vmem:[%s9297_s5 + $0x20] sm:$0xff]   ;;  %v6518_v9 = vld [vmem:[%s9297_s5 + $0x48] sm:$0xff]  }
 0x5fa   : > { %v3895_v35 = vpop.f32.mrf.mxu0 }
 0x5fb   : > { %v3896_v50 = vadd.f32 %v3895_v35, %v9605_v5  ;;  %v3935_v28 = vmax.f32 %v3894_v47, 0.0  ;;  %v4017_v35 = vpack.c.bf16 %v3933_v16, %v3931_v22  ;;  %v6519_v16 = vld [vmem:[%s9297_s5 + $0xe8] sm:$0xff]  }
 0x5fc   : > { %v3897_v27 = vpop.f32.mrf.mxu0 }
 0x5fd   : > { %v3898_v41 = vadd.f32 %v3897_v27, %v9605_v5  ;;  %v3936_v20 = vmax.f32 %v3896_v50, 0.0  ;;  %v3872_v27 = vadd.f32 %v3871_v51, %v9612_v31  ;;  %v3862_v51 = vadd.f32 %v8614_v38, %v9614_v62  ;;  %v8744_v31 = vpop.permute.xlu0 %4093 }
 0x5fe   : > { %v3901_v63 = vpop.f32.mrf.mxu0 }
 0x5ff   : > { %v3902_v3 = vadd.f32 %v3901_v63, %v9606_v58  ;;  %v3937_v14 = vmax.f32 %v3898_v41, 0.0  ;;  %v4018_v10 = vpack.c.bf16 %v3936_v20, %v3934_v2  ;;  %v3930_v63 = vmax.f32 %v3882_v17, 0.0  ;;  %v9615_v41 = vld [vmem:[#allocation82_spill] sm:$0xff]  ;;  %v6515_v20 = vld [vmem:[%s9297_s5 + $0xd8] sm:$0xff]   ;;  %v6520_v17 = vld [vmem:[%s9297_s5 + $0x50] sm:$0xff]  }
 0x600   : > { %v3903_v8 = vpop.f32.mrf.mxu0  ;;  %v3858_v1 = vadd.f32 %v8612_v53, %v9615_v41  ;;  %v3856_v7 = vadd.f32 %v8610_v56, %v9615_v41  ;;  %v3922_v38 = vmax.f32 %v3862_v51, 0.0  ;;  %v6521_v2 = vld [vmem:[%s9297_s5 + $0xf0] sm:$0xff]   ;;  %v6528_v51 = vld [vmem:[%s9297_s5 + $0x80] sm:$0xff]  }
 0x601   : > { %v3904_v44 = vadd.f32 %v3903_v8, %v9606_v58  ;;  %v3938_v13 = vmax.f32 %v3902_v3, 0.0  ;;  %v4019_v48 = vpack.c.bf16 %v3937_v14, %v3935_v28  ;;  %v3864_v8 = vadd.f32 %v3863_v46, %v9614_v62  ;;  %v9616_v46 = vld [vmem:[#allocation87_spill] sm:$0xff]  ;;  %v6501_v14 = vld [vmem:[%s9297_s5 + $0xa0] sm:$0xff]   ;;  %v8750_v22 = vpop.permute.xlu0 %4103 }
 0x602   : > { %v3905_v24 = vpop.f32.mrf.mxu0  ;;  %v4016_v5 = vpack.c.bf16 %v3932_v61, %v3930_v63  ;;  %v3925_v58 = vmax.f32 %v3868_v25, 0.0  ;;  %v3921_v53 = vmax.f32 %v3858_v1, 0.0  ;;  %v6512_v28 = vld [vmem:[%s9297_s5 + $0x30] sm:$0xff]   ;;  %v6522_v61 = vld [vmem:[%s9297_s5 + $0x58] sm:$0xff]   ;;  %v6525_v63 = vld [vmem:[%s9297_s5 + $0x68] sm:$0xff]  }
 0x603   : > { %v3906_v12 = vadd.f32 %v3905_v24, %v9607_v15  ;;  %v3939_v26 = vmax.f32 %v3904_v44, 0.0  ;;  %v3927_v24 = vmax.f32 %v3874_v19, 0.0  ;;  %v3923_v3 = vmax.f32 %v3864_v8, 0.0  ;;  %v6527_v1 = vld [vmem:[%s9297_s5 + $0x78] sm:$0xff]  }
 0x604   : > { %v3907_v4 = vpop.f32.mrf.mxu0 }
 0x605   : > { %v3908_v55 = vadd.f32 %v3907_v4, %v9607_v15  ;;  %v3940_v52 = vmax.f32 %v3906_v12, 0.0  ;;  %v4015_v44 = vpack.c.bf16 %v3929_v34, %v3927_v24  ;;  %v3926_v15 = vmax.f32 %v3872_v27, 0.0  ;;  %v8760_v39 = vpop.permute.xlu0 %4113  ;;  %v6524_v34 = vld [vmem:[%s9297_s5 + $0x60] sm:$0xff]  }
 0x606   : > { %v3854_v12 = vadd.f32 %v8606_v0, %v9616_v46  ;;  %v3924_v4 = vmax.f32 %v3866_v33, 0.0  ;;  %v4013_v47 = vpack.c.bf16 %v3925_v58, %v3923_v3  ;;  %v3920_v0 = vmax.f32 %v3856_v7, 0.0  ;;  %v6529_v7 = vld [vmem:[%s9297_s5 + $0x88] sm:$0xff]  }
 0x607   : > { %v3941_v37 = vmax.f32 %v3908_v55, 0.0  ;;  %v4020_v6 = vpack.c.bf16 %v3940_v52, %v3938_v13  ;;  %v4014_v43 = vpack.c.bf16 %v3928_v36, %v3926_v15  ;;  %v3852_v55 = vadd.f32 %v8602_v40, %v9616_v46  ;;  %v6500_v40 = vld [vmem:[%s9297_s5] sm:$0xff]   ;;  %v6526_v36 = vld [vmem:[%s9297_s5 + $0x70] sm:$0xff]  }
 0x608   : > { %v3919_v50 = vmax.f32 %v3854_v12, 0.0  ;;  %v4012_v52 = vpack.c.bf16 %v3924_v4, %v3922_v38  ;;  %v6509_v13 = vld [vmem:[%s9297_s5 + $0xc0] sm:$0xff]   ;;  %v6531_v38 = vld [vmem:[%s9297_s5 + $0x98] sm:$0xff]  }
 0x609   : > { %v4021_v30 = vpack.c.bf16 %v3941_v37, %v3939_v26  ;;  %v3918_v18 = vmax.f32 %v3852_v55, 0.0  ;;  %v6506_v26 = vld [vmem:[%s9297_s5 + $0x18] sm:$0xff]  }
 0x60a   : > { %v4011_v59 = vpack.c.bf16 %v3921_v53, %v3919_v50  ;;  %v6507_v37 = vld [vmem:[%s9297_s5 + $0xb8] sm:$0xff]   ;;  %v6530_v53 = vld [vmem:[%s9297_s5 + $0x90] sm:$0xff]  }
 0x60b   : > { %4598 = vmatprep.subr.bf16.mxu0 %v4021_v30  ;;  %6346 = vmatprep.subr.bf16.mxu1 %v4021_v30  ;;  %v4010_v56 = vpack.c.bf16 %v3920_v0, %v3918_v18  ;;  %v6513_v30 = vld [vmem:[%s9297_s5 + $0xd0] sm:$0xff]  }
 0x60c   : > { %4599 = vmatpush1.bf16.msra.mxu0 %v4020_v6  ;;  %6354 = vmatpush1.bf16.msra.mxu1 %v4020_v6  ;;  %v6516_v6 = vld [vmem:[%s9297_s5 + $0x40] sm:$0xff]  }
 0x60d   : > { %4600 = vmatprep.subr.bf16.mxu0 %v4019_v48  ;;  %6347 = vmatprep.subr.bf16.mxu1 %v4019_v48  ;;  %v8734_v48 = vpop.permute.xlu1 %4088 }
 0x610   : > { %4601 = vmatpush1.bf16.msra.mxu0 %v4018_v10  ;;  %6355 = vmatpush1.bf16.msra.mxu1 %v4018_v10  ;;  %v6523_v10 = vld [vmem:[%s9297_s5 + $0xf8] sm:$0xff]  }
 0x611   : > { %4602 = vmatprep.subr.bf16.mxu0 %v4017_v35  ;;  %6348 = vmatprep.subr.bf16.mxu1 %v4017_v35  ;;  %v8746_v19 = vpop.permute.xlu1 %4098  ;;  %v8768_v35 = vpop.permute.xlu0 %4123 }
 0x614   : > { %4603 = vmatpush1.bf16.msra.mxu0 %v4016_v5  ;;  %6356 = vmatpush1.bf16.msra.mxu1 %v4016_v5 }
 0x615   : > { %4604 = vmatprep.subr.bf16.mxu0 %v4015_v44  ;;  %6349 = vmatprep.subr.bf16.mxu1 %v4015_v44  ;;  %v8752_v21 = vpop.permute.xlu1 %4108  ;;  %v8776_v62 = vpop.permute.xlu0 %4133 }
 0x618   : > { %4605 = vmatpush1.bf16.msra.mxu0 %v4014_v43  ;;  %6357 = vmatpush1.bf16.msra.mxu1 %v4014_v43 }
 0x619   : > { %4606 = vmatprep.subr.bf16.mxu0 %v4013_v47  ;;  %6350 = vmatprep.subr.bf16.mxu1 %v4013_v47  ;;  %v8762_v25 = vpop.permute.xlu1 %4118  ;;  %v8781_v24 = vpop.permute.xlu0 %4143 }
 0x61c   : > { %4607 = vmatpush1.bf16.msra.mxu0 %v4012_v52  ;;  %6358 = vmatpush1.bf16.msra.mxu1 %v4012_v52 }
 0x61d   : > { %4608 = vmatprep.subr.bf16.mxu0 %v4011_v59  ;;  %6351 = vmatprep.subr.bf16.mxu1 %v4011_v59  ;;  %v8770_v27 = vpop.permute.xlu1 %4128  ;;  %v8788_v5 = vpop.permute.xlu0 %4153 }
 0x620   : > { %4609 = vmatpush1.bf16.msra.mxu0 %v4010_v56  ;;  %6359 = vmatpush1.bf16.msra.mxu1 %v4010_v56 }
 0x621   : > { %4610 = vmatprep.subr.bf16.mxu0 %v8608_v54  ;;  %6352 = vmatprep.subr.bf16.mxu1 %v8608_v54  ;;  %v6505_v54 = vld [vmem:[%s9297_s5 + $0xb0] sm:$0xff]   ;;  %v8778_v8 = vpop.permute.xlu1 %4138  ;;  %v8796_v58 = vpop.permute.xlu0 %4163 }
 0x624   : > { %4611 = vmatpush1.bf16.msra.mxu0 %v8604_v42  ;;  %6360 = vmatpush1.bf16.msra.mxu1 %v8604_v42  ;;  %v6503_v42 = vld [vmem:[%s9297_s5 + $0xa8] sm:$0xff]  }
 0x625   : > { %4612 = vmatprep.subr.bf16.mxu0 %v8596_v32  ;;  %6353 = vmatprep.subr.bf16.mxu1 %v8596_v32  ;;  %v6502_v32 = vld [vmem:[%s9297_s5 + $0x8] sm:$0xff]   ;;  %v8783_v33 = vpop.permute.xlu1 %4148  ;;  %v8804_v15 = vpop.permute.xlu0 %4173 }
 0x628   : > { %4613 = vmatpush1.bf16.msra.mxu0 %v8594_v60  ;;  %6361 = vmatpush1.bf16.msra.mxu1 %v8594_v60  ;;  %v6504_v60 = vld [vmem:[%s9297_s5 + $0x10] sm:$0xff]  }
 0x629   : > { %v8790_v41 = vpop.permute.xlu1 %4158  ;;  %v8809_v12 = vpop.permute.xlu0 %4183 }
 0x62b   : > { %4631 = vmatmul.mubr.bf16.vlgmr.msra.gmra.mxu0 %v6500_v40  ;;  %4831 = vmatmul.mubr.bf16.vlgmr.msra.gmra.mxu1 %v6501_v14 }
 0x62c   : > { %4640 = vmatprep.mubr.bf16.mxu0 %v9431_v49  ;;  %4840 = vmatprep.mubr.bf16.mxu1 %v9431_v49 }
 0x62d   : > { %v8798_v44 = vpop.permute.xlu1 %4168  ;;  %v8816_v4 = vpop.permute.xlu0 %4193 }
 0x631   : > { %v8806_v46 = vpop.permute.xlu1 %4178  ;;  %v8824_v47 = vpop.permute.xlu0 %4203 }
 0x633   : > { %4641 = vmatmul.mubr.bf16.gmra.mxu0 %v6502_v32  ;;  %4841 = vmatmul.mubr.bf16.gmra.mxu1 %v6503_v42 }
 0x634   : > { %4650 = vmatprep.mubr.bf16.mxu0 %v9431_v49  ;;  %4850 = vmatprep.mubr.bf16.mxu1 %v9431_v49 }
 0x635   : > { %v8811_v3 = vpop.permute.xlu1 %4188  ;;  %v8832_v50 = vpop.permute.xlu0 %4213 }
 0x639   : > { %v8818_v43 = vpop.permute.xlu1 %4198  ;;  %v8836_v52 = vpop.permute.xlu0 %4223 }
 0x63b   : > { %4651 = vmatmul.mubr.bf16.gmra.mxu0 %v6504_v60  ;;  %4851 = vmatmul.mubr.bf16.gmra.mxu1 %v6505_v54 }
 0x63c   : > { %4660 = vmatprep.mubr.bf16.mxu0 %v9431_v49  ;;  %4860 = vmatprep.mubr.bf16.mxu1 %v9431_v49 }
 0x63d   : > { %v8826_v55 = vpop.permute.xlu1 %4208  ;;  %v8840_v18 = vpop.permute.xlu0 %4233 }
 0x641   : > { %v8834_v0 = vpop.permute.xlu1 %4218  ;;  %v8844_v40 = vpop.permute.xlu0 %4243 }
 0x643   : > { %4661 = vmatmul.mubr.bf16.gmra.mxu0 %v6506_v26  ;;  %4861 = vmatmul.mubr.bf16.gmra.mxu1 %v6507_v37 }
 0x644   : > { %4670 = vmatprep.mubr.bf16.mxu0 %v9431_v49  ;;  %4870 = vmatprep.mubr.bf16.mxu1 %v9431_v49 }
 0x645   : > { %v8838_v59 = vpop.permute.xlu1 %4228  ;;  %v8848_v14 = vpop.permute.xlu0 %4253 }
 0x649   : > { %v8842_v56 = vpop.permute.xlu1 %4238  ;;  %v8852_v42 = vpop.permute.xlu0 %4263 }
 0x64b   : > { %4671 = vmatmul.mubr.bf16.gmra.mxu0 %v6508_v29  ;;  %4871 = vmatmul.mubr.bf16.gmra.mxu1 %v6509_v13 }
 0x64c   : > { %4680 = vmatprep.mubr.bf16.mxu0 %v9431_v49  ;;  %4880 = vmatprep.mubr.bf16.mxu1 %v9431_v49 }
 0x64d   : > { %v8856_v54 = vpop.permute.xlu0 %4273 }
 0x651   : > { %v8860_v37 = vpop.permute.xlu0 %4283 }
 0x653   : > { %4681 = vmatmul.mubr.bf16.gmra.mxu0 %v6510_v23  ;;  %4881 = vmatmul.mubr.bf16.gmra.mxu1 %v6511_v45 }
 0x654   : > { %4690 = vmatprep.mubr.bf16.mxu0 %v9431_v49  ;;  %4890 = vmatprep.mubr.bf16.mxu1 %v9431_v49 }
 0x65b   : > { %4691 = vmatmul.mubr.bf16.gmra.mxu0 %v6512_v28  ;;  %4891 = vmatmul.mubr.bf16.gmra.mxu1 %v6513_v30 }
 0x65c   : > { %4700 = vmatprep.mubr.bf16.mxu0 %v9431_v49  ;;  %4900 = vmatprep.mubr.bf16.mxu1 %v9431_v49 }
 0x663   : > { %4701 = vmatmul.mubr.bf16.gmra.mxu0 %v6514_v57  ;;  %4901 = vmatmul.mubr.bf16.gmra.mxu1 %v6515_v20 }
 0x664   : > { %4710 = vmatprep.mubr.bf16.mxu0 %v9431_v49  ;;  %4910 = vmatprep.mubr.bf16.mxu1 %v9431_v49 }
 0x66b   : > { %4711 = vmatmul.mubr.bf16.gmra.mxu0 %v6516_v6  ;;  %4911 = vmatmul.mubr.bf16.gmra.mxu1 %v6517_v11 }
 0x66c   : > { %4720 = vmatprep.mubr.bf16.mxu0 %v9431_v49  ;;  %4920 = vmatprep.mubr.bf16.mxu1 %v9431_v49 }
 0x673   : > { %4721 = vmatmul.mubr.bf16.gmra.mxu0 %v6518_v9  ;;  %4921 = vmatmul.mubr.bf16.gmra.mxu1 %v6519_v16  ;;  %v4294_v16 = vpop.permute.xlu0 %4293 }
 0x674   : > { %4730 = vmatprep.mubr.bf16.mxu0 %v9431_v49  ;;  %4930 = vmatprep.mubr.bf16.mxu1 %v9431_v49 }
 0x67b   : > { %4731 = vmatmul.mubr.bf16.gmra.mxu0 %v6520_v17  ;;  %4931 = vmatmul.mubr.bf16.gmra.mxu1 %v6521_v2 }
 0x67c   : > { %4740 = vmatprep.mubr.bf16.mxu0 %v9431_v49  ;;  %4940 = vmatprep.mubr.bf16.mxu1 %v9431_v49 }
 0x683   : > { %4741 = vmatmul.mubr.bf16.gmra.mxu0 %v6522_v61  ;;  %4941 = vmatmul.mubr.bf16.gmra.mxu1 %v6523_v10 }
 0x684   : > { %4750 = vmatprep.mubr.bf16.mxu0 %v9431_v49 }
 0x68b   : > { %4751 = vmatmul.mubr.bf16.gmra.mxu0 %v6524_v34 }
 0x68c   : > { %4760 = vmatprep.mubr.bf16.mxu0 %v9431_v49 }
 0x693   : > { %4761 = vmatmul.mubr.bf16.gmra.mxu0 %v6525_v63 }
 0x694   : > { %4770 = vmatprep.mubr.bf16.mxu0 %v9431_v49 }
 0x69b   : > { %4771 = vmatmul.mubr.bf16.gmra.mxu0 %v6526_v36 }
 0x69c   : > { %4780 = vmatprep.mubr.bf16.mxu0 %v9431_v49 }
 0x6a3   : > { %4781 = vmatmul.mubr.bf16.gmra.mxu0 %v6527_v1 }
 0x6a4   : > { %4790 = vmatprep.mubr.bf16.mxu0 %v9431_v49 }
 0x6ab   : > { %4791 = vmatmul.mubr.bf16.gmra.mxu0 %v6528_v51 }
 0x6ac   : > { %4800 = vmatprep.mubr.bf16.mxu0 %v9431_v49 }
 0x6b3   : > { %4801 = vmatmul.mubr.bf16.gmra.mxu0 %v6529_v7 }
 0x6b4   : > { %4810 = vmatprep.mubr.bf16.mxu0 %v9431_v49 }
 0x6bb   : > { %4811 = vmatmul.mubr.bf16.gmra.mxu0 %v6530_v53 }
 0x6bc   : > { %4820 = vmatprep.mubr.bf16.mxu0 %v9431_v49  ;;  %v8846_v49 = vpop.permute.xlu1 %4248 }
 0x6c0   : > { %v8850_v32 = vpop.permute.xlu1 %4258 }
 0x6c3   : > { %4821 = vmatmul.mubr.bf16.gmra.mxu0 %v6531_v38 }
 0x6c4   : > { %v8854_v60 = vpop.permute.xlu1 %4268 }
 0x6c8   : > { %v8858_v26 = vpop.permute.xlu1 %4278 }
 0x6cc   : > { %v4289_v29 = vpop.permute.xlu1 %4288 }
 0x6d0   : > { %v4299_v51 = vpop.permute.xlu1 %4298 }
 0x6eb   : > { %v4632_v13 = vpop.f32.mrf.mxu0  ;;  %v4832_v23 = vpop.f32.mrf.mxu1 }
 0x6ec   : > { %v4633_v45 = vadd.f32 %v4632_v13, %v8734_v48  ;;  %v4833_v28 = vadd.f32 %v4832_v23, %v4289_v29 }
 0x6ed   : > { %v4634_v30 = vpop.f32.mrf.mxu0  ;;  %v4834_v57 = vpop.f32.mrf.mxu1 }
 0x6ee   : > { %v4635_v20 = vadd.f32 %v4634_v30, %v8734_v48  ;;  %v4835_v6 = vadd.f32 %v4834_v57, %v4289_v29  ;;  %v4951_v17 = vmax.f32 %v4633_v45, 0.0  ;;  %v5031_v2 = vmax.f32 %v4833_v28, 0.0 }
 0x6ef   : > { %v4636_v11 = vpop.f32.mrf.mxu0  ;;  %v4836_v9 = vpop.f32.mrf.mxu1 }
 0x6f0   : > { %v4952_v61 = vmax.f32 %v4635_v20, 0.0  ;;  %v5032_v10 = vmax.f32 %v4835_v6, 0.0  ;;  %v4637_v34 = vadd.f32 %v4636_v11, %v8744_v31  ;;  %v4837_v63 = vadd.f32 %v4836_v9, %v4294_v16 }
 0x6f1   : > { %v4638_v36 = vpop.f32.mrf.mxu0  ;;  %v4838_v1 = vpop.f32.mrf.mxu1 }
 0x6f2   : > { %v6282_v7 = vpack.c.bf16 %v4952_v61, %v4951_v17  ;;  %v6322_v53 = vpack.c.bf16 %v5032_v10, %v5031_v2  ;;  %v4639_v48 = vadd.f32 %v4638_v36, %v8744_v31  ;;  %v4839_v38 = vadd.f32 %v4838_v1, %v4294_v16  ;;  %v4304_v10 = vpop.permute.xlu0 %4303 }
 0x6f3   : > { %v4642_v29 = vpop.f32.mrf.mxu0  ;;  %v4842_v13 = vpop.f32.mrf.mxu1  ;;  %v4953_v28 = vmax.f32 %v4637_v34, 0.0  ;;  %v5033_v30 = vmax.f32 %v4837_v63, 0.0 }
 0x6f4   : > { %6148 = vst [vmem:[%s8360_s17 + $0x8] sm:$0xff] %v6282_v7  ;;  %6188 = vst [vmem:[%s8360_s17 + $0x288] sm:$0xff] %v6322_v53  ;;  %v4643_v23 = vadd.f32 %v4642_v29, %v8746_v19  ;;  %v4843_v45 = vadd.f32 %v4842_v13, %v4299_v51  ;;  %v4954_v57 = vmax.f32 %v4639_v48, 0.0  ;;  %v5034_v20 = vmax.f32 %v4839_v38, 0.0 }
 0x6f5   : > { %v4644_v6 = vpop.f32.mrf.mxu0  ;;  %v4844_v11 = vpop.f32.mrf.mxu1 }
 0x6f6   : > { %v4645_v9 = vadd.f32 %v4644_v6, %v8746_v19  ;;  %v4845_v17 = vadd.f32 %v4844_v11, %v4299_v51  ;;  %v6283_v31 = vpack.c.bf16 %v4954_v57, %v4953_v28  ;;  %v6323_v16 = vpack.c.bf16 %v5034_v20, %v5033_v30  ;;  %v4309_v19 = vpop.permute.xlu1 %4308 }
 0x6f7   : > { %v4646_v2 = vpop.f32.mrf.mxu0  ;;  %v4846_v61 = vpop.f32.mrf.mxu1  ;;  %v4955_v36 = vmax.f32 %v4643_v23, 0.0  ;;  %v5035_v1 = vmax.f32 %v4843_v45, 0.0 }
 0x6f8   : > { %v4956_v7 = vmax.f32 %v4645_v9, 0.0  ;;  %v5036_v34 = vmax.f32 %v4845_v17, 0.0  ;;  %6149 = vst [vmem:[%s8360_s17 + $0x18] sm:$0xff] %v6283_v31  ;;  %6189 = vst [vmem:[%s8360_s17 + $0x298] sm:$0xff] %v6323_v16  ;;  %v4647_v63 = vadd.f32 %v4646_v2, %v8750_v22  ;;  %v4847_v53 = vadd.f32 %v4846_v61, %v4304_v10 }
 0x6f9   : > { %v4648_v48 = vpop.f32.mrf.mxu0  ;;  %v4848_v38 = vpop.f32.mrf.mxu1 }
 0x6fa   : > { %v6284_v51 = vpack.c.bf16 %v4956_v7, %v4955_v36  ;;  %v6324_v29 = vpack.c.bf16 %v5036_v34, %v5035_v1  ;;  %v4649_v13 = vadd.f32 %v4648_v48, %v8750_v22  ;;  %v4849_v28 = vadd.f32 %v4848_v38, %v4304_v10  ;;  %v4314_v1 = vpop.permute.xlu0 %4313 }
 0x6fb   : > { %v4652_v30 = vpop.f32.mrf.mxu0  ;;  %v4852_v23 = vpop.f32.mrf.mxu1  ;;  %v4957_v20 = vmax.f32 %v4647_v63, 0.0  ;;  %v5037_v6 = vmax.f32 %v4847_v53, 0.0 }
 0x6fc   : > { %6150 = vst [vmem:[%s8360_s17 + $0x28] sm:$0xff] %v6284_v51  ;;  %6190 = vst [vmem:[%s8360_s17 + $0x2a8] sm:$0xff] %v6324_v29  ;;  %v4653_v45 = vadd.f32 %v4652_v30, %v8752_v21  ;;  %v4853_v57 = vadd.f32 %v4852_v23, %v4309_v19  ;;  %v4958_v11 = vmax.f32 %v4649_v13, 0.0  ;;  %v5038_v9 = vmax.f32 %v4849_v28, 0.0 }
 0x6fd   : > { %v4654_v17 = vpop.f32.mrf.mxu0  ;;  %v4854_v31 = vpop.f32.mrf.mxu1 }
 0x6fe   : > { %v4655_v16 = vadd.f32 %v4654_v17, %v8752_v21  ;;  %v4855_v2 = vadd.f32 %v4854_v31, %v4309_v19  ;;  %v6285_v22 = vpack.c.bf16 %v4958_v11, %v4957_v20  ;;  %v6325_v61 = vpack.c.bf16 %v5038_v9, %v5037_v6  ;;  %v4319_v21 = vpop.permute.xlu1 %4318 }
 0x6ff   : > { %v4656_v10 = vpop.f32.mrf.mxu0  ;;  %v4856_v36 = vpop.f32.mrf.mxu1  ;;  %v4959_v7 = vmax.f32 %v4653_v45, 0.0  ;;  %v5039_v34 = vmax.f32 %v4853_v57, 0.0 }
 0x700   : > { %v4960_v48 = vmax.f32 %v4655_v16, 0.0  ;;  %v5040_v63 = vmax.f32 %v4855_v2, 0.0  ;;  %6151 = vst [vmem:[%s8360_s17 + $0x38] sm:$0xff] %v6285_v22  ;;  %6191 = vst [vmem:[%s8360_s17 + $0x2b8] sm:$0xff] %v6325_v61  ;;  %v4657_v53 = vadd.f32 %v4656_v10, %v8760_v39  ;;  %v4857_v38 = vadd.f32 %v4856_v36, %v4314_v1 }
 0x701   : > { %v4658_v51 = vpop.f32.mrf.mxu0  ;;  %v4858_v29 = vpop.f32.mrf.mxu1 }
 0x702   : > { %v6286_v19 = vpack.c.bf16 %v4960_v48, %v4959_v7  ;;  %v6326_v13 = vpack.c.bf16 %v5040_v63, %v5039_v34  ;;  %v4659_v28 = vadd.f32 %v4658_v51, %v8760_v39  ;;  %v4859_v30 = vadd.f32 %v4858_v29, %v4314_v1  ;;  %v4324_v1 = vpop.permute.xlu0 %4323 }
 0x703   : > { %v4662_v23 = vpop.f32.mrf.mxu0  ;;  %v4862_v45 = vpop.f32.mrf.mxu1  ;;  %v4961_v6 = vmax.f32 %v4657_v53, 0.0  ;;  %v5041_v11 = vmax.f32 %v4857_v38, 0.0 }
 0x704   : > { %6152 = vst [vmem:[%s8360_s17 + $0x48] sm:$0xff] %v6286_v19  ;;  %6192 = vst [vmem:[%s8360_s17 + $0x2c8] sm:$0xff] %v6326_v13  ;;  %v4663_v57 = vadd.f32 %v4662_v23, %v8762_v25  ;;  %v4863_v20 = vadd.f32 %v4862_v45, %v4319_v21  ;;  %v4962_v9 = vmax.f32 %v4659_v28, 0.0  ;;  %v5042_v17 = vmax.f32 %v4859_v30, 0.0 }
 0x705   : > { %v4664_v31 = vpop.f32.mrf.mxu0  ;;  %v4864_v16 = vpop.f32.mrf.mxu1 }
 0x706   : > { %v4665_v2 = vadd.f32 %v4664_v31, %v8762_v25  ;;  %v4865_v22 = vadd.f32 %v4864_v16, %v4319_v21  ;;  %v6287_v39 = vpack.c.bf16 %v4962_v9, %v4961_v6  ;;  %v6327_v61 = vpack.c.bf16 %v5042_v17, %v5041_v11  ;;  %v4329_v25 = vpop.permute.xlu1 %4328 }
 0x707   : > { %v4666_v10 = vpop.f32.mrf.mxu0  ;;  %v4866_v36 = vpop.f32.mrf.mxu1  ;;  %v4963_v7 = vmax.f32 %v4663_v57, 0.0  ;;  %v5043_v34 = vmax.f32 %v4863_v20, 0.0 }
 0x708   : > { %v4964_v48 = vmax.f32 %v4665_v2, 0.0  ;;  %v5044_v63 = vmax.f32 %v4865_v22, 0.0  ;;  %6153 = vst [vmem:[%s8360_s17 + $0x58] sm:$0xff] %v6287_v39  ;;  %6193 = vst [vmem:[%s8360_s17 + $0x2d8] sm:$0xff] %v6327_v61  ;;  %v4667_v53 = vadd.f32 %v4666_v10, %v8768_v35  ;;  %v4867_v38 = vadd.f32 %v4866_v36, %v4324_v1  ;;  %v4334_v10 = vpop.permute.xlu0 %4333 }
 0x709   : > { %v4668_v51 = vpop.f32.mrf.mxu0  ;;  %v4868_v29 = vpop.f32.mrf.mxu1 }
 0x70a   : > { %v6288_v21 = vpack.c.bf16 %v4964_v48, %v4963_v7  ;;  %v6328_v19 = vpack.c.bf16 %v5044_v63, %v5043_v34  ;;  %v4669_v13 = vadd.f32 %v4668_v51, %v8768_v35  ;;  %v4869_v28 = vadd.f32 %v4868_v29, %v4324_v1 }
 0x70b   : > { %v4672_v30 = vpop.f32.mrf.mxu0  ;;  %v4872_v23 = vpop.f32.mrf.mxu1  ;;  %v4965_v20 = vmax.f32 %v4667_v53, 0.0  ;;  %v5045_v6 = vmax.f32 %v4867_v38, 0.0 }
 0x70c   : > { %6154 = vst [vmem:[%s8360_s17 + $0x68] sm:$0xff] %v6288_v21  ;;  %6194 = vst [vmem:[%s8360_s17 + $0x2e8] sm:$0xff] %v6328_v19  ;;  %v4673_v45 = vadd.f32 %v4672_v30, %v8770_v27  ;;  %v4873_v57 = vadd.f32 %v4872_v23, %v4329_v25  ;;  %v4966_v11 = vmax.f32 %v4669_v13, 0.0  ;;  %v5046_v9 = vmax.f32 %v4869_v28, 0.0 }
 0x70d   : > { %v4674_v17 = vpop.f32.mrf.mxu0  ;;  %v4874_v31 = vpop.f32.mrf.mxu1 }
 0x70e   : > { %v4675_v16 = vadd.f32 %v4674_v17, %v8770_v27  ;;  %v4875_v2 = vadd.f32 %v4874_v31, %v4329_v25  ;;  %v6289_v35 = vpack.c.bf16 %v4966_v11, %v4965_v20  ;;  %v6329_v22 = vpack.c.bf16 %v5046_v9, %v5045_v6  ;;  %v4339_v27 = vpop.permute.xlu1 %4338 }
 0x70f   : > { %v4676_v39 = vpop.f32.mrf.mxu0  ;;  %v4876_v61 = vpop.f32.mrf.mxu1  ;;  %v4967_v36 = vmax.f32 %v4673_v45, 0.0  ;;  %v5047_v1 = vmax.f32 %v4873_v57, 0.0 }
 0x710   : > { %v4968_v7 = vmax.f32 %v4675_v16, 0.0  ;;  %v5048_v34 = vmax.f32 %v4875_v2, 0.0  ;;  %6155 = vst [vmem:[%s8360_s17 + $0x78] sm:$0xff] %v6289_v35  ;;  %6195 = vst [vmem:[%s8360_s17 + $0x2f8] sm:$0xff] %v6329_v22  ;;  %v4677_v48 = vadd.f32 %v4676_v39, %v8776_v62  ;;  %v4877_v63 = vadd.f32 %v4876_v61, %v4334_v10  ;;  %v4344_v35 = vpop.permute.xlu0 %4343 }
 0x711   : > { %v4678_v53 = vpop.f32.mrf.mxu0  ;;  %v4878_v38 = vpop.f32.mrf.mxu1 }
 0x712   : > { %v6290_v51 = vpack.c.bf16 %v4968_v7, %v4967_v36  ;;  %v6330_v29 = vpack.c.bf16 %v5048_v34, %v5047_v1  ;;  %v4679_v25 = vadd.f32 %v4678_v53, %v8776_v62  ;;  %v4879_v21 = vadd.f32 %v4878_v38, %v4334_v10 }
 0x713   : > { %v4682_v19 = vpop.f32.mrf.mxu0  ;;  %v4882_v13 = vpop.f32.mrf.mxu1  ;;  %v4969_v23 = vmax.f32 %v4677_v48, 0.0  ;;  %v5049_v45 = vmax.f32 %v4877_v63, 0.0 }
 0x714   : > { %6156 = vst [vmem:[%s8360_s17 + $0x88] sm:$0xff] %v6290_v51  ;;  %6196 = vst [vmem:[%s8360_s17 + $0x308] sm:$0xff] %v6330_v29  ;;  %v4683_v28 = vadd.f32 %v4682_v19, %v8778_v8  ;;  %v4883_v30 = vadd.f32 %v4882_v13, %v4339_v27  ;;  %v4970_v57 = vmax.f32 %v4679_v25, 0.0  ;;  %v5050_v20 = vmax.f32 %v4879_v21, 0.0 }
 0x715   : > { %v4684_v6 = vpop.f32.mrf.mxu0  ;;  %v4884_v11 = vpop.f32.mrf.mxu1 }
 0x716   : > { %v4685_v9 = vadd.f32 %v4684_v6, %v8778_v8  ;;  %v4885_v17 = vadd.f32 %v4884_v11, %v4339_v27  ;;  %v6291_v62 = vpack.c.bf16 %v4970_v57, %v4969_v23  ;;  %v6331_v31 = vpack.c.bf16 %v5050_v20, %v5049_v45  ;;  %v4349_v8 = vpop.permute.xlu1 %4348 }
 0x717   : > { %v4686_v16 = vpop.f32.mrf.mxu0  ;;  %v4886_v2 = vpop.f32.mrf.mxu1  ;;  %v4971_v22 = vmax.f32 %v4683_v28, 0.0  ;;  %v5051_v39 = vmax.f32 %v4883_v30, 0.0 }
 0x718   : > { %v4972_v61 = vmax.f32 %v4685_v9, 0.0  ;;  %v5052_v10 = vmax.f32 %v4885_v17, 0.0  ;;  %6157 = vst [vmem:[%s8360_s17 + $0x98] sm:$0xff] %v6291_v62  ;;  %6197 = vst [vmem:[%s8360_s17 + $0x318] sm:$0xff] %v6331_v31  ;;  %v4687_v36 = vadd.f32 %v4686_v16, %v8781_v24  ;;  %v4887_v1 = vadd.f32 %v4886_v2, %v4344_v35  ;;  %v4354_v9 = vpop.permute.xlu0 %4353 }
 0x719   : > { %v4688_v7 = vpop.f32.mrf.mxu0  ;;  %v4888_v34 = vpop.f32.mrf.mxu1 }
 0x71a   : > { %v6292_v48 = vpack.c.bf16 %v4972_v61, %v4971_v22  ;;  %v6332_v63 = vpack.c.bf16 %v5052_v10, %v5051_v39  ;;  %v4689_v53 = vadd.f32 %v4688_v7, %v8781_v24  ;;  %v4889_v38 = vadd.f32 %v4888_v34, %v4344_v35 }
 0x71b   : > { %v4692_v27 = vpop.f32.mrf.mxu0  ;;  %v4892_v51 = vpop.f32.mrf.mxu1  ;;  %v4973_v21 = vmax.f32 %v4687_v36, 0.0  ;;  %v5053_v19 = vmax.f32 %v4887_v1, 0.0 }
 0x71c   : > { %6158 = vst [vmem:[%s8360_s17 + $0xa8] sm:$0xff] %v6292_v48  ;;  %6198 = vst [vmem:[%s8360_s17 + $0x328] sm:$0xff] %v6332_v63  ;;  %v4693_v29 = vadd.f32 %v4692_v27, %v8783_v33  ;;  %v4893_v25 = vadd.f32 %v4892_v51, %v4349_v8  ;;  %v4974_v13 = vmax.f32 %v4689_v53, 0.0  ;;  %v5054_v28 = vmax.f32 %v4889_v38, 0.0 }
 0x71d   : > { %v4694_v30 = vpop.f32.mrf.mxu0  ;;  %v4894_v23 = vpop.f32.mrf.mxu1 }
 0x71e   : > { %v4695_v45 = vadd.f32 %v4694_v30, %v8783_v33  ;;  %v4895_v57 = vadd.f32 %v4894_v23, %v4349_v8  ;;  %v6293_v24 = vpack.c.bf16 %v4974_v13, %v4973_v21  ;;  %v6333_v20 = vpack.c.bf16 %v5054_v28, %v5053_v19  ;;  %v4359_v33 = vpop.permute.xlu1 %4358  ;;  %v4364_v30 = vpop.permute.xlu0 %4363 }
 0x71f   : > { %v4696_v6 = vpop.f32.mrf.mxu0  ;;  %v4896_v11 = vpop.f32.mrf.mxu1  ;;  %v4975_v17 = vmax.f32 %v4693_v29, 0.0  ;;  %v5055_v62 = vmax.f32 %v4893_v25, 0.0 }
 0x720   : > { %v4976_v31 = vmax.f32 %v4695_v45, 0.0  ;;  %v5056_v16 = vmax.f32 %v4895_v57, 0.0  ;;  %6159 = vst [vmem:[%s8360_s17 + $0xb8] sm:$0xff] %v6293_v24  ;;  %6199 = vst [vmem:[%s8360_s17 + $0x338] sm:$0xff] %v6333_v20  ;;  %v4697_v2 = vadd.f32 %v4696_v6, %v8788_v5  ;;  %v4897_v35 = vadd.f32 %v4896_v11, %v4354_v9 }
 0x721   : > { %v4698_v22 = vpop.f32.mrf.mxu0  ;;  %v4898_v39 = vpop.f32.mrf.mxu1 }
 0x722   : > { %v6294_v61 = vpack.c.bf16 %v4976_v31, %v4975_v17  ;;  %v6334_v10 = vpack.c.bf16 %v5056_v16, %v5055_v62  ;;  %v4699_v36 = vadd.f32 %v4698_v22, %v8788_v5  ;;  %v4899_v1 = vadd.f32 %v4898_v39, %v4354_v9 }
 0x723   : > { %v4702_v7 = vpop.f32.mrf.mxu0  ;;  %v4902_v34 = vpop.f32.mrf.mxu1  ;;  %v4977_v63 = vmax.f32 %v4697_v2, 0.0  ;;  %v5057_v53 = vmax.f32 %v4897_v35, 0.0 }
 0x724   : > { %6160 = vst [vmem:[%s8360_s17 + $0xc8] sm:$0xff] %v6294_v61  ;;  %6200 = vst [vmem:[%s8360_s17 + $0x348] sm:$0xff] %v6334_v10  ;;  %v4703_v8 = vadd.f32 %v4702_v7, %v8790_v41  ;;  %v4903_v48 = vadd.f32 %v4902_v34, %v4359_v33  ;;  %v4978_v38 = vmax.f32 %v4699_v36, 0.0  ;;  %v5058_v27 = vmax.f32 %v4899_v1, 0.0 }
 0x725   : > { %v4704_v51 = vpop.f32.mrf.mxu0  ;;  %v4904_v29 = vpop.f32.mrf.mxu1 }
 0x726   : > { %v4705_v25 = vadd.f32 %v4704_v51, %v8790_v41  ;;  %v4905_v21 = vadd.f32 %v4904_v29, %v4359_v33  ;;  %v6295_v5 = vpack.c.bf16 %v4978_v38, %v4977_v63  ;;  %v6335_v19 = vpack.c.bf16 %v5058_v27, %v5057_v53  ;;  %v4369_v41 = vpop.permute.xlu1 %4368  ;;  %v4374_v38 = vpop.permute.xlu0 %4373 }
 0x727   : > { %v4706_v13 = vpop.f32.mrf.mxu0  ;;  %v4906_v28 = vpop.f32.mrf.mxu1  ;;  %v4979_v23 = vmax.f32 %v4703_v8, 0.0  ;;  %v5059_v45 = vmax.f32 %v4903_v48, 0.0 }
 0x728   : > { %v4980_v57 = vmax.f32 %v4705_v25, 0.0  ;;  %v5060_v24 = vmax.f32 %v4905_v21, 0.0  ;;  %6161 = vst [vmem:[%s8360_s17 + $0xd8] sm:$0xff] %v6295_v5  ;;  %6201 = vst [vmem:[%s8360_s17 + $0x358] sm:$0xff] %v6335_v19  ;;  %v4707_v20 = vadd.f32 %v4706_v13, %v8796_v58  ;;  %v4907_v6 = vadd.f32 %v4906_v28, %v4364_v30 }
 0x729   : > { %v4708_v11 = vpop.f32.mrf.mxu0  ;;  %v4908_v9 = vpop.f32.mrf.mxu1 }
 0x72a   : > { %v6296_v17 = vpack.c.bf16 %v4980_v57, %v4979_v23  ;;  %v6336_v62 = vpack.c.bf16 %v5060_v24, %v5059_v45  ;;  %v4709_v31 = vadd.f32 %v4708_v11, %v8796_v58  ;;  %v4909_v16 = vadd.f32 %v4908_v9, %v4364_v30 }
 0x72b   : > { %v4712_v2 = vpop.f32.mrf.mxu0  ;;  %v4912_v35 = vpop.f32.mrf.mxu1  ;;  %v4981_v33 = vmax.f32 %v4707_v20, 0.0  ;;  %v5061_v61 = vmax.f32 %v4907_v6, 0.0 }
 0x72c   : > { %6162 = vst [vmem:[%s8360_s17 + $0xe8] sm:$0xff] %v6296_v17  ;;  %6202 = vst [vmem:[%s8360_s17 + $0x368] sm:$0xff] %v6336_v62  ;;  %v4713_v22 = vadd.f32 %v4712_v2, %v8798_v44  ;;  %v4913_v39 = vadd.f32 %v4912_v35, %v4369_v41  ;;  %v4982_v10 = vmax.f32 %v4709_v31, 0.0  ;;  %v5062_v36 = vmax.f32 %v4909_v16, 0.0 }
 0x72d   : > { %v4714_v1 = vpop.f32.mrf.mxu0  ;;  %v4914_v7 = vpop.f32.mrf.mxu1 }
 0x72e   : > { %v4715_v34 = vadd.f32 %v4714_v1, %v8798_v44  ;;  %v4915_v8 = vadd.f32 %v4914_v7, %v4369_v41  ;;  %v6297_v58 = vpack.c.bf16 %v4982_v10, %v4981_v33  ;;  %v6337_v48 = vpack.c.bf16 %v5062_v36, %v5061_v61  ;;  %v4379_v44 = vpop.permute.xlu1 %4378  ;;  %v4384_v33 = vpop.permute.xlu0 %4383 }
 0x72f   : > { %v4716_v63 = vpop.f32.mrf.mxu0  ;;  %v4916_v53 = vpop.f32.mrf.mxu1  ;;  %v4983_v27 = vmax.f32 %v4713_v22, 0.0  ;;  %v5063_v51 = vmax.f32 %v4913_v39, 0.0 }
 0x730   : > { %v4984_v29 = vmax.f32 %v4715_v34, 0.0  ;;  %v5064_v25 = vmax.f32 %v4915_v8, 0.0  ;;  %6163 = vst [vmem:[%s8360_s17 + $0xf8] sm:$0xff] %v6297_v58  ;;  %6203 = vst [vmem:[%s8360_s17 + $0x378] sm:$0xff] %v6337_v48  ;;  %v4717_v21 = vadd.f32 %v4716_v63, %v8804_v15  ;;  %v4917_v5 = vadd.f32 %v4916_v53, %v4374_v38 }
 0x731   : > { %v4718_v19 = vpop.f32.mrf.mxu0  ;;  %v4918_v13 = vpop.f32.mrf.mxu1 }
 0x732   : > { %v6298_v28 = vpack.c.bf16 %v4984_v29, %v4983_v27  ;;  %v6338_v30 = vpack.c.bf16 %v5064_v25, %v5063_v51  ;;  %v4719_v23 = vadd.f32 %v4718_v19, %v8804_v15  ;;  %v4919_v45 = vadd.f32 %v4918_v13, %v4374_v38 }
 0x733   : > { %v4722_v57 = vpop.f32.mrf.mxu0  ;;  %v4922_v24 = vpop.f32.mrf.mxu1  ;;  %v4985_v11 = vmax.f32 %v4717_v21, 0.0  ;;  %v5065_v9 = vmax.f32 %v4917_v5, 0.0 }
 0x734   : > { %6164 = vst [vmem:[%s8360_s17 + $0x108] sm:$0xff] %v6298_v28  ;;  %6204 = vst [vmem:[%s8360_s17 + $0x388] sm:$0xff] %v6338_v30  ;;  %v4723_v20 = vadd.f32 %v4722_v57, %v8806_v46  ;;  %v4923_v6 = vadd.f32 %v4922_v24, %v4379_v44  ;;  %v4986_v41 = vmax.f32 %v4719_v23, 0.0  ;;  %v5066_v17 = vmax.f32 %v4919_v45, 0.0 }
 0x735   : > { %v4724_v62 = vpop.f32.mrf.mxu0  ;;  %v4924_v31 = vpop.f32.mrf.mxu1 }
 0x736   : > { %v4725_v16 = vadd.f32 %v4724_v62, %v8806_v46  ;;  %v4925_v2 = vadd.f32 %v4924_v31, %v4379_v44  ;;  %v6299_v15 = vpack.c.bf16 %v4986_v41, %v4985_v11  ;;  %v6339_v35 = vpack.c.bf16 %v5066_v17, %v5065_v9  ;;  %v4389_v46 = vpop.permute.xlu1 %4388 }
 0x737   : > { %v4726_v22 = vpop.f32.mrf.mxu0  ;;  %v4926_v39 = vpop.f32.mrf.mxu1  ;;  %v4987_v61 = vmax.f32 %v4723_v20, 0.0  ;;  %v5067_v10 = vmax.f32 %v4923_v6, 0.0 }
 0x738   : > { %v4988_v36 = vmax.f32 %v4725_v16, 0.0  ;;  %v5068_v1 = vmax.f32 %v4925_v2, 0.0  ;;  %6165 = vst [vmem:[%s8360_s17 + $0x118] sm:$0xff] %v6299_v15  ;;  %6205 = vst [vmem:[%s8360_s17 + $0x398] sm:$0xff] %v6339_v35  ;;  %v4727_v7 = vadd.f32 %v4726_v22, %v8809_v12  ;;  %v4927_v34 = vadd.f32 %v4926_v39, %v4384_v33  ;;  %v4394_v20 = vpop.permute.xlu0 %4393 }
 0x739   : > { %v4728_v8 = vpop.f32.mrf.mxu0  ;;  %v4928_v58 = vpop.f32.mrf.mxu1 }
 0x73a   : > { %v6300_v48 = vpack.c.bf16 %v4988_v36, %v4987_v61  ;;  %v6340_v63 = vpack.c.bf16 %v5068_v1, %v5067_v10  ;;  %v4729_v53 = vadd.f32 %v4728_v8, %v8809_v12  ;;  %v4929_v38 = vadd.f32 %v4928_v58, %v4384_v33 }
 0x73b   : > { %v4732_v27 = vpop.f32.mrf.mxu0  ;;  %v4932_v51 = vpop.f32.mrf.mxu1  ;;  %v4989_v21 = vmax.f32 %v4727_v7, 0.0  ;;  %v5069_v5 = vmax.f32 %v4927_v34, 0.0 }
 0x73c   : > { %6166 = vst [vmem:[%s8360_s17 + $0x128] sm:$0xff] %v6300_v48  ;;  %6206 = vst [vmem:[%s8360_s17 + $0x3a8] sm:$0xff] %v6340_v63  ;;  %v4733_v29 = vadd.f32 %v4732_v27, %v8811_v3  ;;  %v4933_v25 = vadd.f32 %v4932_v51, %v4389_v46  ;;  %v4990_v19 = vmax.f32 %v4729_v53, 0.0  ;;  %v5070_v13 = vmax.f32 %v4929_v38, 0.0  ;;  %v4404_v27 = vpop.permute.xlu0 %4403 }
 0x73d   : > { %v4734_v44 = vpop.f32.mrf.mxu0  ;;  %v4934_v28 = vpop.f32.mrf.mxu1 }
 0x73e   : > { %v4735_v30 = vadd.f32 %v4734_v44, %v8811_v3  ;;  %v4935_v23 = vadd.f32 %v4934_v28, %v4389_v46  ;;  %v6301_v12 = vpack.c.bf16 %v4990_v19, %v4989_v21  ;;  %v6341_v45 = vpack.c.bf16 %v5070_v13, %v5069_v5  ;;  %v4399_v3 = vpop.permute.xlu1 %4398 }
 0x73f   : > { %v4736_v57 = vpop.f32.mrf.mxu0  ;;  %v4936_v24 = vpop.f32.mrf.mxu1  ;;  %v4991_v6 = vmax.f32 %v4733_v29, 0.0  ;;  %v5071_v11 = vmax.f32 %v4933_v25, 0.0 }
 0x740   : > { %v4992_v9 = vmax.f32 %v4735_v30, 0.0  ;;  %v5072_v41 = vmax.f32 %v4935_v23, 0.0  ;;  %6167 = vst [vmem:[%s8360_s17 + $0x138] sm:$0xff] %v6301_v12  ;;  %6207 = vst [vmem:[%s8360_s17 + $0x3b8] sm:$0xff] %v6341_v45  ;;  %v4737_v17 = vadd.f32 %v4736_v57, %v8816_v4  ;;  %v4937_v62 = vadd.f32 %v4936_v24, %v4394_v20 }
 0x741   : > { %v4738_v31 = vpop.f32.mrf.mxu0  ;;  %v4938_v16 = vpop.f32.mrf.mxu1 }
 0x742   : > { %v6302_v2 = vpack.c.bf16 %v4992_v9, %v4991_v6  ;;  %v6342_v15 = vpack.c.bf16 %v5072_v41, %v5071_v11  ;;  %v4739_v35 = vadd.f32 %v4738_v31, %v8816_v4  ;;  %v4939_v22 = vadd.f32 %v4938_v16, %v4394_v20 }
 0x743   : > { %v4742_v39 = vpop.f32.mrf.mxu0  ;;  %v4942_v33 = vpop.f32.mrf.mxu1  ;;  %v4993_v36 = vmax.f32 %v4737_v17, 0.0  ;;  %v5073_v1 = vmax.f32 %v4937_v62, 0.0 }
 0x744   : > { %6168 = vst [vmem:[%s8360_s17 + $0x148] sm:$0xff] %v6302_v2  ;;  %6208 = vst [vmem:[%s8360_s17 + $0x3c8] sm:$0xff] %v6342_v15  ;;  %v4743_v61 = vadd.f32 %v4742_v39, %v8818_v43  ;;  %v4943_v10 = vadd.f32 %v4942_v33, %v4399_v3  ;;  %v4994_v7 = vmax.f32 %v4739_v35, 0.0  ;;  %v5074_v34 = vmax.f32 %v4939_v22, 0.0 }
 0x745   : > { %v4744_v8 = vpop.f32.mrf.mxu0  ;;  %v4944_v58 = vpop.f32.mrf.mxu1 }
 0x746   : > { %v4745_v46 = vadd.f32 %v4744_v8, %v8818_v43  ;;  %v4945_v48 = vadd.f32 %v4944_v58, %v4399_v3  ;;  %v6303_v4 = vpack.c.bf16 %v4994_v7, %v4993_v36  ;;  %v6343_v63 = vpack.c.bf16 %v5074_v34, %v5073_v1 }
 0x747   : > { %v4746_v53 = vpop.f32.mrf.mxu0  ;;  %v4946_v38 = vpop.f32.mrf.mxu1  ;;  %v4995_v51 = vmax.f32 %v4743_v61, 0.0  ;;  %v5075_v29 = vmax.f32 %v4943_v10, 0.0 }
 0x748   : > { %v4996_v25 = vmax.f32 %v4745_v46, 0.0  ;;  %v5076_v21 = vmax.f32 %v4945_v48, 0.0  ;;  %6169 = vst [vmem:[%s8360_s17 + $0x158] sm:$0xff] %v6303_v4  ;;  %6209 = vst [vmem:[%s8360_s17 + $0x3d8] sm:$0xff] %v6343_v63  ;;  %v4747_v5 = vadd.f32 %v4746_v53, %v8824_v47  ;;  %v4947_v19 = vadd.f32 %v4946_v38, %v4404_v27 }
 0x749   : > { %v4748_v13 = vpop.f32.mrf.mxu0  ;;  %v4948_v44 = vpop.f32.mrf.mxu1 }
 0x74a   : > { %v6304_v43 = vpack.c.bf16 %v4996_v25, %v4995_v51  ;;  %v6344_v28 = vpack.c.bf16 %v5076_v21, %v5075_v29  ;;  %v4749_v30 = vadd.f32 %v4748_v13, %v8824_v47  ;;  %v4949_v23 = vadd.f32 %v4948_v44, %v4404_v27 }
 0x74b   : > { %v4752_v12 = vpop.f32.mrf.mxu0  ;;  %v4997_v57 = vmax.f32 %v4747_v5, 0.0  ;;  %v5077_v24 = vmax.f32 %v4947_v19, 0.0 }
 0x74c   : > { %6170 = vst [vmem:[%s8360_s17 + $0x168] sm:$0xff] %v6304_v43  ;;  %6210 = vst [vmem:[%s8360_s17 + $0x3e8] sm:$0xff] %v6344_v28  ;;  %v4753_v45 = vadd.f32 %v4752_v12, %v8826_v55  ;;  %v4998_v20 = vmax.f32 %v4749_v30, 0.0  ;;  %v5078_v6 = vmax.f32 %v4949_v23, 0.0 }
 0x74d   : > { %v4754_v11 = vpop.f32.mrf.mxu0 }
 0x74e   : > { %v4755_v9 = vadd.f32 %v4754_v11, %v8826_v55  ;;  %v6305_v41 = vpack.c.bf16 %v4998_v20, %v4997_v57  ;;  %v6345_v17 = vpack.c.bf16 %v5078_v6, %v5077_v24  ;;  %v4999_v47 = vmax.f32 %v4753_v45, 0.0 }
 0x74f   : > { %v4756_v62 = vpop.f32.mrf.mxu0 }
 0x750   : > { %v5000_v31 = vmax.f32 %v4755_v9, 0.0  ;;  %v4757_v16 = vadd.f32 %v4756_v62, %v8832_v50  ;;  %6171 = vst [vmem:[%s8360_s17 + $0x178] sm:$0xff] %v6305_v41  ;;  %6211 = vst [vmem:[%s8360_s17 + $0x3f8] sm:$0xff] %v6345_v17 }
 0x751   : > { %v4758_v3 = vpop.f32.mrf.mxu0 }
 0x752   : > { %v6306_v2 = vpack.c.bf16 %v5000_v31, %v4999_v47  ;;  %v4759_v15 = vadd.f32 %v4758_v3, %v8832_v50  ;;  %v5001_v22 = vmax.f32 %v4757_v16, 0.0 }
 0x753   : > { %v4762_v35 = vpop.f32.mrf.mxu0 }
 0x754   : > { %6172 = vst [vmem:[%s8360_s17 + $0x188] sm:$0xff] %v6306_v2  ;;  %v5002_v39 = vmax.f32 %v4759_v15, 0.0  ;;  %v4763_v55 = vadd.f32 %v4762_v35, %v8834_v0 }
 0x755   : > { %v4764_v33 = vpop.f32.mrf.mxu0 }
 0x756   : > { %v6307_v61 = vpack.c.bf16 %v5002_v39, %v5001_v22  ;;  %v4765_v10 = vadd.f32 %v4764_v33, %v8834_v0  ;;  %v5003_v1 = vmax.f32 %v4763_v55, 0.0 }
 0x757   : > { %v4766_v36 = vpop.f32.mrf.mxu0 }
 0x758   : > { %6173 = vst [vmem:[%s8360_s17 + $0x198] sm:$0xff] %v6307_v61  ;;  %v5004_v7 = vmax.f32 %v4765_v10, 0.0  ;;  %v4767_v34 = vadd.f32 %v4766_v36, %v8836_v52 }
 0x759   : > { %v4768_v8 = vpop.f32.mrf.mxu0 }
 0x75a   : > { %v6308_v50 = vpack.c.bf16 %v5004_v7, %v5003_v1  ;;  %v4769_v58 = vadd.f32 %v4768_v8, %v8836_v52  ;;  %v5005_v48 = vmax.f32 %v4767_v34, 0.0 }
 0x75b   : > { %v4772_v46 = vpop.f32.mrf.mxu0 }
 0x75c   : > { %6174 = vst [vmem:[%s8360_s17 + $0x1a8] sm:$0xff] %v6308_v50  ;;  %v5006_v4 = vmax.f32 %v4769_v58, 0.0  ;;  %v4773_v63 = vadd.f32 %v4772_v46, %v8838_v59 }
 0x75d   : > { %v4774_v53 = vpop.f32.mrf.mxu0 }
 0x75e   : > { %v6309_v0 = vpack.c.bf16 %v5006_v4, %v5005_v48  ;;  %v4775_v38 = vadd.f32 %v4774_v53, %v8838_v59  ;;  %v5007_v51 = vmax.f32 %v4773_v63, 0.0 }
 0x75f   : > { %v4776_v27 = vpop.f32.mrf.mxu0 }
 0x760   : > { %6175 = vst [vmem:[%s8360_s17 + $0x1b8] sm:$0xff] %v6309_v0  ;;  %v5008_v29 = vmax.f32 %v4775_v38, 0.0  ;;  %v4777_v25 = vadd.f32 %v4776_v27, %v8840_v18 }
 0x761   : > { %v4778_v21 = vpop.f32.mrf.mxu0 }
 0x762   : > { %v6310_v52 = vpack.c.bf16 %v5008_v29, %v5007_v51  ;;  %v4779_v5 = vadd.f32 %v4778_v21, %v8840_v18  ;;  %v5009_v13 = vmax.f32 %v4777_v25, 0.0 }
 0x763   : > { %v4782_v19 = vpop.f32.mrf.mxu0 }
 0x764   : > { %6176 = vst [vmem:[%s8360_s17 + $0x1c8] sm:$0xff] %v6310_v52  ;;  %v5010_v44 = vmax.f32 %v4779_v5, 0.0  ;;  %v4783_v43 = vadd.f32 %v4782_v19, %v8842_v56 }
 0x765   : > { %v4784_v28 = vpop.f32.mrf.mxu0 }
 0x766   : > { %v6311_v59 = vpack.c.bf16 %v5010_v44, %v5009_v13  ;;  %v4785_v30 = vadd.f32 %v4784_v28, %v8842_v56  ;;  %v5011_v12 = vmax.f32 %v4783_v43, 0.0 }
 0x767   : > { %v4786_v23 = vpop.f32.mrf.mxu0 }
 0x768   : > { %6177 = vst [vmem:[%s8360_s17 + $0x1d8] sm:$0xff] %v6311_v59  ;;  %v5012_v45 = vmax.f32 %v4785_v30, 0.0  ;;  %v4787_v57 = vadd.f32 %v4786_v23, %v8844_v40 }
 0x769   : > { %v4788_v24 = vpop.f32.mrf.mxu0 }
 0x76a   : > { %v6312_v18 = vpack.c.bf16 %v5012_v45, %v5011_v12  ;;  %v4789_v20 = vadd.f32 %v4788_v24, %v8844_v40  ;;  %v5013_v11 = vmax.f32 %v4787_v57, 0.0  ;;  %v5556_v24 = vld [vmem:[%s8360_s17 + $0x10] sm:$0xff] (%p6697_p5) }
 0x76b   : > { %v4792_v6 = vpop.f32.mrf.mxu0  ;;  %5557 = vst [vmem:[%s9022_s25 + $0x20] sm:$0xff] (%p6697_p5), %v5556_v24  ;;  %v5684_v24 = vld [vmem:[%s8360_s17 + $0x210] sm:$0xff] (%p6697_p5) }
 0x76c   : > { %6178 = vst [vmem:[%s8360_s17 + $0x1e8] sm:$0xff] %v6312_v18  ;;  %v5014_v9 = vmax.f32 %v4789_v20, 0.0  ;;  %v4793_v41 = vadd.f32 %v4792_v6, %v8846_v49  ;;  %v5558_v18 = vld [vmem:[%s8360_s17 + $0x18] sm:$0xff] (%p6697_p5)  ;;  %v5560_v20 = vld [vmem:[%s8360_s17 + $0x20] sm:$0xff] (%p6697_p5)  ;;  %v5562_v6 = vld [vmem:[%s8360_s17 + $0x28] sm:$0xff] (%p6697_p5) }
 0x76d   : > { %v4794_v17 = vpop.f32.mrf.mxu0  ;;  %5559 = vst [vmem:[%s9022_s25 + $0x28] sm:$0xff] (%p6697_p5), %v5558_v18  ;;  %5561 = vst [vmem:[%s9022_s25 + $0x40] sm:$0xff] (%p6697_p5), %v5560_v20  ;;  %v5688_v20 = vld [vmem:[%s8360_s17 + $0x220] sm:$0xff] (%p6697_p5) }
 0x76e   : > { %v6313_v56 = vpack.c.bf16 %v5014_v9, %v5013_v11  ;;  %v4795_v62 = vadd.f32 %v4794_v17, %v8846_v49  ;;  %v5015_v31 = vmax.f32 %v4793_v41, 0.0  ;;  %v5564_v11 = vld [vmem:[%s8360_s17 + $0x30] sm:$0xff] (%p6697_p5)  ;;  %v5566_v9 = vld [vmem:[%s8360_s17 + $0x38] sm:$0xff] (%p6697_p5)  ;;  %v5568_v41 = vld [vmem:[%s8360_s17 + $0x40] sm:$0xff] (%p6697_p5)  ;;  %5563 = vst [vmem:[%s9022_s25 + $0x48] sm:$0xff] (%p6697_p5), %v5562_v6 }
 0x76f   : > { %v4796_v47 = vpop.f32.mrf.mxu0  ;;  %v5570_v17 = vld [vmem:[%s8360_s17 + $0x48] sm:$0xff] (%p6697_p5)  ;;  %5565 = vst [vmem:[%s9022_s25 + $0x60] sm:$0xff] (%p6697_p5), %v5564_v11  ;;  %5567 = vst [vmem:[%s9022_s25 + $0x68] sm:$0xff] (%p6697_p5), %v5566_v9  ;;  %v5692_v11 = vld [vmem:[%s8360_s17 + $0x230] sm:$0xff] (%p6697_p5) }
 0x770   : > { %6179 = vst [vmem:[%s8360_s17 + $0x1f8] sm:$0xff] %v6313_v56  ;;  %v5016_v16 = vmax.f32 %v4795_v62, 0.0  ;;  %v4797_v3 = vadd.f32 %v4796_v47, %v8848_v14  ;;  %v5572_v56 = vld [vmem:[%s8360_s17 + $0x50] sm:$0xff] (%p6697_p5)  ;;  %v5574_v62 = vld [vmem:[%s8360_s17 + $0x58] sm:$0xff] (%p6697_p5)  ;;  %5569 = vst [vmem:[%s9022_s25 + $0x80] sm:$0xff] (%p6697_p5), %v5568_v41 }
 0x771   : > { %v4798_v2 = vpop.f32.mrf.mxu0  ;;  %5571 = vst [vmem:[%s9022_s25 + $0x88] sm:$0xff] (%p6697_p5), %v5570_v17  ;;  %5573 = vst [vmem:[%s9022_s25 + $0xa0] sm:$0xff] (%p6697_p5), %v5572_v56  ;;  %v5576_v47 = vld [vmem:[%s8360_s17 + $0x60] sm:$0xff] (%p6697_p5)  ;;  %v5700_v56 = vld [vmem:[%s8360_s17 + $0x250] sm:$0xff] (%p6697_p5) }
 0x772   : > { %v6314_v40 = vpack.c.bf16 %v5016_v16, %v5015_v31  ;;  %v4799_v15 = vadd.f32 %v4798_v2, %v8848_v14  ;;  %v5017_v22 = vmax.f32 %v4797_v3, 0.0  ;;  %5575 = vst [vmem:[%s9022_s25 + $0xa8] sm:$0xff] (%p6697_p5), %v5574_v62  ;;  %v5578_v31 = vld [vmem:[%s8360_s17 + $0x68] sm:$0xff] (%p6697_p5)  ;;  %v5580_v16 = vld [vmem:[%s8360_s17 + $0x70] sm:$0xff] (%p6697_p5)  ;;  %5577 = vst [vmem:[%s9022_s25 + $0xc0] sm:$0xff] (%p6697_p5), %v5576_v47 }
 0x773   : > { %v4802_v35 = vpop.f32.mrf.mxu0  ;;  %5579 = vst [vmem:[%s9022_s25 + $0xc8] sm:$0xff] (%p6697_p5), %v5578_v31  ;;  %5581 = vst [vmem:[%s9022_s25 + $0xe0] sm:$0xff] (%p6697_p5), %v5580_v16  ;;  %v5582_v3 = vld [vmem:[%s8360_s17 + $0x78] sm:$0xff] (%p6697_p5)  ;;  %v5584_v2 = vld [vmem:[%s8360_s17 + $0x80] sm:$0xff] (%p6697_p5) }
 0x774   : > { %6180 = vst [vmem:[%s8360_s17 + $0x208] sm:$0xff] %v6314_v40  ;;  %v5018_v39 = vmax.f32 %v4799_v15, 0.0  ;;  %v4803_v55 = vadd.f32 %v4802_v35, %v8850_v32  ;;  %v5586_v40 = vld [vmem:[%s8360_s17 + $0x88] sm:$0xff] (%p6697_p5)  ;;  %5583 = vst [vmem:[%s9022_s25 + $0xe8] sm:$0xff] (%p6697_p5), %v5582_v3  ;;  %v5588_v15 = vld [vmem:[%s8360_s17 + $0x90] sm:$0xff] (%p6697_p5) }
 0x775   : > { %v4804_v33 = vpop.f32.mrf.mxu0  ;;  %5585 = vst [vmem:[%s9022_s25 + $0x100] sm:$0xff] (%p6697_p5), %v5584_v2  ;;  %5587 = vst [vmem:[%s9022_s25 + $0x108] sm:$0xff] (%p6697_p5), %v5586_v40  ;;  %v5590_v35 = vld [vmem:[%s8360_s17 + $0x98] sm:$0xff] (%p6697_p5)  ;;  %v5696_v41 = vld [vmem:[%s8360_s17 + $0x240] sm:$0xff] (%p6697_p5) }
 0x776   : > { %v6315_v49 = vpack.c.bf16 %v5018_v39, %v5017_v22  ;;  %v4805_v61 = vadd.f32 %v4804_v33, %v8850_v32  ;;  %v5019_v36 = vmax.f32 %v4803_v55, 0.0  ;;  %v5592_v22 = vld [vmem:[%s8360_s17 + $0xa0] sm:$0xff] (%p6697_p5)  ;;  %5589 = vst [vmem:[%s9022_s25 + $0x120] sm:$0xff] (%p6697_p5), %v5588_v15  ;;  %5591 = vst [vmem:[%s9022_s25 + $0x128] sm:$0xff] (%p6697_p5), %v5590_v35  ;;  %v5594_v39 = vld [vmem:[%s8360_s17 + $0xa8] sm:$0xff] (%p6697_p5) }
 0x777   : > { %v4806_v10 = vpop.f32.mrf.mxu0  ;;  %5593 = vst [vmem:[%s9022_s25 + $0x140] sm:$0xff] (%p6697_p5), %v5592_v22  ;;  %v5596_v55 = vld [vmem:[%s8360_s17 + $0xb0] sm:$0xff] (%p6697_p5)  ;;  %v5598_v33 = vld [vmem:[%s8360_s17 + $0xb8] sm:$0xff] (%p6697_p5)  ;;  %5595 = vst [vmem:[%s9022_s25 + $0x148] sm:$0xff] (%p6697_p5), %v5594_v39 }
 0x778   : > { %6181 = vst [vmem:[%s8360_s17 + $0x218] sm:$0xff] %v6315_v49  ;;  %v5020_v1 = vmax.f32 %v4805_v61, 0.0  ;;  %v4807_v7 = vadd.f32 %v4806_v10, %v8852_v42  ;;  %5597 = vst [vmem:[%s9022_s25 + $0x160] sm:$0xff] (%p6697_p5), %v5596_v55  ;;  %v5600_v49 = vld [vmem:[%s8360_s17 + $0xc0] sm:$0xff] (%p6697_p5)  ;;  %v5602_v61 = vld [vmem:[%s8360_s17 + $0xc8] sm:$0xff] (%p6697_p5) }
 0x779   : > { %v4808_v34 = vpop.f32.mrf.mxu0  ;;  %5599 = vst [vmem:[%s9022_s25 + $0x168] sm:$0xff] (%p6697_p5), %v5598_v33  ;;  %v5604_v10 = vld [vmem:[%s8360_s17 + $0xd0] sm:$0xff] (%p6697_p5)  ;;  %5601 = vst [vmem:[%s9022_s25 + $0x180] sm:$0xff] (%p6697_p5), %v5600_v49  ;;  %v5704_v47 = vld [vmem:[%s8360_s17 + $0x260] sm:$0xff] (%p6697_p5) }
 0x77a   : > { %v6316_v14 = vpack.c.bf16 %v5020_v1, %v5019_v36  ;;  %v4809_v8 = vadd.f32 %v4808_v34, %v8852_v42  ;;  %v5021_v58 = vmax.f32 %v4807_v7, 0.0  ;;  %5603 = vst [vmem:[%s9022_s25 + $0x188] sm:$0xff] (%p6697_p5), %v5602_v61  ;;  %5605 = vst [vmem:[%s9022_s25 + $0x1a0] sm:$0xff] (%p6697_p5), %v5604_v10  ;;  %v5606_v36 = vld [vmem:[%s8360_s17 + $0xd8] sm:$0xff] (%p6697_p5)  ;;  %v5608_v1 = vld [vmem:[%s8360_s17 + $0xe0] sm:$0xff] (%p6697_p5) }
 0x77b   : > { %v4812_v50 = vpop.f32.mrf.mxu0  ;;  %v5610_v7 = vld [vmem:[%s8360_s17 + $0xe8] sm:$0xff] (%p6697_p5)  ;;  %5607 = vst [vmem:[%s9022_s25 + $0x1a8] sm:$0xff] (%p6697_p5), %v5606_v36  ;;  %5609 = vst [vmem:[%s9022_s25 + $0x1c0] sm:$0xff] (%p6697_p5), %v5608_v1  ;;  %v5612_v34 = vld [vmem:[%s8360_s17 + $0xf0] sm:$0xff] (%p6697_p5) }
 0x77c   : > { %6182 = vst [vmem:[%s8360_s17 + $0x228] sm:$0xff] %v6316_v14  ;;  %v5022_v46 = vmax.f32 %v4809_v8, 0.0  ;;  %v4813_v48 = vadd.f32 %v4812_v50, %v8854_v60  ;;  %5611 = vst [vmem:[%s9022_s25 + $0x1c8] sm:$0xff] (%p6697_p5), %v5610_v7  ;;  %v5614_v14 = vld [vmem:[%s8360_s17 + $0xf8] sm:$0xff] (%p6697_p5)  ;;  %v5616_v8 = vld [vmem:[%s8360_s17 + $0x100] sm:$0xff] (%p6697_p5) }
 0x77d   : > { %v4814_v4 = vpop.f32.mrf.mxu0  ;;  %5613 = vst [vmem:[%s9022_s25 + $0x1e0] sm:$0xff] (%p6697_p5), %v5612_v34  ;;  %5615 = vst [vmem:[%s9022_s25 + $0x1e8] sm:$0xff] (%p6697_p5), %v5614_v14  ;;  %v5618_v50 = vld [vmem:[%s8360_s17 + $0x108] sm:$0xff] (%p6697_p5)  ;;  %v5708_v16 = vld [vmem:[%s8360_s17 + $0x270] sm:$0xff] (%p6697_p5) }
 0x77e   : > { %v6317_v32 = vpack.c.bf16 %v5022_v46, %v5021_v58  ;;  %v4815_v63 = vadd.f32 %v4814_v4, %v8854_v60  ;;  %v5023_v0 = vmax.f32 %v4813_v48, 0.0  ;;  %5617 = vst [vmem:[%s9022_s25 + $0x200] sm:$0xff] (%p6697_p5), %v5616_v8  ;;  %v5620_v58 = vld [vmem:[%s8360_s17 + $0x110] sm:$0xff] (%p6697_p5)  ;;  %v5622_v46 = vld [vmem:[%s8360_s17 + $0x118] sm:$0xff] (%p6697_p5)  ;;  %5619 = vst [vmem:[%s9022_s25 + $0x208] sm:$0xff] (%p6697_p5), %v5618_v50 }
 0x77f   : > { %v4816_v53 = vpop.f32.mrf.mxu0  ;;  %5621 = vst [vmem:[%s9022_s25 + $0x220] sm:$0xff] (%p6697_p5), %v5620_v58  ;;  %5623 = vst [vmem:[%s9022_s25 + $0x228] sm:$0xff] (%p6697_p5), %v5622_v46  ;;  %v5624_v48 = vld [vmem:[%s8360_s17 + $0x120] sm:$0xff] (%p6697_p5)  ;;  %v5626_v4 = vld [vmem:[%s8360_s17 + $0x128] sm:$0xff] (%p6697_p5) }
 0x780   : > { %6183 = vst [vmem:[%s8360_s17 + $0x238] sm:$0xff] %v6317_v32  ;;  %v5024_v38 = vmax.f32 %v4815_v63, 0.0  ;;  %v4817_v27 = vadd.f32 %v4816_v53, %v8856_v54  ;;  %v5628_v32 = vld [vmem:[%s8360_s17 + $0x130] sm:$0xff] (%p6697_p5)  ;;  %5625 = vst [vmem:[%s9022_s25 + $0x240] sm:$0xff] (%p6697_p5), %v5624_v48  ;;  %v5630_v63 = vld [vmem:[%s8360_s17 + $0x138] sm:$0xff] (%p6697_p5) }
 0x781   : > { %v4818_v51 = vpop.f32.mrf.mxu0  ;;  %5627 = vst [vmem:[%s9022_s25 + $0x248] sm:$0xff] (%p6697_p5), %v5626_v4  ;;  %5629 = vst [vmem:[%s9022_s25 + $0x260] sm:$0xff] (%p6697_p5), %v5628_v32  ;;  %v5632_v53 = vld [vmem:[%s8360_s17 + $0x140] sm:$0xff] (%p6697_p5)  ;;  %v5686_v18 = vld [vmem:[%s8360_s17 + $0x218] sm:$0xff] (%p6697_p5) }
 0x782   : > { %v6318_v42 = vpack.c.bf16 %v5024_v38, %v5023_v0  ;;  %v4819_v29 = vadd.f32 %v4818_v51, %v8856_v54  ;;  %v5025_v21 = vmax.f32 %v4817_v27, 0.0  ;;  %v5634_v0 = vld [vmem:[%s8360_s17 + $0x148] sm:$0xff] (%p6697_p5)  ;;  %5631 = vst [vmem:[%s9022_s25 + $0x268] sm:$0xff] (%p6697_p5), %v5630_v63  ;;  %5633 = vst [vmem:[%s9022_s25 + $0x280] sm:$0xff] (%p6697_p5), %v5632_v53  ;;  %v5636_v38 = vld [vmem:[%s8360_s17 + $0x150] sm:$0xff] (%p6697_p5) }
 0x783   : > { %v4822_v25 = vpop.f32.mrf.mxu0  ;;  %5635 = vst [vmem:[%s9022_s25 + $0x288] sm:$0xff] (%p6697_p5), %v5634_v0  ;;  %v5638_v27 = vld [vmem:[%s8360_s17 + $0x158] sm:$0xff] (%p6697_p5)  ;;  %v5640_v51 = vld [vmem:[%s8360_s17 + $0x160] sm:$0xff] (%p6697_p5)  ;;  %5637 = vst [vmem:[%s9022_s25 + $0x2a0] sm:$0xff] (%p6697_p5), %v5636_v38 }
 0x784   : > { %6184 = vst [vmem:[%s8360_s17 + $0x248] sm:$0xff] %v6318_v42  ;;  %v5026_v52 = vmax.f32 %v4819_v29, 0.0  ;;  %v4823_v5 = vadd.f32 %v4822_v25, %v8858_v26  ;;  %5639 = vst [vmem:[%s9022_s25 + $0x2a8] sm:$0xff] (%p6697_p5), %v5638_v27  ;;  %v5642_v42 = vld [vmem:[%s8360_s17 + $0x168] sm:$0xff] (%p6697_p5)  ;;  %v5644_v29 = vld [vmem:[%s8360_s17 + $0x170] sm:$0xff] (%p6697_p5) }
 0x785   : > { %v4824_v60 = vpop.f32.mrf.mxu0  ;;  %5641 = vst [vmem:[%s9022_s25 + $0x2c0] sm:$0xff] (%p6697_p5), %v5640_v51  ;;  %v5646_v25 = vld [vmem:[%s8360_s17 + $0x178] sm:$0xff] (%p6697_p5)  ;;  %5643 = vst [vmem:[%s9022_s25 + $0x2c8] sm:$0xff] (%p6697_p5), %v5642_v42  ;;  %v5690_v6 = vld [vmem:[%s8360_s17 + $0x228] sm:$0xff] (%p6697_p5) }
 0x786   : > { %v6319_v19 = vpack.c.bf16 %v5026_v52, %v5025_v21  ;;  %v4825_v13 = vadd.f32 %v4824_v60, %v8858_v26  ;;  %v5027_v43 = vmax.f32 %v4823_v5, 0.0  ;;  %v5552_v26 = vld [vmem:[%s8360_s17] sm:$0xff] (%p6697_p5)  ;;  %5645 = vst [vmem:[%s9022_s25 + $0x2e0] sm:$0xff] (%p6697_p5), %v5644_v29  ;;  %5647 = vst [vmem:[%s9022_s25 + $0x2e8] sm:$0xff] (%p6697_p5), %v5646_v25  ;;  %v5650_v52 = vld [vmem:[%s8360_s17 + $0x188] sm:$0xff] (%p6697_p5) }
 0x787   : > { %v4826_v44 = vpop.f32.mrf.mxu0  ;;  %5553 = vst [vmem:[%s9022_s25] sm:$0xff] (%p6697_p5), %v5552_v26  ;;  %v5648_v21 = vld [vmem:[%s8360_s17 + $0x180] sm:$0xff] (%p6697_p5)  ;;  %v5652_v5 = vld [vmem:[%s8360_s17 + $0x190] sm:$0xff] (%p6697_p5)  ;;  %5651 = vst [vmem:[%s9022_s25 + $0x308] sm:$0xff] (%p6697_p5), %v5650_v52 }
 0x788   : > { %6185 = vst [vmem:[%s8360_s17 + $0x258] sm:$0xff] %v6319_v19  ;;  %v5028_v28 = vmax.f32 %v4825_v13, 0.0  ;;  %v4827_v59 = vadd.f32 %v4826_v44, %v8860_v37  ;;  %5649 = vst [vmem:[%s9022_s25 + $0x300] sm:$0xff] (%p6697_p5), %v5648_v21  ;;  %v5654_v60 = vld [vmem:[%s8360_s17 + $0x198] sm:$0xff] (%p6697_p5)  ;;  %v5656_v19 = vld [vmem:[%s8360_s17 + $0x1a0] sm:$0xff] (%p6697_p5) }
 0x789   : > { %v4828_v30 = vpop.f32.mrf.mxu0  ;;  %5653 = vst [vmem:[%s9022_s25 + $0x320] sm:$0xff] (%p6697_p5), %v5652_v5  ;;  %v5658_v13 = vld [vmem:[%s8360_s17 + $0x1a8] sm:$0xff] (%p6697_p5)  ;;  %5655 = vst [vmem:[%s9022_s25 + $0x328] sm:$0xff] (%p6697_p5), %v5654_v60  ;;  %v5660_v44 = vld [vmem:[%s8360_s17 + $0x1b0] sm:$0xff] (%p6697_p5) }
 0x78a   : > { %v6320_v54 = vpack.c.bf16 %v5028_v28, %v5027_v43  ;;  %v4829_v23 = vadd.f32 %v4828_v30, %v8860_v37  ;;  %v5029_v12 = vmax.f32 %v4827_v59, 0.0  ;;  %v5554_v37 = vld [vmem:[%s8360_s17 + $0x8] sm:$0xff] (%p6697_p5)  ;;  %5657 = vst [vmem:[%s9022_s25 + $0x340] sm:$0xff] (%p6697_p5), %v5656_v19  ;;  %5659 = vst [vmem:[%s9022_s25 + $0x348] sm:$0xff] (%p6697_p5), %v5658_v13  ;;  %v5662_v43 = vld [vmem:[%s8360_s17 + $0x1b8] sm:$0xff] (%p6697_p5) }
 0x78b   : > { %5555 = vst [vmem:[%s9022_s25 + $0x8] sm:$0xff] (%p6697_p5), %v5554_v37  ;;  %v5664_v28 = vld [vmem:[%s8360_s17 + $0x1c0] sm:$0xff] (%p6697_p5)  ;;  %5661 = vst [vmem:[%s9022_s25 + $0x360] sm:$0xff] (%p6697_p5), %v5660_v44  ;;  %v5666_v59 = vld [vmem:[%s8360_s17 + $0x1c8] sm:$0xff] (%p6697_p5) }
 0x78c   : > { %6186 = vst [vmem:[%s8360_s17 + $0x268] sm:$0xff] %v6320_v54  ;;  %v5030_v45 = vmax.f32 %v4829_v23, 0.0  ;;  %5534 = sbr.rel (!%p6697_p5) target bundleno = 1970 (0x7b2), region = 68  ;;  %5663 = vst [vmem:[%s9022_s25 + $0x368] sm:$0xff] (%p6697_p5), %v5662_v43  ;;  %v5668_v30 = vld [vmem:[%s8360_s17 + $0x1d0] sm:$0xff] (%p6697_p5)  ;;  %v5670_v54 = vld [vmem:[%s8360_s17 + $0x1d8] sm:$0xff] (%p6697_p5) }
 0x78d   : > { %5665 = vst [vmem:[%s9022_s25 + $0x380] sm:$0xff] (%p6697_p5), %v5664_v28  ;;  %5667 = vst [vmem:[%s9022_s25 + $0x388] sm:$0xff] (%p6697_p5), %v5666_v59  ;;  %v5672_v23 = vld [vmem:[%s8360_s17 + $0x1e0] sm:$0xff] (%p6697_p5)  ;;  %v5682_v37 = vld [vmem:[%s8360_s17 + $0x208] sm:$0xff] (%p6697_p5) }
 0x78e   : > { %v6321_v57 = vpack.c.bf16 %v5030_v45, %v5029_v12  ;;  %5669 = vst [vmem:[%s9022_s25 + $0x3a0] sm:$0xff] (%p6697_p5), %v5668_v30  ;;  %5671 = vst [vmem:[%s9022_s25 + $0x3a8] sm:$0xff] (%p6697_p5), %v5670_v54  ;;  %v5674_v12 = vld [vmem:[%s8360_s17 + $0x1e8] sm:$0xff] (%p6697_p5)  ;;  %v5676_v45 = vld [vmem:[%s8360_s17 + $0x1f0] sm:$0xff] (%p6697_p5) }
 0x78f   : > { %5673 = vst [vmem:[%s9022_s25 + $0x3c0] sm:$0xff] (%p6697_p5), %v5672_v23  ;;  %5675 = vst [vmem:[%s9022_s25 + $0x3c8] sm:$0xff] (%p6697_p5), %v5674_v12  ;;  %v5680_v26 = vld [vmem:[%s8360_s17 + $0x200] sm:$0xff] (%p6697_p5)  ;;  %v5694_v9 = vld [vmem:[%s8360_s17 + $0x238] sm:$0xff] (%p6697_p5) }
 0x790   : > { %6187 = vst [vmem:[%s8360_s17 + $0x278] sm:$0xff] %v6321_v57  ;;  %5677 = vst [vmem:[%s9022_s25 + $0x3e0] sm:$0xff] (%p6697_p5), %v5676_v45  ;;  %v5678_v57 = vld [vmem:[%s8360_s17 + $0x1f8] sm:$0xff] (%p6697_p5)  ;;  %v5698_v17 = vld [vmem:[%s8360_s17 + $0x248] sm:$0xff] (%p6697_p5) }
 0x791   : > { %5679 = vst [vmem:[%s9022_s25 + $0x3e8] sm:$0xff] %v5678_v57  ;;  %5681 = vst [vmem:[%s9022_s25 + $0x400] sm:$0xff] %v5680_v26  ;;  %v5702_v62 = vld [vmem:[%s8360_s17 + $0x258] sm:$0xff]  ;;  %v5712_v2 = vld [vmem:[%s8360_s17 + $0x280] sm:$0xff] }
 0x792   : > { %5683 = vst [vmem:[%s9022_s25 + $0x408] sm:$0xff] %v5682_v37  ;;  %5685 = vst [vmem:[%s9022_s25 + $0x420] sm:$0xff] %v5684_v24  ;;  %v5714_v40 = vld [vmem:[%s8360_s17 + $0x288] sm:$0xff]  ;;  %v5716_v15 = vld [vmem:[%s8360_s17 + $0x290] sm:$0xff] }
 0x793   : > { %5687 = vst [vmem:[%s9022_s25 + $0x428] sm:$0xff] %v5686_v18  ;;  %5689 = vst [vmem:[%s9022_s25 + $0x440] sm:$0xff] %v5688_v20  ;;  %v5706_v31 = vld [vmem:[%s8360_s17 + $0x268] sm:$0xff]  ;;  %v5718_v35 = vld [vmem:[%s8360_s17 + $0x298] sm:$0xff] }
 0x794   : > { %5691 = vst [vmem:[%s9022_s25 + $0x448] sm:$0xff] %v5690_v6  ;;  %5693 = vst [vmem:[%s9022_s25 + $0x460] sm:$0xff] %v5692_v11  ;;  %v5720_v22 = vld [vmem:[%s8360_s17 + $0x2a0] sm:$0xff]  ;;  %v5722_v39 = vld [vmem:[%s8360_s17 + $0x2a8] sm:$0xff] }
 0x795   : > { %5695 = vst [vmem:[%s9022_s25 + $0x468] sm:$0xff] %v5694_v9  ;;  %5697 = vst [vmem:[%s9022_s25 + $0x480] sm:$0xff] %v5696_v41  ;;  %v5724_v55 = vld [vmem:[%s8360_s17 + $0x2b0] sm:$0xff]  ;;  %v5726_v33 = vld [vmem:[%s8360_s17 + $0x2b8] sm:$0xff] }
 0x796   : > { %5699 = vst [vmem:[%s9022_s25 + $0x488] sm:$0xff] %v5698_v17  ;;  %5701 = vst [vmem:[%s9022_s25 + $0x4a0] sm:$0xff] %v5700_v56  ;;  %v5728_v49 = vld [vmem:[%s8360_s17 + $0x2c0] sm:$0xff]  ;;  %v5730_v61 = vld [vmem:[%s8360_s17 + $0x2c8] sm:$0xff] }
 0x797   : > { %5703 = vst [vmem:[%s9022_s25 + $0x4a8] sm:$0xff] %v5702_v62  ;;  %5705 = vst [vmem:[%s9022_s25 + $0x4c0] sm:$0xff] %v5704_v47  ;;  %v5710_v3 = vld [vmem:[%s8360_s17 + $0x278] sm:$0xff]  ;;  %v5732_v10 = vld [vmem:[%s8360_s17 + $0x2d0] sm:$0xff] }
 0x798   : > { %5707 = vst [vmem:[%s9022_s25 + $0x4c8] sm:$0xff] %v5706_v31  ;;  %5709 = vst [vmem:[%s9022_s25 + $0x4e0] sm:$0xff] %v5708_v16  ;;  %v5734_v36 = vld [vmem:[%s8360_s17 + $0x2d8] sm:$0xff]  ;;  %v5736_v1 = vld [vmem:[%s8360_s17 + $0x2e0] sm:$0xff] }
 0x799   : > { %5711 = vst [vmem:[%s9022_s25 + $0x4e8] sm:$0xff] %v5710_v3  ;;  %5713 = vst [vmem:[%s9022_s25 + $0x500] sm:$0xff] %v5712_v2  ;;  %v5738_v7 = vld [vmem:[%s8360_s17 + $0x2e8] sm:$0xff]  ;;  %v5740_v34 = vld [vmem:[%s8360_s17 + $0x2f0] sm:$0xff] }
 0x79a   : > { %5715 = vst [vmem:[%s9022_s25 + $0x508] sm:$0xff] %v5714_v40  ;;  %5717 = vst [vmem:[%s9022_s25 + $0x520] sm:$0xff] %v5716_v15  ;;  %v5742_v14 = vld [vmem:[%s8360_s17 + $0x2f8] sm:$0xff]  ;;  %v5744_v8 = vld [vmem:[%s8360_s17 + $0x300] sm:$0xff] }
 0x79b   : > { %5719 = vst [vmem:[%s9022_s25 + $0x528] sm:$0xff] %v5718_v35  ;;  %5721 = vst [vmem:[%s9022_s25 + $0x540] sm:$0xff] %v5720_v22  ;;  %v5746_v50 = vld [vmem:[%s8360_s17 + $0x308] sm:$0xff]  ;;  %v5748_v58 = vld [vmem:[%s8360_s17 + $0x310] sm:$0xff] }
 0x79c   : > { %5723 = vst [vmem:[%s9022_s25 + $0x548] sm:$0xff] %v5722_v39  ;;  %5725 = vst [vmem:[%s9022_s25 + $0x560] sm:$0xff] %v5724_v55  ;;  %v5750_v46 = vld [vmem:[%s8360_s17 + $0x318] sm:$0xff]  ;;  %v5752_v48 = vld [vmem:[%s8360_s17 + $0x320] sm:$0xff] }
 0x79d   : > { %5727 = vst [vmem:[%s9022_s25 + $0x568] sm:$0xff] %v5726_v33  ;;  %5729 = vst [vmem:[%s9022_s25 + $0x580] sm:$0xff] %v5728_v49  ;;  %v5754_v4 = vld [vmem:[%s8360_s17 + $0x328] sm:$0xff]  ;;  %v5756_v32 = vld [vmem:[%s8360_s17 + $0x330] sm:$0xff] }
 0x79e   : > { %5731 = vst [vmem:[%s9022_s25 + $0x588] sm:$0xff] %v5730_v61  ;;  %5733 = vst [vmem:[%s9022_s25 + $0x5a0] sm:$0xff] %v5732_v10  ;;  %v5758_v63 = vld [vmem:[%s8360_s17 + $0x338] sm:$0xff]  ;;  %v5760_v53 = vld [vmem:[%s8360_s17 + $0x340] sm:$0xff] }
 0x79f   : > { %5735 = vst [vmem:[%s9022_s25 + $0x5a8] sm:$0xff] %v5734_v36  ;;  %5737 = vst [vmem:[%s9022_s25 + $0x5c0] sm:$0xff] %v5736_v1  ;;  %v5762_v0 = vld [vmem:[%s8360_s17 + $0x348] sm:$0xff]  ;;  %v5764_v38 = vld [vmem:[%s8360_s17 + $0x350] sm:$0xff] }
 0x7a0   : > { %5739 = vst [vmem:[%s9022_s25 + $0x5c8] sm:$0xff] %v5738_v7  ;;  %5741 = vst [vmem:[%s9022_s25 + $0x5e0] sm:$0xff] %v5740_v34  ;;  %v5766_v27 = vld [vmem:[%s8360_s17 + $0x358] sm:$0xff]  ;;  %v5768_v51 = vld [vmem:[%s8360_s17 + $0x360] sm:$0xff] }
 0x7a1   : > { %5743 = vst [vmem:[%s9022_s25 + $0x5e8] sm:$0xff] %v5742_v14  ;;  %5745 = vst [vmem:[%s9022_s25 + $0x600] sm:$0xff] %v5744_v8  ;;  %v5770_v42 = vld [vmem:[%s8360_s17 + $0x368] sm:$0xff]  ;;  %v5772_v29 = vld [vmem:[%s8360_s17 + $0x370] sm:$0xff] }
 0x7a2   : > { %5747 = vst [vmem:[%s9022_s25 + $0x608] sm:$0xff] %v5746_v50  ;;  %5749 = vst [vmem:[%s9022_s25 + $0x620] sm:$0xff] %v5748_v58  ;;  %v5774_v25 = vld [vmem:[%s8360_s17 + $0x378] sm:$0xff]  ;;  %v5776_v21 = vld [vmem:[%s8360_s17 + $0x380] sm:$0xff] }
 0x7a3   : > { %5751 = vst [vmem:[%s9022_s25 + $0x628] sm:$0xff] %v5750_v46  ;;  %5753 = vst [vmem:[%s9022_s25 + $0x640] sm:$0xff] %v5752_v48  ;;  %v5778_v52 = vld [vmem:[%s8360_s17 + $0x388] sm:$0xff]  ;;  %v5780_v5 = vld [vmem:[%s8360_s17 + $0x390] sm:$0xff] }
 0x7a4   : > { %5755 = vst [vmem:[%s9022_s25 + $0x648] sm:$0xff] %v5754_v4  ;;  %5757 = vst [vmem:[%s9022_s25 + $0x660] sm:$0xff] %v5756_v32  ;;  %v5782_v60 = vld [vmem:[%s8360_s17 + $0x398] sm:$0xff]  ;;  %v5784_v19 = vld [vmem:[%s8360_s17 + $0x3a0] sm:$0xff] }
 0x7a5   : > { %5759 = vst [vmem:[%s9022_s25 + $0x668] sm:$0xff] %v5758_v63  ;;  %5761 = vst [vmem:[%s9022_s25 + $0x680] sm:$0xff] %v5760_v53  ;;  %v5786_v13 = vld [vmem:[%s8360_s17 + $0x3a8] sm:$0xff]  ;;  %v5788_v44 = vld [vmem:[%s8360_s17 + $0x3b0] sm:$0xff] }
 0x7a6   : > { %5763 = vst [vmem:[%s9022_s25 + $0x688] sm:$0xff] %v5762_v0  ;;  %5765 = vst [vmem:[%s9022_s25 + $0x6a0] sm:$0xff] %v5764_v38  ;;  %v5790_v43 = vld [vmem:[%s8360_s17 + $0x3b8] sm:$0xff]  ;;  %v5792_v28 = vld [vmem:[%s8360_s17 + $0x3c0] sm:$0xff] }
 0x7a7   : > { %5767 = vst [vmem:[%s9022_s25 + $0x6a8] sm:$0xff] %v5766_v27  ;;  %5769 = vst [vmem:[%s9022_s25 + $0x6c0] sm:$0xff] %v5768_v51  ;;  %v5794_v59 = vld [vmem:[%s8360_s17 + $0x3c8] sm:$0xff]  ;;  %v5796_v30 = vld [vmem:[%s8360_s17 + $0x3d0] sm:$0xff] }
 0x7a8   : > { %5771 = vst [vmem:[%s9022_s25 + $0x6c8] sm:$0xff] %v5770_v42  ;;  %5773 = vst [vmem:[%s9022_s25 + $0x6e0] sm:$0xff] %v5772_v29  ;;  %v5798_v54 = vld [vmem:[%s8360_s17 + $0x3d8] sm:$0xff]  ;;  %v5800_v23 = vld [vmem:[%s8360_s17 + $0x3e0] sm:$0xff] }
 0x7a9   : > { %5775 = vst [vmem:[%s9022_s25 + $0x6e8] sm:$0xff] %v5774_v25  ;;  %5777 = vst [vmem:[%s9022_s25 + $0x700] sm:$0xff] %v5776_v21  ;;  %v5802_v12 = vld [vmem:[%s8360_s17 + $0x3e8] sm:$0xff]  ;;  %v5804_v45 = vld [vmem:[%s8360_s17 + $0x3f0] sm:$0xff] }
 0x7aa   : > { %5779 = vst [vmem:[%s9022_s25 + $0x708] sm:$0xff] %v5778_v52  ;;  %5781 = vst [vmem:[%s9022_s25 + $0x720] sm:$0xff] %v5780_v5  ;;  %v5806_v57 = vld [vmem:[%s8360_s17 + $0x3f8] sm:$0xff] }
 0x7ab   : > { %5783 = vst [vmem:[%s9022_s25 + $0x728] sm:$0xff] %v5782_v60  ;;  %5785 = vst [vmem:[%s9022_s25 + $0x740] sm:$0xff] %v5784_v19 }
 0x7ac   : > { %5787 = vst [vmem:[%s9022_s25 + $0x748] sm:$0xff] %v5786_v13  ;;  %5789 = vst [vmem:[%s9022_s25 + $0x760] sm:$0xff] %v5788_v44 }
 0x7ad   : > { %5791 = vst [vmem:[%s9022_s25 + $0x768] sm:$0xff] %v5790_v43  ;;  %5793 = vst [vmem:[%s9022_s25 + $0x780] sm:$0xff] %v5792_v28 }
 0x7ae   : > { %5795 = vst [vmem:[%s9022_s25 + $0x788] sm:$0xff] %v5794_v59  ;;  %5797 = vst [vmem:[%s9022_s25 + $0x7a0] sm:$0xff] %v5796_v30 }
 0x7af   : > { %5799 = vst [vmem:[%s9022_s25 + $0x7a8] sm:$0xff] %v5798_v54  ;;  %5801 = vst [vmem:[%s9022_s25 + $0x7c0] sm:$0xff] %v5800_v23 }
 0x7b0   : > { %5803 = vst [vmem:[%s9022_s25 + $0x7c8] sm:$0xff] %v5802_v12  ;;  %5805 = vst [vmem:[%s9022_s25 + $0x7e0] sm:$0xff] %v5804_v45 }
 0x7b1   : > { %5807 = vst [vmem:[%s9022_s25 + $0x7e8] sm:$0xff] %v5806_v57 }
 0x7b2 PF: > { %s21_s23 = sadd.s32 1, %s6586_s23   ;;  %s9617_s16 = sld [smem:[#allocation3_spill]] }
 0x7b3   : > { %p18_p11 = scmp.ge.s32.totalorder %s21_s23, 6   ;;  %s9618_s12 = sld [smem:[#allocation4_spill]] }
 0x7b4   : > { %s9619_s17 = smov %s6566_s18  ;;  %s9620_s18 = smov %s6708_s13 }
 0x7b5   : > { %s9621_s19 = smov %s6578_s21  ;;  %s9622_s20 = smov %s6582_s22 }
 0x7b6   :  { %20 = sbr.rel (!%p18_p11) target bundleno = 4 (0x4), region = 119 }
 0x7b8   : > { %s9623_s21 = smov %s9617_s16 }
 0x7b9   : > { %s9624_s22 = smov %s9618_s12 }

</bundles_post_ra>
